<compile_context>
chip_gen: v6e
topology: v6e:2x2x1
jax: 0.10.0
libtpu: 0.0.40
codegen_flags: <defaults>
</compile_context>

<pallas_src>
import jax
import jax.numpy as jnp
from jax.experimental import pallas as pl
from jax.experimental.pallas import tpu as pltpu

IN_EPS = 1e-3   # nn.InstanceNorm2d(eps=0.001)
BN_EPS = 1e-5   # nn.BatchNorm2d default eps
_BF16 = jnp.bfloat16


# --------------------------------------------------------------------------- math ---

def _instnorm(x, eps=IN_EPS):
    """InstanceNorm2d (affine=False): normalize over the points axis (-2) per channel."""
    mu = jnp.mean(x, axis=-2, keepdims=True)
    msq = jnp.mean(x * x, axis=-2, keepdims=True)
    var = jnp.maximum(msq - mu * mu, 0.0)
    return (x - mu) * jax.lax.rsqrt(var + eps)


def _affine(x, sb):
    """Pre-folded BatchNorm along the channel (last / lane) axis.  sb: [2, C]."""
    return x * sb[0:1] + sb[1:2]


def _mm(x, w):
    """[..., Cin] @ [Cin, Cout] on the MXU: bf16 operands, f32 accumulation."""
    lead = x.shape[:-1]
    y = jnp.dot(x.reshape(-1, x.shape[-1]).astype(_BF16), w,
                preferred_element_type=jnp.float32)
    return y.reshape(lead + (w.shape[-1],))


def _forward_block(X, p):
    """GlobalClusterLayer forward for a block of batch elements.  X: [Bt, N, C] f32."""
    Bt = X.shape[0]

    X_bf = X.astype(_BF16)
    Xn = _instnorm(X)                       # shared by the DiffPool / DiffUnpool embeddings

    # ---- DiffPool: IN -> BN -> ReLU -> Conv(C->K); softmax over points; X^T-weighted pool ----
    h = jnp.maximum(_affine(Xn, p["sb_d"]), 0.0)
    e = _mm(h, p["Wd"])                                  # [Bt, N, K]; conv bias dropped
    e = e - jnp.max(e, axis=1, keepdims=True)            # (softmax over N is shift-invariant)
    ex = jnp.exp(e)
    S_down = ex / jnp.sum(ex, axis=1, keepdims=True)     # softmax over the N points
    D = jnp.stack([jnp.dot(S_down[b].T.astype(_BF16), X_bf[b],
                           preferred_element_type=jnp.float32)
                   for b in range(Bt)])                  # [Bt, K, C]

    # ---- OAFilter on the K clusters (channels=C, points=K) ----
    h1 = jnp.maximum(_affine(_instnorm(D), p["sb1"]), 0.0)
    o1 = _mm(h1, p["W1"]) + p["b1"]                      # [Bt, K, C] (trans(1,2) is layout-only)
    h2 = jnp.maximum(o1 * p["sb2"][:, 0:1] + p["sb2"][:, 1:2], 0.0).astype(_BF16)
    c2 = jnp.stack([jnp.dot(p["W2"], h2[b], preferred_element_type=jnp.float32)
                    for b in range(Bt)]) + p["b2"]       # conv over the K ("points") axis
    o2 = o1 + c2
    h3 = jnp.maximum(_affine(_instnorm(o2), p["sb3"]), 0.0)
    Dp = _mm(h3, p["W3"]) + p["b3"] + D                  # [Bt, K, C]
    Dp_bf = Dp.astype(_BF16)

    # ---- DiffUnpool: IN -> BN -> ReLU -> Conv(C->K); softmax over clusters; unpool ----
    hu = jnp.maximum(_affine(Xn, p["sb_u"]), 0.0)
    eu = _mm(hu, p["Wu"]) + p["bu"]                      # [Bt, N, K]
    eu = eu - jnp.max(eu, axis=-1, keepdims=True)
    exu = jnp.exp(eu)
    S_up = (exu / jnp.sum(exu, axis=-1, keepdims=True)).astype(_BF16)
    U = jnp.stack([jnp.dot(S_up[b], Dp_bf[b], preferred_element_type=jnp.float32)
                   for b in range(Bt)])                  # [Bt, N, C]

    # ---- global_mlp (Conv2d(128,1)): constant over points, so it only reaches the
    #      output through the PointCN shortcut conv (its bias bg is folded into bs) ----
    g_row = jnp.sum(Dp * p["Wg"], axis=-1)                               # [Bt, K]
    gw = jnp.dot(g_row.astype(_BF16), p["Ws_bot"],
                 preferred_element_type=jnp.float32)                     # [Bt, 128]

    # ---- PointCN(256 -> 128): concat eliminated algebraically (the constant global-
    #      feature channels are zeroed by IN; their conv1 contribution, like bc1,
    #      cancels in the second IN) ----
    ha = jnp.maximum(_affine(_instnorm(U), p["sb_a"]), 0.0)
    oa = _mm(ha, p["Wc1"])
    hb = jnp.maximum(_affine(_instnorm(oa), p["sb_b"]), 0.0)
    ob = _mm(hb, p["Wc2"]) + p["bc2"]
    sc = _mm(U, p["Ws_top"]) + p["bs"] + gw[:, None, :]                  # shortcut conv
    return ob + sc


# ------------------------------------------------------------------------- kernel ---

PREP_NAMES = ("sb_d", "Wd",
              "sb1", "W1", "b1", "sb2", "W2", "b2", "sb3", "W3", "b3",
              "sb_u", "Wu", "bu",
              "Wg",
              "sb_a", "Wc1", "sb_b", "Wc2", "bc2", "Ws_top", "Ws_bot", "bs")


def _kernel(x_ref, *refs):
    param_refs, out_ref = refs[:-1], refs[-1]
    p = {name: r[...] for name, r in zip(PREP_NAMES, param_refs)}
    out_ref[...] = _forward_block(x_ref[...], p)


def _fold_bn(bn4, eps=BN_EPS):
    """[4, d] = (gamma, beta, running_mean, running_var)  ->  [2, d] = (scale, bias)."""
    scale = bn4[0] * jax.lax.rsqrt(bn4[3] + eps)
    return jnp.stack([scale, bn4[1] - bn4[2] * scale], axis=0)


def prepare_params(params):
    """Fold inference-mode BN, split/fold the concat-related weights, cast MXU weights to bf16."""
    p = params
    C, K = p["Wd"].shape
    Ws_top, Ws_bot = p["Ws"][:C], p["Ws"][C:]
    return dict(
        sb_d=_fold_bn(p["bn_d"]), Wd=p["Wd"].astype(_BF16),                   # bd dropped
        sb1=_fold_bn(p["bn1"]), W1=p["W1"].astype(_BF16), b1=p["b1"],
        sb2=_fold_bn(p["bn2"]).T, W2=p["W2"].astype(_BF16), b2=p["b2"].reshape(K, 1),
        sb3=_fold_bn(p["bn3"]), W3=p["W3"].astype(_BF16), b3=p["b3"],
        sb_u=_fold_bn(p["bn_u"]), Wu=p["Wu"].astype(_BF16), bu=p["bu"],
        Wg=p["Wg"],
        sb_a=_fold_bn(p["bn_a"])[:, :C], Wc1=p["Wc1"][:C].astype(_BF16),      # bc1 dropped
        sb_b=_fold_bn(p["bn_b"]), Wc2=p["Wc2"].astype(_BF16), bc2=p["bc2"],
        Ws_top=Ws_top.astype(_BF16), Ws_bot=Ws_bot.astype(_BF16),
        bs=p["bs"] + p["bg"][0, 0] * jnp.sum(Ws_bot, axis=0, keepdims=True),  # bg folded
    )


def _pick_block_batch(B, N):
    """Batch elements per grid step: fill ~256 MXU rows, keep >=2 parallel steps (v7x 2 TCs)."""
    bt = max(1, min(B, pl.cdiv(256, N)))
    if B >= 2:
        bt = max(1, min(bt, B // 2))
    while B % bt:
        bt -= 1
    return bt


def global_cluster_layer(feats, params, block_batch=None):
    """feats: NCHW [B, C, N, 1] float32  ->  NCHW [B, 128, N, 1] float32."""
    B, C, N, W = feats.shape
    assert W == 1
    x = jnp.transpose(feats[..., 0], (0, 2, 1)).astype(jnp.float32)       # [B, N, C]
    prep = prepare_params(params)
    plist = [prep[n] for n in PREP_NAMES]
    F = prep["Wc2"].shape[1]

    bt = block_batch if block_batch is not None else _pick_block_batch(B, N)

    in_specs = [pl.BlockSpec((bt, N, C), lambda b: (b, 0, 0))]
    in_specs += [pl.BlockSpec(v.shape, lambda b: (0, 0)) for v in plist]  # all params 2-D
    out_specs = pl.BlockSpec((bt, N, F), lambda b: (b, 0, 0))

    out = pl.pallas_call(
        _kernel,
        out_shape=jax.ShapeDtypeStruct((B, N, F), jnp.float32),
        grid=(B // bt,),
        in_specs=in_specs,
        out_specs=out_specs,
        compiler_params=pltpu.CompilerParams(dimension_semantics=("parallel",)),
    )(x, *plist)
    return jnp.transpose(out, (0, 2, 1))[..., None]                        # [B, 128, N, 1]


# --------------------------------------------------------------------- f32 reference ---

def _reference_forward(x, params):
    """Full-precision, UN-simplified pure-JAX reference of the PyTorch forward (eval mode).

    x: [B, N, C] float32 (points-major).  Keeps every bias, the global-feature repeat and
    the [.,256] channel concat, so it also validates the kernel's algebraic eliminations.
    """
    P = jax.lax.Precision.HIGHEST
    p = params
    B, N, C = x.shape
    K = p["Wd"].shape[1]

    def bn(t, bn4, eps=BN_EPS):                       # channel (last-axis) BatchNorm, eval mode
        scale = bn4[0] / jnp.sqrt(bn4[3] + eps)
        return (t - bn4[2]) * scale + bn4[1]

    def inorm(t, eps=IN_EPS):                         # InstanceNorm over points (axis=-2)
        mu = jnp.mean(t, axis=-2, keepdims=True)
        var = jnp.mean((t - mu) ** 2, axis=-2, keepdims=True)
        return (t - mu) / jnp.sqrt(var + eps)

    relu = lambda t: jnp.maximum(t, 0.0)

    # DiffPool
    h = relu(bn(inorm(x), p["bn_d"]))
    e = jnp.einsum("bnc,ck->bnk", h, p["Wd"], precision=P) + p["bd"]
    S_down = jax.nn.softmax(e, axis=1)                                    # softmax over the N points
    D = jnp.einsum("bnk,bnc->bkc", S_down, x, precision=P)                # [B, K, C]

    # OAFilter (channels=C, points=K)
    h1 = relu(bn(inorm(D), p["bn1"]))
    o1 = jnp.einsum("bkc,cd->bkd", h1, p["W1"], precision=P) + p["b1"]    # [B, K, C]
    s2 = p["bn2"][0] / jnp.sqrt(p["bn2"][3] + BN_EPS)                     # BN over the K axis
    h2 = relu((o1 - p["bn2"][2][:, None]) * s2[:, None] + p["bn2"][1][:, None])
    c2 = jnp.einsum("pk,bkc->bpc", p["W2"], h2, precision=P) + p["b2"][None]
    o2 = o1 + c2
    h3 = relu(bn(inorm(o2), p["bn3"]))
    Dp = jnp.einsum("bkc,cd->bkd", h3, p["W3"], precision=P) + p["b3"] + D

    # DiffUnpool
    hu = relu(bn(inorm(x), p["bn_u"]))
    eu = jnp.einsum("bnc,ck->bnk", hu, p["Wu"], precision=P) + p["bu"]
    S_up = jax.nn.softmax(eu, axis=-1)                                    # softmax over the K clusters
    U = jnp.einsum("bnk,bkc->bnc", S_up, Dp, precision=P)                 # [B, N, C]

    # global_mlp + repeat over points + channel concat
    g = jnp.einsum("bkc,c->bk", Dp, p["Wg"][0], precision=P) + p["bg"][0, 0]
    G = jnp.broadcast_to(g[:, None, :], (B, N, K))
    A = jnp.concatenate([U, G], axis=-1)                                  # [B, N, C + K]

    # PointCN(256 -> 128) + shortcut conv
    ha = relu(bn(inorm(A), p["bn_a"]))
    oa = jnp.einsum("bnc,cf->bnf", ha, p["Wc1"], precision=P) + p["bc1"]
    hb = relu(bn(inorm(oa), p["bn_b"]))
    ob = jnp.einsum("bnf,fg->bng", hb, p["Wc2"], precision=P) + p["bc2"]
    sc = jnp.einsum("bnc,cf->bnf", A, p["Ws"], precision=P) + p["bs"]
    return ob + sc


# -------------------------------------------------------------------------- params ---

def make_params(key, in_dim=128, cluster_num=128):
    C, K = in_dim, cluster_num
    keys = iter(jax.random.split(key, 32))

    def w(shape):
        return jax.random.normal(next(keys), shape, jnp.float32) * 0.1

    def bn(dim):
        k1, k2, k3, k4 = jax.random.split(next(keys), 4)
        gamma = jax.random.uniform(k1, (dim,), jnp.float32, 0.5, 1.5)
        beta = jax.random.normal(k2, (dim,), jnp.float32) * 0.1
        mean = jax.random.normal(k3, (dim,), jnp.float32) * 0.1
        var = jax.random.uniform(k4, (dim,), jnp.float32, 0.5, 1.5)
        return jnp.stack([gamma, beta, mean, var], axis=0)                 # [4, dim]

    return dict(
        # DiffPool conv block
        bn_d=bn(C), Wd=w((C, K)), bd=w((1, K)),
        # OAFilter
        bn1=bn(C), W1=w((C, C)), b1=w((1, C)),
        bn2=bn(K), W2=w((K, K)), b2=w((K, 1)),
        bn3=bn(C), W3=w((C, C)), b3=w((1, C)),
        # DiffUnpool conv block
        bn_u=bn(C), Wu=w((C, K)), bu=w((1, K)),
        # global_mlp Conv2d(128, 1)
        Wg=w((1, C)), bg=w((1, 1)),
        # PointCN(256 -> 128) + shortcut
        bn_a=bn(C + K), Wc1=w((C + K, 128)), bc1=w((1, 128)),
        bn_b=bn(128), Wc2=w((128, 128)), bc2=w((1, 128)),
        Ws=w((C + K, 128)), bs=w((1, 128)),
    )


if __name__ == "__main__":
    key = jax.random.PRNGKey(0)
    kx, kp = jax.random.split(key)
    # global_mlp hard-codes 128 in-channels and cn hard-codes 256 -> in_dim=128, cluster_num=128.
    B, C, N, K = 4, 128, 64, 128
    feats = jax.random.normal(kx, (B, C, N, 1), jnp.float32)
    params = make_params(kp, in_dim=C, cluster_num=K)

    out = jax.block_until_ready(global_cluster_layer(feats, params))
    assert out.shape == (B, 128, N, 1)

    # Full-precision, un-simplified pure-JAX reference (eval-mode BatchNorm).
    x = jnp.transpose(feats[..., 0], (0, 2, 1)).astype(jnp.float32)       # [B, N, C]
    ref = jnp.transpose(_reference_forward(x, params), (0, 2, 1))[..., None]

    # The kernel's matmuls run in bf16 with f32 accumulation, so compare with a tolerance
    # scaled to the output magnitude (bf16-level relative error over a chain of matmuls).
    scale = float(jnp.max(jnp.abs(ref)))
    err = float(jnp.max(jnp.abs(out - ref)))
    assert err <= 0.04 * scale + 0.04, (err, scale)

    print("KERNEL_OK")
</pallas_src>

<mosaic_0001>
module attributes {stable_mosaic.version = 11 : i64} {
  func.func @_kernel(%arg0: i32, %arg1: memref<2x64x128xf32, #tpu.memory_space<vmem>>, %arg2: memref<2x128xf32, #tpu.memory_space<vmem>>, %arg3: memref<128x128xbf16, #tpu.memory_space<vmem>>, %arg4: memref<2x128xf32, #tpu.memory_space<vmem>>, %arg5: memref<128x128xbf16, #tpu.memory_space<vmem>>, %arg6: memref<1x128xf32, #tpu.memory_space<vmem>>, %arg7: memref<128x2xf32, #tpu.memory_space<vmem>>, %arg8: memref<128x128xbf16, #tpu.memory_space<vmem>>, %arg9: memref<128x1xf32, #tpu.memory_space<vmem>>, %arg10: memref<2x128xf32, #tpu.memory_space<vmem>>, %arg11: memref<128x128xbf16, #tpu.memory_space<vmem>>, %arg12: memref<1x128xf32, #tpu.memory_space<vmem>>, %arg13: memref<2x128xf32, #tpu.memory_space<vmem>>, %arg14: memref<128x128xbf16, #tpu.memory_space<vmem>>, %arg15: memref<1x128xf32, #tpu.memory_space<vmem>>, %arg16: memref<1x128xf32, #tpu.memory_space<vmem>>, %arg17: memref<2x128xf32, #tpu.memory_space<vmem>>, %arg18: memref<128x128xbf16, #tpu.memory_space<vmem>>, %arg19: memref<2x128xf32, #tpu.memory_space<vmem>>, %arg20: memref<128x128xbf16, #tpu.memory_space<vmem>>, %arg21: memref<1x128xf32, #tpu.memory_space<vmem>>, %arg22: memref<128x128xbf16, #tpu.memory_space<vmem>>, %arg23: memref<128x128xbf16, #tpu.memory_space<vmem>>, %arg24: memref<1x128xf32, #tpu.memory_space<vmem>>, %arg25: memref<2x64x128xf32, #tpu.memory_space<vmem>>) attributes {dimension_semantics = [#tpu.dimension_semantics<parallel>], iteration_bounds = array<i64: 2>, scalar_prefetch = 0 : i64, scratch_operands = 0 : i64, tpu.core_type = #tpu.core_type<tc>, window_params = [{transform_indices = @transform_0, window_bounds = array<i64: 2, 64, 128>}, {pipeline_mode = #tpu.pipeline_mode<synchronous>, transform_indices = @transform_1, window_bounds = array<i64: 2, 128>}, {pipeline_mode = #tpu.pipeline_mode<synchronous>, transform_indices = @transform_2, window_bounds = array<i64: 128, 128>}, {pipeline_mode = #tpu.pipeline_mode<synchronous>, transform_indices = @transform_3, window_bounds = array<i64: 2, 128>}, {pipeline_mode = #tpu.pipeline_mode<synchronous>, transform_indices = @transform_4, window_bounds = array<i64: 128, 128>}, {pipeline_mode = #tpu.pipeline_mode<synchronous>, transform_indices = @transform_5, window_bounds = array<i64: 1, 128>}, {pipeline_mode = #tpu.pipeline_mode<synchronous>, transform_indices = @transform_6, window_bounds = array<i64: 128, 2>}, {pipeline_mode = #tpu.pipeline_mode<synchronous>, transform_indices = @transform_7, window_bounds = array<i64: 128, 128>}, {pipeline_mode = #tpu.pipeline_mode<synchronous>, transform_indices = @transform_8, window_bounds = array<i64: 128, 1>}, {pipeline_mode = #tpu.pipeline_mode<synchronous>, transform_indices = @transform_9, window_bounds = array<i64: 2, 128>}, {pipeline_mode = #tpu.pipeline_mode<synchronous>, transform_indices = @transform_10, window_bounds = array<i64: 128, 128>}, {pipeline_mode = #tpu.pipeline_mode<synchronous>, transform_indices = @transform_11, window_bounds = array<i64: 1, 128>}, {pipeline_mode = #tpu.pipeline_mode<synchronous>, transform_indices = @transform_12, window_bounds = array<i64: 2, 128>}, {pipeline_mode = #tpu.pipeline_mode<synchronous>, transform_indices = @transform_13, window_bounds = array<i64: 128, 128>}, {pipeline_mode = #tpu.pipeline_mode<synchronous>, transform_indices = @transform_14, window_bounds = array<i64: 1, 128>}, {pipeline_mode = #tpu.pipeline_mode<synchronous>, transform_indices = @transform_15, window_bounds = array<i64: 1, 128>}, {pipeline_mode = #tpu.pipeline_mode<synchronous>, transform_indices = @transform_16, window_bounds = array<i64: 2, 128>}, {pipeline_mode = #tpu.pipeline_mode<synchronous>, transform_indices = @transform_17, window_bounds = array<i64: 128, 128>}, {pipeline_mode = #tpu.pipeline_mode<synchronous>, transform_indices = @transform_18, window_bounds = array<i64: 2, 128>}, {pipeline_mode = #tpu.pipeline_mode<synchronous>, transform_indices = @transform_19, window_bounds = array<i64: 128, 128>}, {pipeline_mode = #tpu.pipeline_mode<synchronous>, transform_indices = @transform_20, window_bounds = array<i64: 1, 128>}, {pipeline_mode = #tpu.pipeline_mode<synchronous>, transform_indices = @transform_21, window_bounds = array<i64: 128, 128>}, {pipeline_mode = #tpu.pipeline_mode<synchronous>, transform_indices = @transform_22, window_bounds = array<i64: 128, 128>}, {pipeline_mode = #tpu.pipeline_mode<synchronous>, transform_indices = @transform_23, window_bounds = array<i64: 1, 128>}, {transform_indices = @transform_24, window_bounds = array<i64: 2, 64, 128>}]} {
    %c0 = arith.constant 0 : index
    %c0_0 = arith.constant 0 : index
    %0 = vector.load %arg2[%c0, %c0_0] : memref<2x128xf32, #tpu.memory_space<vmem>>, vector<2x128xf32>
    %c0_1 = arith.constant 0 : index
    %c0_2 = arith.constant 0 : index
    %1 = vector.load %arg3[%c0_1, %c0_2] : memref<128x128xbf16, #tpu.memory_space<vmem>>, vector<128x128xbf16>
    %c0_3 = arith.constant 0 : index
    %c0_4 = arith.constant 0 : index
    %2 = vector.load %arg4[%c0_3, %c0_4] : memref<2x128xf32, #tpu.memory_space<vmem>>, vector<2x128xf32>
    %c0_5 = arith.constant 0 : index
    %c0_6 = arith.constant 0 : index
    %3 = vector.load %arg5[%c0_5, %c0_6] : memref<128x128xbf16, #tpu.memory_space<vmem>>, vector<128x128xbf16>
    %c0_7 = arith.constant 0 : index
    %c0_8 = arith.constant 0 : index
    %4 = vector.load %arg6[%c0_7, %c0_8] : memref<1x128xf32, #tpu.memory_space<vmem>>, vector<1x128xf32>
    %c0_9 = arith.constant 0 : index
    %c0_10 = arith.constant 0 : index
    %5 = vector.load %arg7[%c0_9, %c0_10] : memref<128x2xf32, #tpu.memory_space<vmem>>, vector<128x2xf32>
    %c0_11 = arith.constant 0 : index
    %c0_12 = arith.constant 0 : index
    %6 = vector.load %arg8[%c0_11, %c0_12] : memref<128x128xbf16, #tpu.memory_space<vmem>>, vector<128x128xbf16>
    %c0_13 = arith.constant 0 : index
    %c0_14 = arith.constant 0 : index
    %7 = vector.load %arg9[%c0_13, %c0_14] : memref<128x1xf32, #tpu.memory_space<vmem>>, vector<128x1xf32>
    %c0_15 = arith.constant 0 : index
    %c0_16 = arith.constant 0 : index
    %8 = vector.load %arg10[%c0_15, %c0_16] : memref<2x128xf32, #tpu.memory_space<vmem>>, vector<2x128xf32>
    %c0_17 = arith.constant 0 : index
    %c0_18 = arith.constant 0 : index
    %9 = vector.load %arg11[%c0_17, %c0_18] : memref<128x128xbf16, #tpu.memory_space<vmem>>, vector<128x128xbf16>
    %c0_19 = arith.constant 0 : index
    %c0_20 = arith.constant 0 : index
    %10 = vector.load %arg12[%c0_19, %c0_20] : memref<1x128xf32, #tpu.memory_space<vmem>>, vector<1x128xf32>
    %c0_21 = arith.constant 0 : index
    %c0_22 = arith.constant 0 : index
    %11 = vector.load %arg13[%c0_21, %c0_22] : memref<2x128xf32, #tpu.memory_space<vmem>>, vector<2x128xf32>
    %c0_23 = arith.constant 0 : index
    %c0_24 = arith.constant 0 : index
    %12 = vector.load %arg14[%c0_23, %c0_24] : memref<128x128xbf16, #tpu.memory_space<vmem>>, vector<128x128xbf16>
    %c0_25 = arith.constant 0 : index
    %c0_26 = arith.constant 0 : index
    %13 = vector.load %arg15[%c0_25, %c0_26] : memref<1x128xf32, #tpu.memory_space<vmem>>, vector<1x128xf32>
    %c0_27 = arith.constant 0 : index
    %c0_28 = arith.constant 0 : index
    %14 = vector.load %arg16[%c0_27, %c0_28] : memref<1x128xf32, #tpu.memory_space<vmem>>, vector<1x128xf32>
    %c0_29 = arith.constant 0 : index
    %c0_30 = arith.constant 0 : index
    %15 = vector.load %arg17[%c0_29, %c0_30] : memref<2x128xf32, #tpu.memory_space<vmem>>, vector<2x128xf32>
    %c0_31 = arith.constant 0 : index
    %c0_32 = arith.constant 0 : index
    %16 = vector.load %arg18[%c0_31, %c0_32] : memref<128x128xbf16, #tpu.memory_space<vmem>>, vector<128x128xbf16>
    %c0_33 = arith.constant 0 : index
    %c0_34 = arith.constant 0 : index
    %17 = vector.load %arg19[%c0_33, %c0_34] : memref<2x128xf32, #tpu.memory_space<vmem>>, vector<2x128xf32>
    %c0_35 = arith.constant 0 : index
    %c0_36 = arith.constant 0 : index
    %18 = vector.load %arg20[%c0_35, %c0_36] : memref<128x128xbf16, #tpu.memory_space<vmem>>, vector<128x128xbf16>
    %c0_37 = arith.constant 0 : index
    %c0_38 = arith.constant 0 : index
    %19 = vector.load %arg21[%c0_37, %c0_38] : memref<1x128xf32, #tpu.memory_space<vmem>>, vector<1x128xf32>
    %c0_39 = arith.constant 0 : index
    %c0_40 = arith.constant 0 : index
    %20 = vector.load %arg22[%c0_39, %c0_40] : memref<128x128xbf16, #tpu.memory_space<vmem>>, vector<128x128xbf16>
    %c0_41 = arith.constant 0 : index
    %c0_42 = arith.constant 0 : index
    %21 = vector.load %arg23[%c0_41, %c0_42] : memref<128x128xbf16, #tpu.memory_space<vmem>>, vector<128x128xbf16>
    %c0_43 = arith.constant 0 : index
    %c0_44 = arith.constant 0 : index
    %22 = vector.load %arg24[%c0_43, %c0_44] : memref<1x128xf32, #tpu.memory_space<vmem>>, vector<1x128xf32>
    %c0_45 = arith.constant 0 : index
    %c0_46 = arith.constant 0 : index
    %c0_47 = arith.constant 0 : index
    %23 = vector.load %arg1[%c0_45, %c0_46, %c0_47] : memref<2x64x128xf32, #tpu.memory_space<vmem>>, vector<2x64x128xf32>
    %24 = arith.truncf %23 : vector<2x64x128xf32> to vector<2x64x128xbf16>
    %cst = arith.constant dense<0.000000e+00> : vector<2x128xf32>
    %25 = vector.multi_reduction <add>, %23, %cst [1] : vector<2x64x128xf32> to vector<2x128xf32>
    %26 = vector.shape_cast %25 : vector<2x128xf32> to vector<2x1x128xf32>
    %cst_48 = arith.constant 6.400000e+01 : f32
    %27 = vector.broadcast %cst_48 : f32 to vector<2x1x128xf32>
    %28 = arith.divf %26, %27 : vector<2x1x128xf32>
    %29 = arith.mulf %23, %23 : vector<2x64x128xf32>
    %cst_49 = arith.constant dense<0.000000e+00> : vector<2x128xf32>
    %30 = vector.multi_reduction <add>, %29, %cst_49 [1] : vector<2x64x128xf32> to vector<2x128xf32>
    %31 = vector.shape_cast %30 : vector<2x128xf32> to vector<2x1x128xf32>
    %cst_50 = arith.constant 6.400000e+01 : f32
    %32 = vector.broadcast %cst_50 : f32 to vector<2x1x128xf32>
    %33 = arith.divf %31, %32 : vector<2x1x128xf32>
    %34 = arith.mulf %28, %28 : vector<2x1x128xf32>
    %35 = arith.subf %33, %34 : vector<2x1x128xf32>
    %cst_51 = arith.constant 0.000000e+00 : f32
    %36 = vector.broadcast %cst_51 : f32 to vector<2x1x128xf32>
    %37 = arith.maximumf %35, %36 : vector<2x1x128xf32>
    %38 = vector.broadcast %28 : vector<2x1x128xf32> to vector<2x64x128xf32>
    %39 = arith.subf %23, %38 : vector<2x64x128xf32>
    %cst_52 = arith.constant 1.000000e-03 : f32
    %40 = vector.broadcast %cst_52 : f32 to vector<2x1x128xf32>
    %41 = arith.addf %37, %40 : vector<2x1x128xf32>
    %42 = math.rsqrt %41 : vector<2x1x128xf32>
    %43 = vector.broadcast %42 : vector<2x1x128xf32> to vector<2x64x128xf32>
    %44 = arith.mulf %39, %43 : vector<2x64x128xf32>
    %45 = vector.extract_strided_slice %0 {offsets = [0, 0], sizes = [1, 128], strides = [1, 1]} : vector<2x128xf32> to vector<1x128xf32>
    %46 = vector.shape_cast %45 : vector<1x128xf32> to vector<1x1x128xf32>
    %47 = vector.broadcast %46 : vector<1x1x128xf32> to vector<2x64x128xf32>
    %48 = arith.mulf %44, %47 : vector<2x64x128xf32>
    %49 = vector.extract_strided_slice %0 {offsets = [1, 0], sizes = [1, 128], strides = [1, 1]} : vector<2x128xf32> to vector<1x128xf32>
    %50 = vector.shape_cast %49 : vector<1x128xf32> to vector<1x1x128xf32>
    %51 = vector.broadcast %50 : vector<1x1x128xf32> to vector<2x64x128xf32>
    %52 = arith.addf %48, %51 : vector<2x64x128xf32>
    %cst_53 = arith.constant 0.000000e+00 : f32
    %53 = vector.broadcast %cst_53 : f32 to vector<2x64x128xf32>
    %54 = arith.maximumf %52, %53 : vector<2x64x128xf32>
    %55 = vector.shape_cast %54 : vector<2x64x128xf32> to vector<128x128xf32>
    %56 = arith.truncf %55 : vector<128x128xf32> to vector<128x128xbf16>
    %cst_54 = arith.constant dense<0.000000e+00> : vector<128x128xf32>
    %57 = tpu.matmul %56, %1, %cst_54 {dimension_numbers = #tpu.dot_dimension_numbers<[1], [0], [0], [1], [0, 0, 1, 1], [], []>} : vector<128x128xbf16>, vector<128x128xbf16>, vector<128x128xf32> -> vector<128x128xf32>
    %58 = vector.shape_cast %57 : vector<128x128xf32> to vector<2x64x128xf32>
    %cst_55 = arith.constant dense<0xFF800000> : vector<2x128xf32>
    %59 = vector.multi_reduction <maximumf>, %58, %cst_55 [1] : vector<2x64x128xf32> to vector<2x128xf32>
    %60 = vector.shape_cast %59 : vector<2x128xf32> to vector<2x1x128xf32>
    %61 = vector.broadcast %60 : vector<2x1x128xf32> to vector<2x64x128xf32>
    %62 = arith.subf %58, %61 : vector<2x64x128xf32>
    %63 = math.exp %62 : vector<2x64x128xf32>
    %cst_56 = arith.constant dense<0.000000e+00> : vector<2x128xf32>
    %64 = vector.multi_reduction <add>, %63, %cst_56 [1] : vector<2x64x128xf32> to vector<2x128xf32>
    %65 = vector.shape_cast %64 : vector<2x128xf32> to vector<2x1x128xf32>
    %66 = vector.broadcast %65 : vector<2x1x128xf32> to vector<2x64x128xf32>
    %67 = arith.divf %63, %66 : vector<2x64x128xf32>
    %68 = vector.extract_strided_slice %67 {offsets = [0, 0, 0], sizes = [1, 64, 128], strides = [1, 1, 1]} : vector<2x64x128xf32> to vector<1x64x128xf32>
    %69 = vector.shape_cast %68 : vector<1x64x128xf32> to vector<64x128xf32>
    %70 = tpu.transpose %69, [1, 0] : vector<64x128xf32> -> vector<128x64xf32>
    %71 = arith.truncf %70 : vector<128x64xf32> to vector<128x64xbf16>
    %72 = vector.extract_strided_slice %24 {offsets = [0, 0, 0], sizes = [1, 64, 128], strides = [1, 1, 1]} : vector<2x64x128xbf16> to vector<1x64x128xbf16>
    %73 = vector.shape_cast %72 : vector<1x64x128xbf16> to vector<64x128xbf16>
    %cst_57 = arith.constant dense<0.000000e+00> : vector<128x128xf32>
    %74 = tpu.matmul %71, %73, %cst_57 {dimension_numbers = #tpu.dot_dimension_numbers<[1], [0], [0], [1], [0, 0, 1, 1], [], []>} : vector<128x64xbf16>, vector<64x128xbf16>, vector<128x128xf32> -> vector<128x128xf32>
    %75 = vector.extract_strided_slice %67 {offsets = [1, 0, 0], sizes = [1, 64, 128], strides = [1, 1, 1]} : vector<2x64x128xf32> to vector<1x64x128xf32>
    %76 = vector.shape_cast %75 : vector<1x64x128xf32> to vector<64x128xf32>
    %77 = tpu.transpose %76, [1, 0] : vector<64x128xf32> -> vector<128x64xf32>
    %78 = arith.truncf %77 : vector<128x64xf32> to vector<128x64xbf16>
    %79 = vector.extract_strided_slice %24 {offsets = [1, 0, 0], sizes = [1, 64, 128], strides = [1, 1, 1]} : vector<2x64x128xbf16> to vector<1x64x128xbf16>
    %80 = vector.shape_cast %79 : vector<1x64x128xbf16> to vector<64x128xbf16>
    %cst_58 = arith.constant dense<0.000000e+00> : vector<128x128xf32>
    %81 = tpu.matmul %78, %80, %cst_58 {dimension_numbers = #tpu.dot_dimension_numbers<[1], [0], [0], [1], [0, 0, 1, 1], [], []>} : vector<128x64xbf16>, vector<64x128xbf16>, vector<128x128xf32> -> vector<128x128xf32>
    %82 = vector.shape_cast %74 : vector<128x128xf32> to vector<1x128x128xf32>
    %83 = vector.shape_cast %81 : vector<128x128xf32> to vector<1x128x128xf32>
    %84 = tpu.concatenate %82, %83 in 0 : vector<1x128x128xf32>, vector<1x128x128xf32> -> vector<2x128x128xf32>
    %cst_59 = arith.constant dense<0.000000e+00> : vector<2x128xf32>
    %85 = vector.multi_reduction <add>, %84, %cst_59 [1] : vector<2x128x128xf32> to vector<2x128xf32>
    %86 = vector.shape_cast %85 : vector<2x128xf32> to vector<2x1x128xf32>
    %cst_60 = arith.constant 1.280000e+02 : f32
    %87 = vector.broadcast %cst_60 : f32 to vector<2x1x128xf32>
    %88 = arith.divf %86, %87 : vector<2x1x128xf32>
    %89 = arith.mulf %84, %84 : vector<2x128x128xf32>
    %cst_61 = arith.constant dense<0.000000e+00> : vector<2x128xf32>
    %90 = vector.multi_reduction <add>, %89, %cst_61 [1] : vector<2x128x128xf32> to vector<2x128xf32>
    %91 = vector.shape_cast %90 : vector<2x128xf32> to vector<2x1x128xf32>
    %cst_62 = arith.constant 1.280000e+02 : f32
    %92 = vector.broadcast %cst_62 : f32 to vector<2x1x128xf32>
    %93 = arith.divf %91, %92 : vector<2x1x128xf32>
    %94 = arith.mulf %88, %88 : vector<2x1x128xf32>
    %95 = arith.subf %93, %94 : vector<2x1x128xf32>
    %cst_63 = arith.constant 0.000000e+00 : f32
    %96 = vector.broadcast %cst_63 : f32 to vector<2x1x128xf32>
    %97 = arith.maximumf %95, %96 : vector<2x1x128xf32>
    %98 = vector.broadcast %88 : vector<2x1x128xf32> to vector<2x128x128xf32>
    %99 = arith.subf %84, %98 : vector<2x128x128xf32>
    %cst_64 = arith.constant 1.000000e-03 : f32
    %100 = vector.broadcast %cst_64 : f32 to vector<2x1x128xf32>
    %101 = arith.addf %97, %100 : vector<2x1x128xf32>
    %102 = math.rsqrt %101 : vector<2x1x128xf32>
    %103 = vector.broadcast %102 : vector<2x1x128xf32> to vector<2x128x128xf32>
    %104 = arith.mulf %99, %103 : vector<2x128x128xf32>
    %105 = vector.extract_strided_slice %2 {offsets = [0, 0], sizes = [1, 128], strides = [1, 1]} : vector<2x128xf32> to vector<1x128xf32>
    %106 = vector.shape_cast %105 : vector<1x128xf32> to vector<1x1x128xf32>
    %107 = vector.broadcast %106 : vector<1x1x128xf32> to vector<2x128x128xf32>
    %108 = arith.mulf %104, %107 : vector<2x128x128xf32>
    %109 = vector.extract_strided_slice %2 {offsets = [1, 0], sizes = [1, 128], strides = [1, 1]} : vector<2x128xf32> to vector<1x128xf32>
    %110 = vector.shape_cast %109 : vector<1x128xf32> to vector<1x1x128xf32>
    %111 = vector.broadcast %110 : vector<1x1x128xf32> to vector<2x128x128xf32>
    %112 = arith.addf %108, %111 : vector<2x128x128xf32>
    %cst_65 = arith.constant 0.000000e+00 : f32
    %113 = vector.broadcast %cst_65 : f32 to vector<2x128x128xf32>
    %114 = arith.maximumf %112, %113 : vector<2x128x128xf32>
    %115 = vector.shape_cast %114 : vector<2x128x128xf32> to vector<256x128xf32>
    %116 = arith.truncf %115 : vector<256x128xf32> to vector<256x128xbf16>
    %cst_66 = arith.constant dense<0.000000e+00> : vector<256x128xf32>
    %117 = tpu.matmul %116, %3, %cst_66 {dimension_numbers = #tpu.dot_dimension_numbers<[1], [0], [0], [1], [0, 0, 1, 1], [], []>} : vector<256x128xbf16>, vector<128x128xbf16>, vector<256x128xf32> -> vector<256x128xf32>
    %118 = vector.shape_cast %117 : vector<256x128xf32> to vector<2x128x128xf32>
    %119 = vector.shape_cast %4 : vector<1x128xf32> to vector<1x1x128xf32>
    %120 = vector.broadcast %119 : vector<1x1x128xf32> to vector<2x128x128xf32>
    %121 = arith.addf %118, %120 : vector<2x128x128xf32>
    %122 = vector.extract_strided_slice %5 {offsets = [0, 0], sizes = [128, 1], strides = [1, 1]} : vector<128x2xf32> to vector<128x1xf32>
    %123 = vector.shape_cast %122 : vector<128x1xf32> to vector<1x128x1xf32>
    %124 = vector.broadcast %123 : vector<1x128x1xf32> to vector<2x128x128xf32>
    %125 = arith.mulf %121, %124 : vector<2x128x128xf32>
    %126 = vector.extract_strided_slice %5 {offsets = [0, 1], sizes = [128, 1], strides = [1, 1]} : vector<128x2xf32> to vector<128x1xf32>
    %127 = vector.shape_cast %126 : vector<128x1xf32> to vector<1x128x1xf32>
    %128 = vector.broadcast %127 : vector<1x128x1xf32> to vector<2x128x128xf32>
    %129 = arith.addf %125, %128 : vector<2x128x128xf32>
    %cst_67 = arith.constant 0.000000e+00 : f32
    %130 = vector.broadcast %cst_67 : f32 to vector<2x128x128xf32>
    %131 = arith.maximumf %129, %130 : vector<2x128x128xf32>
    %132 = arith.truncf %131 : vector<2x128x128xf32> to vector<2x128x128xbf16>
    %133 = vector.extract_strided_slice %132 {offsets = [0, 0, 0], sizes = [1, 128, 128], strides = [1, 1, 1]} : vector<2x128x128xbf16> to vector<1x128x128xbf16>
    %134 = vector.shape_cast %133 : vector<1x128x128xbf16> to vector<128x128xbf16>
    %cst_68 = arith.constant dense<0.000000e+00> : vector<128x128xf32>
    %135 = tpu.matmul %6, %134, %cst_68 {dimension_numbers = #tpu.dot_dimension_numbers<[1], [0], [0], [1], [0, 0, 1, 1], [], []>} : vector<128x128xbf16>, vector<128x128xbf16>, vector<128x128xf32> -> vector<128x128xf32>
    %136 = vector.extract_strided_slice %132 {offsets = [1, 0, 0], sizes = [1, 128, 128], strides = [1, 1, 1]} : vector<2x128x128xbf16> to vector<1x128x128xbf16>
    %137 = vector.shape_cast %136 : vector<1x128x128xbf16> to vector<128x128xbf16>
    %cst_69 = arith.constant dense<0.000000e+00> : vector<128x128xf32>
    %138 = tpu.matmul %6, %137, %cst_69 {dimension_numbers = #tpu.dot_dimension_numbers<[1], [0], [0], [1], [0, 0, 1, 1], [], []>} : vector<128x128xbf16>, vector<128x128xbf16>, vector<128x128xf32> -> vector<128x128xf32>
    %139 = vector.shape_cast %135 : vector<128x128xf32> to vector<1x128x128xf32>
    %140 = vector.shape_cast %138 : vector<128x128xf32> to vector<1x128x128xf32>
    %141 = tpu.concatenate %139, %140 in 0 : vector<1x128x128xf32>, vector<1x128x128xf32> -> vector<2x128x128xf32>
    %142 = vector.shape_cast %7 : vector<128x1xf32> to vector<1x128x1xf32>
    %143 = vector.broadcast %142 : vector<1x128x1xf32> to vector<2x128x128xf32>
    %144 = arith.addf %141, %143 : vector<2x128x128xf32>
    %145 = arith.addf %121, %144 : vector<2x128x128xf32>
    %cst_70 = arith.constant dense<0.000000e+00> : vector<2x128xf32>
    %146 = vector.multi_reduction <add>, %145, %cst_70 [1] : vector<2x128x128xf32> to vector<2x128xf32>
    %147 = vector.shape_cast %146 : vector<2x128xf32> to vector<2x1x128xf32>
    %cst_71 = arith.constant 1.280000e+02 : f32
    %148 = vector.broadcast %cst_71 : f32 to vector<2x1x128xf32>
    %149 = arith.divf %147, %148 : vector<2x1x128xf32>
    %150 = arith.mulf %145, %145 : vector<2x128x128xf32>
    %cst_72 = arith.constant dense<0.000000e+00> : vector<2x128xf32>
    %151 = vector.multi_reduction <add>, %150, %cst_72 [1] : vector<2x128x128xf32> to vector<2x128xf32>
    %152 = vector.shape_cast %151 : vector<2x128xf32> to vector<2x1x128xf32>
    %cst_73 = arith.constant 1.280000e+02 : f32
    %153 = vector.broadcast %cst_73 : f32 to vector<2x1x128xf32>
    %154 = arith.divf %152, %153 : vector<2x1x128xf32>
    %155 = arith.mulf %149, %149 : vector<2x1x128xf32>
    %156 = arith.subf %154, %155 : vector<2x1x128xf32>
    %cst_74 = arith.constant 0.000000e+00 : f32
    %157 = vector.broadcast %cst_74 : f32 to vector<2x1x128xf32>
    %158 = arith.maximumf %156, %157 : vector<2x1x128xf32>
    %159 = vector.broadcast %149 : vector<2x1x128xf32> to vector<2x128x128xf32>
    %160 = arith.subf %145, %159 : vector<2x128x128xf32>
    %cst_75 = arith.constant 1.000000e-03 : f32
    %161 = vector.broadcast %cst_75 : f32 to vector<2x1x128xf32>
    %162 = arith.addf %158, %161 : vector<2x1x128xf32>
    %163 = math.rsqrt %162 : vector<2x1x128xf32>
    %164 = vector.broadcast %163 : vector<2x1x128xf32> to vector<2x128x128xf32>
    %165 = arith.mulf %160, %164 : vector<2x128x128xf32>
    %166 = vector.extract_strided_slice %8 {offsets = [0, 0], sizes = [1, 128], strides = [1, 1]} : vector<2x128xf32> to vector<1x128xf32>
    %167 = vector.shape_cast %166 : vector<1x128xf32> to vector<1x1x128xf32>
    %168 = vector.broadcast %167 : vector<1x1x128xf32> to vector<2x128x128xf32>
    %169 = arith.mulf %165, %168 : vector<2x128x128xf32>
    %170 = vector.extract_strided_slice %8 {offsets = [1, 0], sizes = [1, 128], strides = [1, 1]} : vector<2x128xf32> to vector<1x128xf32>
    %171 = vector.shape_cast %170 : vector<1x128xf32> to vector<1x1x128xf32>
    %172 = vector.broadcast %171 : vector<1x1x128xf32> to vector<2x128x128xf32>
    %173 = arith.addf %169, %172 : vector<2x128x128xf32>
    %cst_76 = arith.constant 0.000000e+00 : f32
    %174 = vector.broadcast %cst_76 : f32 to vector<2x128x128xf32>
    %175 = arith.maximumf %173, %174 : vector<2x128x128xf32>
    %176 = vector.shape_cast %175 : vector<2x128x128xf32> to vector<256x128xf32>
    %177 = arith.truncf %176 : vector<256x128xf32> to vector<256x128xbf16>
    %cst_77 = arith.constant dense<0.000000e+00> : vector<256x128xf32>
    %178 = tpu.matmul %177, %9, %cst_77 {dimension_numbers = #tpu.dot_dimension_numbers<[1], [0], [0], [1], [0, 0, 1, 1], [], []>} : vector<256x128xbf16>, vector<128x128xbf16>, vector<256x128xf32> -> vector<256x128xf32>
    %179 = vector.shape_cast %178 : vector<256x128xf32> to vector<2x128x128xf32>
    %180 = vector.shape_cast %10 : vector<1x128xf32> to vector<1x1x128xf32>
    %181 = vector.broadcast %180 : vector<1x1x128xf32> to vector<2x128x128xf32>
    %182 = arith.addf %179, %181 : vector<2x128x128xf32>
    %183 = arith.addf %182, %84 : vector<2x128x128xf32>
    %184 = arith.truncf %183 : vector<2x128x128xf32> to vector<2x128x128xbf16>
    %185 = vector.extract_strided_slice %11 {offsets = [0, 0], sizes = [1, 128], strides = [1, 1]} : vector<2x128xf32> to vector<1x128xf32>
    %186 = vector.shape_cast %185 : vector<1x128xf32> to vector<1x1x128xf32>
    %187 = vector.broadcast %186 : vector<1x1x128xf32> to vector<2x64x128xf32>
    %188 = arith.mulf %44, %187 : vector<2x64x128xf32>
    %189 = vector.extract_strided_slice %11 {offsets = [1, 0], sizes = [1, 128], strides = [1, 1]} : vector<2x128xf32> to vector<1x128xf32>
    %190 = vector.shape_cast %189 : vector<1x128xf32> to vector<1x1x128xf32>
    %191 = vector.broadcast %190 : vector<1x1x128xf32> to vector<2x64x128xf32>
    %192 = arith.addf %188, %191 : vector<2x64x128xf32>
    %cst_78 = arith.constant 0.000000e+00 : f32
    %193 = vector.broadcast %cst_78 : f32 to vector<2x64x128xf32>
    %194 = arith.maximumf %192, %193 : vector<2x64x128xf32>
    %195 = vector.shape_cast %194 : vector<2x64x128xf32> to vector<128x128xf32>
    %196 = arith.truncf %195 : vector<128x128xf32> to vector<128x128xbf16>
    %cst_79 = arith.constant dense<0.000000e+00> : vector<128x128xf32>
    %197 = tpu.matmul %196, %12, %cst_79 {dimension_numbers = #tpu.dot_dimension_numbers<[1], [0], [0], [1], [0, 0, 1, 1], [], []>} : vector<128x128xbf16>, vector<128x128xbf16>, vector<128x128xf32> -> vector<128x128xf32>
    %198 = vector.shape_cast %197 : vector<128x128xf32> to vector<2x64x128xf32>
    %199 = vector.shape_cast %13 : vector<1x128xf32> to vector<1x1x128xf32>
    %200 = vector.broadcast %199 : vector<1x1x128xf32> to vector<2x64x128xf32>
    %201 = arith.addf %198, %200 : vector<2x64x128xf32>
    %cst_80 = arith.constant dense<0xFF800000> : vector<2x64xf32>
    %202 = vector.multi_reduction <maximumf>, %201, %cst_80 [2] : vector<2x64x128xf32> to vector<2x64xf32>
    %203 = vector.shape_cast %202 : vector<2x64xf32> to vector<2x64x1xf32>
    %204 = vector.broadcast %203 : vector<2x64x1xf32> to vector<2x64x128xf32>
    %205 = arith.subf %201, %204 : vector<2x64x128xf32>
    %206 = math.exp %205 : vector<2x64x128xf32>
    %cst_81 = arith.constant dense<0.000000e+00> : vector<2x64xf32>
    %207 = vector.multi_reduction <add>, %206, %cst_81 [2] : vector<2x64x128xf32> to vector<2x64xf32>
    %208 = vector.shape_cast %207 : vector<2x64xf32> to vector<2x64x1xf32>
    %209 = vector.broadcast %208 : vector<2x64x1xf32> to vector<2x64x128xf32>
    %210 = arith.divf %206, %209 : vector<2x64x128xf32>
    %211 = arith.truncf %210 : vector<2x64x128xf32> to vector<2x64x128xbf16>
    %212 = vector.extract_strided_slice %211 {offsets = [0, 0, 0], sizes = [1, 64, 128], strides = [1, 1, 1]} : vector<2x64x128xbf16> to vector<1x64x128xbf16>
    %213 = vector.shape_cast %212 : vector<1x64x128xbf16> to vector<64x128xbf16>
    %214 = vector.extract_strided_slice %184 {offsets = [0, 0, 0], sizes = [1, 128, 128], strides = [1, 1, 1]} : vector<2x128x128xbf16> to vector<1x128x128xbf16>
    %215 = vector.shape_cast %214 : vector<1x128x128xbf16> to vector<128x128xbf16>
    %cst_82 = arith.constant dense<0.000000e+00> : vector<64x128xf32>
    %216 = tpu.matmul %213, %215, %cst_82 {dimension_numbers = #tpu.dot_dimension_numbers<[1], [0], [0], [1], [0, 0, 1, 1], [], []>} : vector<64x128xbf16>, vector<128x128xbf16>, vector<64x128xf32> -> vector<64x128xf32>
    %217 = vector.extract_strided_slice %211 {offsets = [1, 0, 0], sizes = [1, 64, 128], strides = [1, 1, 1]} : vector<2x64x128xbf16> to vector<1x64x128xbf16>
    %218 = vector.shape_cast %217 : vector<1x64x128xbf16> to vector<64x128xbf16>
    %219 = vector.extract_strided_slice %184 {offsets = [1, 0, 0], sizes = [1, 128, 128], strides = [1, 1, 1]} : vector<2x128x128xbf16> to vector<1x128x128xbf16>
    %220 = vector.shape_cast %219 : vector<1x128x128xbf16> to vector<128x128xbf16>
    %cst_83 = arith.constant dense<0.000000e+00> : vector<64x128xf32>
    %221 = tpu.matmul %218, %220, %cst_83 {dimension_numbers = #tpu.dot_dimension_numbers<[1], [0], [0], [1], [0, 0, 1, 1], [], []>} : vector<64x128xbf16>, vector<128x128xbf16>, vector<64x128xf32> -> vector<64x128xf32>
    %222 = vector.shape_cast %216 : vector<64x128xf32> to vector<1x64x128xf32>
    %223 = vector.shape_cast %221 : vector<64x128xf32> to vector<1x64x128xf32>
    %224 = tpu.concatenate %222, %223 in 0 : vector<1x64x128xf32>, vector<1x64x128xf32> -> vector<2x64x128xf32>
    %225 = vector.shape_cast %14 : vector<1x128xf32> to vector<1x1x128xf32>
    %226 = vector.broadcast %225 : vector<1x1x128xf32> to vector<2x128x128xf32>
    %227 = arith.mulf %183, %226 : vector<2x128x128xf32>
    %cst_84 = arith.constant dense<0.000000e+00> : vector<2x128xf32>
    %228 = vector.multi_reduction <add>, %227, %cst_84 [2] : vector<2x128x128xf32> to vector<2x128xf32>
    %229 = arith.truncf %228 : vector<2x128xf32> to vector<2x128xbf16>
    %cst_85 = arith.constant dense<0.000000e+00> : vector<2x128xf32>
    %230 = tpu.matmul %229, %21, %cst_85 {dimension_numbers = #tpu.dot_dimension_numbers<[1], [0], [0], [1], [0, 0, 1, 1], [], []>} : vector<2x128xbf16>, vector<128x128xbf16>, vector<2x128xf32> -> vector<2x128xf32>
    %cst_86 = arith.constant dense<0.000000e+00> : vector<2x128xf32>
    %231 = vector.multi_reduction <add>, %224, %cst_86 [1] : vector<2x64x128xf32> to vector<2x128xf32>
    %232 = vector.shape_cast %231 : vector<2x128xf32> to vector<2x1x128xf32>
    %cst_87 = arith.constant 6.400000e+01 : f32
    %233 = vector.broadcast %cst_87 : f32 to vector<2x1x128xf32>
    %234 = arith.divf %232, %233 : vector<2x1x128xf32>
    %235 = arith.mulf %224, %224 : vector<2x64x128xf32>
    %cst_88 = arith.constant dense<0.000000e+00> : vector<2x128xf32>
    %236 = vector.multi_reduction <add>, %235, %cst_88 [1] : vector<2x64x128xf32> to vector<2x128xf32>
    %237 = vector.shape_cast %236 : vector<2x128xf32> to vector<2x1x128xf32>
    %cst_89 = arith.constant 6.400000e+01 : f32
    %238 = vector.broadcast %cst_89 : f32 to vector<2x1x128xf32>
    %239 = arith.divf %237, %238 : vector<2x1x128xf32>
    %240 = arith.mulf %234, %234 : vector<2x1x128xf32>
    %241 = arith.subf %239, %240 : vector<2x1x128xf32>
    %cst_90 = arith.constant 0.000000e+00 : f32
    %242 = vector.broadcast %cst_90 : f32 to vector<2x1x128xf32>
    %243 = arith.maximumf %241, %242 : vector<2x1x128xf32>
    %244 = vector.broadcast %234 : vector<2x1x128xf32> to vector<2x64x128xf32>
    %245 = arith.subf %224, %244 : vector<2x64x128xf32>
    %cst_91 = arith.constant 1.000000e-03 : f32
    %246 = vector.broadcast %cst_91 : f32 to vector<2x1x128xf32>
    %247 = arith.addf %243, %246 : vector<2x1x128xf32>
    %248 = math.rsqrt %247 : vector<2x1x128xf32>
    %249 = vector.broadcast %248 : vector<2x1x128xf32> to vector<2x64x128xf32>
    %250 = arith.mulf %245, %249 : vector<2x64x128xf32>
    %251 = vector.extract_strided_slice %15 {offsets = [0, 0], sizes = [1, 128], strides = [1, 1]} : vector<2x128xf32> to vector<1x128xf32>
    %252 = vector.shape_cast %251 : vector<1x128xf32> to vector<1x1x128xf32>
    %253 = vector.broadcast %252 : vector<1x1x128xf32> to vector<2x64x128xf32>
    %254 = arith.mulf %250, %253 : vector<2x64x128xf32>
    %255 = vector.extract_strided_slice %15 {offsets = [1, 0], sizes = [1, 128], strides = [1, 1]} : vector<2x128xf32> to vector<1x128xf32>
    %256 = vector.shape_cast %255 : vector<1x128xf32> to vector<1x1x128xf32>
    %257 = vector.broadcast %256 : vector<1x1x128xf32> to vector<2x64x128xf32>
    %258 = arith.addf %254, %257 : vector<2x64x128xf32>
    %cst_92 = arith.constant 0.000000e+00 : f32
    %259 = vector.broadcast %cst_92 : f32 to vector<2x64x128xf32>
    %260 = arith.maximumf %258, %259 : vector<2x64x128xf32>
    %261 = vector.shape_cast %260 : vector<2x64x128xf32> to vector<128x128xf32>
    %262 = arith.truncf %261 : vector<128x128xf32> to vector<128x128xbf16>
    %cst_93 = arith.constant dense<0.000000e+00> : vector<128x128xf32>
    %263 = tpu.matmul %262, %16, %cst_93 {dimension_numbers = #tpu.dot_dimension_numbers<[1], [0], [0], [1], [0, 0, 1, 1], [], []>} : vector<128x128xbf16>, vector<128x128xbf16>, vector<128x128xf32> -> vector<128x128xf32>
    %264 = vector.shape_cast %263 : vector<128x128xf32> to vector<2x64x128xf32>
    %cst_94 = arith.constant dense<0.000000e+00> : vector<2x128xf32>
    %265 = vector.multi_reduction <add>, %264, %cst_94 [1] : vector<2x64x128xf32> to vector<2x128xf32>
    %266 = vector.shape_cast %265 : vector<2x128xf32> to vector<2x1x128xf32>
    %cst_95 = arith.constant 6.400000e+01 : f32
    %267 = vector.broadcast %cst_95 : f32 to vector<2x1x128xf32>
    %268 = arith.divf %266, %267 : vector<2x1x128xf32>
    %269 = arith.mulf %264, %264 : vector<2x64x128xf32>
    %cst_96 = arith.constant dense<0.000000e+00> : vector<2x128xf32>
    %270 = vector.multi_reduction <add>, %269, %cst_96 [1] : vector<2x64x128xf32> to vector<2x128xf32>
    %271 = vector.shape_cast %270 : vector<2x128xf32> to vector<2x1x128xf32>
    %cst_97 = arith.constant 6.400000e+01 : f32
    %272 = vector.broadcast %cst_97 : f32 to vector<2x1x128xf32>
    %273 = arith.divf %271, %272 : vector<2x1x128xf32>
    %274 = arith.mulf %268, %268 : vector<2x1x128xf32>
    %275 = arith.subf %273, %274 : vector<2x1x128xf32>
    %cst_98 = arith.constant 0.000000e+00 : f32
    %276 = vector.broadcast %cst_98 : f32 to vector<2x1x128xf32>
    %277 = arith.maximumf %275, %276 : vector<2x1x128xf32>
    %278 = vector.broadcast %268 : vector<2x1x128xf32> to vector<2x64x128xf32>
    %279 = arith.subf %264, %278 : vector<2x64x128xf32>
    %cst_99 = arith.constant 1.000000e-03 : f32
    %280 = vector.broadcast %cst_99 : f32 to vector<2x1x128xf32>
    %281 = arith.addf %277, %280 : vector<2x1x128xf32>
    %282 = math.rsqrt %281 : vector<2x1x128xf32>
    %283 = vector.broadcast %282 : vector<2x1x128xf32> to vector<2x64x128xf32>
    %284 = arith.mulf %279, %283 : vector<2x64x128xf32>
    %285 = vector.extract_strided_slice %17 {offsets = [0, 0], sizes = [1, 128], strides = [1, 1]} : vector<2x128xf32> to vector<1x128xf32>
    %286 = vector.shape_cast %285 : vector<1x128xf32> to vector<1x1x128xf32>
    %287 = vector.broadcast %286 : vector<1x1x128xf32> to vector<2x64x128xf32>
    %288 = arith.mulf %284, %287 : vector<2x64x128xf32>
    %289 = vector.extract_strided_slice %17 {offsets = [1, 0], sizes = [1, 128], strides = [1, 1]} : vector<2x128xf32> to vector<1x128xf32>
    %290 = vector.shape_cast %289 : vector<1x128xf32> to vector<1x1x128xf32>
    %291 = vector.broadcast %290 : vector<1x1x128xf32> to vector<2x64x128xf32>
    %292 = arith.addf %288, %291 : vector<2x64x128xf32>
    %cst_100 = arith.constant 0.000000e+00 : f32
    %293 = vector.broadcast %cst_100 : f32 to vector<2x64x128xf32>
    %294 = arith.maximumf %292, %293 : vector<2x64x128xf32>
    %295 = vector.shape_cast %294 : vector<2x64x128xf32> to vector<128x128xf32>
    %296 = arith.truncf %295 : vector<128x128xf32> to vector<128x128xbf16>
    %cst_101 = arith.constant dense<0.000000e+00> : vector<128x128xf32>
    %297 = tpu.matmul %296, %18, %cst_101 {dimension_numbers = #tpu.dot_dimension_numbers<[1], [0], [0], [1], [0, 0, 1, 1], [], []>} : vector<128x128xbf16>, vector<128x128xbf16>, vector<128x128xf32> -> vector<128x128xf32>
    %298 = vector.shape_cast %297 : vector<128x128xf32> to vector<2x64x128xf32>
    %299 = vector.shape_cast %19 : vector<1x128xf32> to vector<1x1x128xf32>
    %300 = vector.broadcast %299 : vector<1x1x128xf32> to vector<2x64x128xf32>
    %301 = arith.addf %298, %300 : vector<2x64x128xf32>
    %302 = vector.shape_cast %224 : vector<2x64x128xf32> to vector<128x128xf32>
    %303 = arith.truncf %302 : vector<128x128xf32> to vector<128x128xbf16>
    %cst_102 = arith.constant dense<0.000000e+00> : vector<128x128xf32>
    %304 = tpu.matmul %303, %20, %cst_102 {dimension_numbers = #tpu.dot_dimension_numbers<[1], [0], [0], [1], [0, 0, 1, 1], [], []>} : vector<128x128xbf16>, vector<128x128xbf16>, vector<128x128xf32> -> vector<128x128xf32>
    %305 = vector.shape_cast %304 : vector<128x128xf32> to vector<2x64x128xf32>
    %306 = vector.shape_cast %22 : vector<1x128xf32> to vector<1x1x128xf32>
    %307 = vector.broadcast %306 : vector<1x1x128xf32> to vector<2x64x128xf32>
    %308 = arith.addf %305, %307 : vector<2x64x128xf32>
    %309 = vector.shape_cast %230 : vector<2x128xf32> to vector<2x1x128xf32>
    %310 = vector.broadcast %309 : vector<2x1x128xf32> to vector<2x64x128xf32>
    %311 = arith.addf %308, %310 : vector<2x64x128xf32>
    %312 = arith.addf %301, %311 : vector<2x64x128xf32>
    %c0_103 = arith.constant 0 : index
    %c0_104 = arith.constant 0 : index
    %c0_105 = arith.constant 0 : index
    %313 = vector.load %arg25[%c0_103, %c0_104, %c0_105] : memref<2x64x128xf32, #tpu.memory_space<vmem>>, vector<2x64x128xf32>
    tpu.vector_store %arg25[%c0_103, %c0_104, %c0_105], %312 {strides = array<i32>} : memref<2x64x128xf32, #tpu.memory_space<vmem>>, vector<2x64x128xf32>,
    return
  }
  func.func @transform_0(%arg0: i32) -> (i32, i32, i32) {
    %c0_i32 = arith.constant 0 : i32
    %c0_i32_0 = arith.constant 0 : i32
    %c0_i32_1 = arith.constant 0 : i32
    return %arg0, %c0_i32, %c0_i32_0 : i32, i32, i32
  }
  func.func @transform_1(%arg0: i32) -> (i32, i32) {
    %c0_i32 = arith.constant 0 : i32
    %c0_i32_0 = arith.constant 0 : i32
    %c0_i32_1 = arith.constant 0 : i32
    return %c0_i32, %c0_i32_0 : i32, i32
  }
  func.func @transform_2(%arg0: i32) -> (i32, i32) {
    %c0_i32 = arith.constant 0 : i32
    %c0_i32_0 = arith.constant 0 : i32
    %c0_i32_1 = arith.constant 0 : i32
    return %c0_i32, %c0_i32_0 : i32, i32
  }
  func.func @transform_3(%arg0: i32) -> (i32, i32) {
    %c0_i32 = arith.constant 0 : i32
    %c0_i32_0 = arith.constant 0 : i32
    %c0_i32_1 = arith.constant 0 : i32
    return %c0_i32, %c0_i32_0 : i32, i32
  }
  func.func @transform_4(%arg0: i32) -> (i32, i32) {
    %c0_i32 = arith.constant 0 : i32
    %c0_i32_0 = arith.constant 0 : i32
    %c0_i32_1 = arith.constant 0 : i32
    return %c0_i32, %c0_i32_0 : i32, i32
  }
  func.func @transform_5(%arg0: i32) -> (i32, i32) {
    %c0_i32 = arith.constant 0 : i32
    %c0_i32_0 = arith.constant 0 : i32
    %c0_i32_1 = arith.constant 0 : i32
    return %c0_i32, %c0_i32_0 : i32, i32
  }
  func.func @transform_6(%arg0: i32) -> (i32, i32) {
    %c0_i32 = arith.constant 0 : i32
    %c0_i32_0 = arith.constant 0 : i32
    %c0_i32_1 = arith.constant 0 : i32
    return %c0_i32, %c0_i32_0 : i32, i32
  }
  func.func @transform_7(%arg0: i32) -> (i32, i32) {
    %c0_i32 = arith.constant 0 : i32
    %c0_i32_0 = arith.constant 0 : i32
    %c0_i32_1 = arith.constant 0 : i32
    return %c0_i32, %c0_i32_0 : i32, i32
  }
  func.func @transform_8(%arg0: i32) -> (i32, i32) {
    %c0_i32 = arith.constant 0 : i32
    %c0_i32_0 = arith.constant 0 : i32
    %c0_i32_1 = arith.constant 0 : i32
    return %c0_i32, %c0_i32_0 : i32, i32
  }
  func.func @transform_9(%arg0: i32) -> (i32, i32) {
    %c0_i32 = arith.constant 0 : i32
    %c0_i32_0 = arith.constant 0 : i32
    %c0_i32_1 = arith.constant 0 : i32
    return %c0_i32, %c0_i32_0 : i32, i32
  }
  func.func @transform_10(%arg0: i32) -> (i32, i32) {
    %c0_i32 = arith.constant 0 : i32
    %c0_i32_0 = arith.constant 0 : i32
    %c0_i32_1 = arith.constant 0 : i32
    return %c0_i32, %c0_i32_0 : i32, i32
  }
  func.func @transform_11(%arg0: i32) -> (i32, i32) {
    %c0_i32 = arith.constant 0 : i32
    %c0_i32_0 = arith.constant 0 : i32
    %c0_i32_1 = arith.constant 0 : i32
    return %c0_i32, %c0_i32_0 : i32, i32
  }
  func.func @transform_12(%arg0: i32) -> (i32, i32) {
    %c0_i32 = arith.constant 0 : i32
    %c0_i32_0 = arith.constant 0 : i32
    %c0_i32_1 = arith.constant 0 : i32
    return %c0_i32, %c0_i32_0 : i32, i32
  }
  func.func @transform_13(%arg0: i32) -> (i32, i32) {
    %c0_i32 = arith.constant 0 : i32
    %c0_i32_0 = arith.constant 0 : i32
    %c0_i32_1 = arith.constant 0 : i32
    return %c0_i32, %c0_i32_0 : i32, i32
  }
  func.func @transform_14(%arg0: i32) -> (i32, i32) {
    %c0_i32 = arith.constant 0 : i32
    %c0_i32_0 = arith.constant 0 : i32
    %c0_i32_1 = arith.constant 0 : i32
    return %c0_i32, %c0_i32_0 : i32, i32
  }
  func.func @transform_15(%arg0: i32) -> (i32, i32) {
    %c0_i32 = arith.constant 0 : i32
    %c0_i32_0 = arith.constant 0 : i32
    %c0_i32_1 = arith.constant 0 : i32
    return %c0_i32, %c0_i32_0 : i32, i32
  }
  func.func @transform_16(%arg0: i32) -> (i32, i32) {
    %c0_i32 = arith.constant 0 : i32
    %c0_i32_0 = arith.constant 0 : i32
    %c0_i32_1 = arith.constant 0 : i32
    return %c0_i32, %c0_i32_0 : i32, i32
  }
  func.func @transform_17(%arg0: i32) -> (i32, i32) {
    %c0_i32 = arith.constant 0 : i32
    %c0_i32_0 = arith.constant 0 : i32
    %c0_i32_1 = arith.constant 0 : i32
    return %c0_i32, %c0_i32_0 : i32, i32
  }
  func.func @transform_18(%arg0: i32) -> (i32, i32) {
    %c0_i32 = arith.constant 0 : i32
    %c0_i32_0 = arith.constant 0 : i32
    %c0_i32_1 = arith.constant 0 : i32
    return %c0_i32, %c0_i32_0 : i32, i32
  }
  func.func @transform_19(%arg0: i32) -> (i32, i32) {
    %c0_i32 = arith.constant 0 : i32
    %c0_i32_0 = arith.constant 0 : i32
    %c0_i32_1 = arith.constant 0 : i32
    return %c0_i32, %c0_i32_0 : i32, i32
  }
  func.func @transform_20(%arg0: i32) -> (i32, i32) {
    %c0_i32 = arith.constant 0 : i32
    %c0_i32_0 = arith.constant 0 : i32
    %c0_i32_1 = arith.constant 0 : i32
    return %c0_i32, %c0_i32_0 : i32, i32
  }
  func.func @transform_21(%arg0: i32) -> (i32, i32) {
    %c0_i32 = arith.constant 0 : i32
    %c0_i32_0 = arith.constant 0 : i32
    %c0_i32_1 = arith.constant 0 : i32
    return %c0_i32, %c0_i32_0 : i32, i32
  }
  func.func @transform_22(%arg0: i32) -> (i32, i32) {
    %c0_i32 = arith.constant 0 : i32
    %c0_i32_0 = arith.constant 0 : i32
    %c0_i32_1 = arith.constant 0 : i32
    return %c0_i32, %c0_i32_0 : i32, i32
  }
  func.func @transform_23(%arg0: i32) -> (i32, i32) {
    %c0_i32 = arith.constant 0 : i32
    %c0_i32_0 = arith.constant 0 : i32
    %c0_i32_1 = arith.constant 0 : i32
    return %c0_i32, %c0_i32_0 : i32, i32
  }
  func.func @transform_24(%arg0: i32) -> (i32, i32, i32) {
    %c0_i32 = arith.constant 0 : i32
    %c0_i32_0 = arith.constant 0 : i32
    %c0_i32_1 = arith.constant 0 : i32
    return %arg0, %c0_i32, %c0_i32_0 : i32, i32, i32
  }
}

</mosaic_0001>

<bundles_post_ra>
// kernel: tpu_custom_call.1
= control target key start
LH: loop header
LB: loop body
LE: loop exit
PB: predicated region body
PF: predicated region fallthrough
CT: control target
= control target key end

     0   :  { %s10167_s0 = inlined_call_operand.vmem [shape: f32[4,64,128], index: 0, kind: input, shape index: {}]   ;;  %s10168_s1 = inlined_call_operand.vmem [shape: f32[2,128], index: 1, kind: input, shape index: {}]   ;;  %s10169_s2 = inlined_call_operand.hbm [shape: bf16[128,128], index: 2, kind: input, shape index: {}]   ;;  %s10170_s3 = inlined_call_operand.vmem [shape: f32[2,128], index: 3, kind: input, shape index: {}]   ;;  %s10171_s4 = inlined_call_operand.hbm [shape: bf16[128,128], index: 4, kind: input, shape index: {}]   ;;  %s10172_s5 = inlined_call_operand.hbm [shape: f32[1,128], index: 5, kind: input, shape index: {}]   ;;  %s10173_s6 = inlined_call_operand.vmem [shape: f32[128,2], index: 6, kind: input, shape index: {}]   ;;  %s10174_s7 = inlined_call_operand.hbm [shape: bf16[128,128], index: 7, kind: input, shape index: {}]   ;;  %s10175_s8 = inlined_call_operand.vmem [shape: f32[128,1], index: 8, kind: input, shape index: {}]   ;;  %s10176_s9 = inlined_call_operand.vmem [shape: f32[2,128], index: 9, kind: input, shape index: {}]   ;;  %s10177_s10 = inlined_call_operand.hbm [shape: bf16[128,128], index: 10, kind: input, shape index: {}]   ;;  %s10178_s11 = inlined_call_operand.vmem [shape: f32[1,128], index: 11, kind: input, shape index: {}]   ;;  %s10179_s12 = inlined_call_operand.vmem [shape: f32[2,128], index: 12, kind: input, shape index: {}]   ;;  %s10180_s13 = inlined_call_operand.hbm [shape: bf16[128,128], index: 13, kind: input, shape index: {}]   ;;  %s10181_s14 = inlined_call_operand.vmem [shape: f32[1,128], index: 14, kind: input, shape index: {}]   ;;  %s10182_s15 = inlined_call_operand.vmem [shape: f32[1,128], index: 15, kind: input, shape index: {}]   ;;  %s10183_s16 = inlined_call_operand.vmem [shape: f32[2,128], index: 16, kind: input, shape index: {}]   ;;  %s10184_s17 = inlined_call_operand.hbm [shape: bf16[128,128], index: 17, kind: input, shape index: {}]   ;;  %s10185_s18 = inlined_call_operand.vmem [shape: f32[2,128], index: 18, kind: input, shape index: {}]   ;;  %s10186_s19 = inlined_call_operand.hbm [shape: bf16[128,128], index: 19, kind: input, shape index: {}]   ;;  %s10187_s20 = inlined_call_operand.vmem [shape: f32[1,128], index: 20, kind: input, shape index: {}]   ;;  %s10188_s21 = inlined_call_operand.hbm [shape: bf16[128,128], index: 21, kind: input, shape index: {}]   ;;  %s10189_s22 = inlined_call_operand.hbm [shape: bf16[128,128], index: 22, kind: input, shape index: {}]   ;;  %s10190_s23 = inlined_call_operand.vmem [shape: f32[1,128], index: 23, kind: input, shape index: {}]   ;;  %s10191_s24 = inlined_call_operand.hbm [shape: f32[4,64,128], index: 24, kind: output, shape index: {}]  }
   0x1   :  { %10282 = sst [smem:[#allocation102_spill]] %s10167_s0 }
   0x2   :  { %10283 = sst [smem:[#allocation103_spill]] %s10168_s1 }
   0x3   :  { %10284 = sst [smem:[#allocation104_spill]] %s10169_s2 }
   0x4   :  { %10285 = sst [smem:[#allocation105_spill]] %s10170_s3 }
   0x5   :  { %10286 = sst [smem:[#allocation106_spill]] %s10171_s4 }
   0x6   :  { %10287 = sst [smem:[#allocation107_spill]] %s10172_s5 }
   0x7   :  { %10288 = sst [smem:[#allocation108_spill]] %s10173_s6 }
   0x8   :  { %10289 = sst [smem:[#allocation109_spill]] %s10174_s7 }
   0x9   :  { %10290 = sst [smem:[#allocation110_spill]] %s10175_s8 }
   0xa   :  { %10291 = sst [smem:[#allocation111_spill]] %s10176_s9 }
   0xb   :  { %10292 = sst [smem:[#allocation112_spill]] %s10187_s20 }
   0xc   :  { %10293 = sst [smem:[#allocation113_spill]] %s10191_s24 }
   0xd   :  { %29 = vsyncpa [#allocation3], 0 }
   0xe   :  { %30 = vsyncpa [#allocation6], 0 }
   0xf   :  { %31 = vsyncpa [#allocation9], 0 }
  0x10   :  { %32 = vsyncpa [#allocation12], 0 }
  0x11   :  { %33 = vsyncpa [#allocation15], 0 }
  0x12   :  { %34 = vsyncpa [#allocation18], 0 }
  0x13   :  { %35 = vsyncpa [#allocation4], 0 }
  0x14   :  { %37 = vsyncpa [#allocation4 + $0x1], 0  ;;  %s7393_s5 = smov 0   ;;  %s7395_s26 = smov 0  }
  0x15   :  { %s7397_s27 = smov 0   ;;  %s7399_s28 = smov 0  }
  0x16 LB: > { %10294 = sst [smem:[#allocation27_spill]] %s7234_s5  ;;  %s7414_s6 = sadd.s32 4294967295, %s7246_s28   ;;  %s7246_s28 = sphi %s7399_s28, %s10490_s28   ;;  %s7242_s27 = sphi %s7397_s27, %s10492_s27   ;;  %s7238_s26 = sphi %s7395_s26, %s10494_s26   ;;  %s7234_s5 = sphi %s7393_s5, %s10493_s5  }
  0x17   : > { %10295 = sst [smem:[#allocation28_spill]] %s7242_s27  ;;  %s5737_s2 = sadd.s32 4294967294, %s7246_s28  }
  0x18   : > { %10296 = sst [smem:[#allocation29_spill]] %s7246_s28  ;;  %s7418_s29 = sadd.s32 1, %s7246_s28  }
  0x19   : > { %10297 = sst [smem:[#allocation30_spill]] %s7418_s29  ;;  %s559_s0 = sadd.s32 1, %s7242_s27 }
  0x1a   : > { %s556_s7 = ssub.s32 %s7246_s28, %s7418_s29  ;;  %p569_p0 = scmp.ne.s32.totalorder %s7242_s27, %s7238_s26 }
  0x1b   : > { %p557_p1 = scmp.eq.s32.totalorder %s556_s7, 0  ;;  %p570_p2 = scmp.eq.s32.totalorder %s7414_s6, 1 }
  0x1c   : > { %p575_p3 = scmp.ne.s32.totalorder %s7238_s26, %s7234_s5  ;;  %p576_p4 = scmp.eq.s32.totalorder %s5737_s2, 1 }
  0x1d   : > { %s7429_s30 = scalar_select %p557_p1, %s7242_s27, %s559_s0  }
  0x1e   : > { %p7431_p5 = por %p570_p2, %p569_p0  ;;  %p7435_p6 = por %p576_p4, %p575_p3 }
  0x1f   : > { %10298 = sst [smem:[#allocation31_spill]] %s7429_s30  ;;  %p5738_p7 = scmp.ge.s32.totalorder %s7246_s28, 1 }
  0x20   : > { %s10299_s3 = scalar_select %p7431_p5, 1, 0 }
  0x21   : > { %s10301_s25 = scalar_select %p7435_p6, 1, 0 }
  0x22   : > { %10300 = sst [smem:[#allocation32_spill]] %s10299_s3  ;;  %p583_p8 = scmp.lt.s32.totalorder %s7246_s28, 3 }
  0x23   : > { %10302 = sst [smem:[#allocation33_spill]] %s10301_s25  ;;  %p10203_p9 = scmp.eq.s32.totalorder %s7414_s6, 0 }
  0x24   : > { %p7442_p10 = pnand %p5738_p7, %p583_p8  ;;  %s7248_s4 = smov [#allocation5]  }
  0x25   : > { %s614_s1 = sshll.u32 %s7248_s4, 4  ;;  %s7249_s0 = smov [#allocation8]   ;;  %s615_s1 = int_to_ptr.vmem [resolvable:$true] %s614_s1 }
  0x26   : > { %s10303_s8 = scalar_select %p7442_p10, 1, 0 }
  0x27   : > { %p6579_p11 = pneg %p7442_p10  ;;  %s641_s7 = sshll.u32 %s7249_s0, 4  ;;  %s642_s7 = int_to_ptr.vmem [resolvable:$true] %s641_s7 }
  0x28   : > { %s7250_s30 = smov [#allocation11]   ;;  %s6913_s25 = scalar_lea.vmem %s615_s1, 1024 }
  0x29   : > { %p7450_p12 = pnand %p10203_p9, %p6579_p11  ;;  %s679_s27 = sshll.u32 %s7250_s30, 4  ;;  %s680_s27 = int_to_ptr.vmem [resolvable:$true] %s679_s27 }
  0x2a   : > { %p6914_p0 = scmp.ne.s32.totalorder %s615_s1, %s6913_s25  ;;  %p6921_p3 = scmp.lt.s32.totalorder %s615_s1, %s615_s1 }
  0x2b   : > { %p7456_p13 = pneg %p7450_p12  ;;  %p6922_p4 = scmp.lt.s32.totalorder %s6913_s25, %s6913_s25 }
  0x2d   : > { %p6916_p1 = pnand %p6914_p0, %p7456_p13  ;;  %p6923_p7 = por %p6922_p4, %p6921_p3 }
  0x2f   : > { %p6917_p2 = pneg %p6916_p1 }
  0x31   : > { %p6924_p8 = pnand %p6923_p7, %p6917_p2 }
  0x33   : > { %6927 = shalt.err (!%p6924_p8)
}
  0x34   : > { %s7251_s4 = smov 64   ;;  %s7252_s30 = smov 4  }
  0x35   : > { %s10306_s28 = sld [smem:[#allocation106_spill]]  ;;  %s6939_s24 = scalar_lea.vmem %s642_s7, 1024 }
  0x36   : > { %p6940_p11 = scmp.ne.s32.totalorder %s642_s7, %s6939_s24  ;;  %p6947_p3 = scmp.lt.s32.totalorder %s642_s7, %s642_s7 }
  0x37   : > { %p6948_p2 = scmp.lt.s32.totalorder %s6939_s24, %s6939_s24 }
  0x38   : > { %p6942_p0 = pnand %p6940_p11, %p7456_p13 }
  0x39   : > { %p6949_p4 = por %p6948_p2, %p6947_p3 }
  0x3a   : > { %p6943_p1 = pneg %p6942_p0 }
  0x3b   : > { %6585 = dma.hbm_to_vmem [thread:$0]  (!%p7450_p12), %s10306_s28, 1024, %s615_s1, [#allocation6], %s7251_s4, %s7251_s4, %s7252_s30  }
  0x3c   : > { %p6950_p7 = pnand %p6949_p4, %p6943_p1 }
  0x3e   : > { %6953 = shalt.err (!%p6950_p7)
}
  0x3f   : > { %s10307_s20 = sld [smem:[#allocation109_spill]]  ;;  %s6965_s5 = scalar_lea.vmem %s680_s27, 1024 }
  0x40   : > { %p6966_p8 = scmp.ne.s32.totalorder %s680_s27, %s6965_s5  ;;  %p6973_p9 = scmp.lt.s32.totalorder %s680_s27, %s680_s27 }
  0x41   : > { %p6974_p3 = scmp.lt.s32.totalorder %s6965_s5, %s6965_s5 }
  0x42   : > { %p6968_p11 = pnand %p6966_p8, %p7456_p13 }
  0x43   : > { %p6975_p1 = por %p6974_p3, %p6973_p9 }
  0x44   : > { %p6969_p0 = pneg %p6968_p11 }
  0x45   : > { %6591 = dma.hbm_to_vmem [thread:$0]  (!%p7450_p12), %s10307_s20, 1024, %s642_s7, [#allocation9], %s7251_s4, %s7251_s4, %s7252_s30  }
  0x46   : > { %p6976_p2 = pnand %p6975_p1, %p6969_p0 }
  0x48   : > { %6979 = shalt.err (!%p6976_p2)
}
  0x49   : > { %6597 = dma.hbm_to_vmem [thread:$0]  (!%p7450_p12), %s10180_s13, 1024, %s680_s27, [#allocation12], %s7251_s4, %s7251_s4, %s7252_s30  }
  0x4a   : > { %s7253_s20 = smov [#allocation14]   ;;  %s7254_s1 = smov [#allocation2]  }
  0x4b   : > { %s717_s3 = sshll.u32 %s7253_s20, 4  ;;  %s598_s7 = sshll.u32 %s7254_s1, 4  ;;  %s718_s3 = int_to_ptr.vmem [resolvable:$true] %s717_s3  ;;  %s599_s7 = int_to_ptr.vmem [resolvable:$true] %s598_s7 }
  0x4c   : > { %s6991_s0 = scalar_lea.vmem %s718_s3, 1024  ;;  %p6999_p8 = scmp.lt.s32.totalorder %s718_s3, %s718_s3 }
  0x4d   : > { %p6992_p4 = scmp.ne.s32.totalorder %s718_s3, %s6991_s0  ;;  %p7000_p11 = scmp.lt.s32.totalorder %s6991_s0, %s6991_s0 }
  0x4f   : > { %p6994_p9 = pnand %p6992_p4, %p7456_p13  ;;  %p7001_p0 = por %p7000_p11, %p6999_p8 }
  0x51   : > { %p6995_p7 = pneg %p6994_p9 }
  0x53   : > { %p7002_p3 = pnand %p7001_p0, %p6995_p7 }
  0x55   : > { %7005 = shalt.err (!%p7002_p3)
}
  0x56   : > { %6603 = dma.hbm_to_vmem [thread:$0]  (!%p7450_p12), %s10186_s19, 1024, %s718_s3, [#allocation15], %s7251_s4, %s7251_s4, %s7252_s30  }
  0x57   : > { %s7017_s5 = scalar_lea.vmem %s599_s7, 1024  ;;  %p7025_p9 = scmp.lt.s32.totalorder %s599_s7, %s599_s7 }
  0x58   : > { %p7018_p1 = scmp.ne.s32.totalorder %s599_s7, %s7017_s5  ;;  %p7026_p8 = scmp.lt.s32.totalorder %s7017_s5, %s7017_s5 }
  0x5a   : > { %p7020_p2 = pnand %p7018_p1, %p7456_p13  ;;  %p7027_p7 = por %p7026_p8, %p7025_p9 }
  0x5c   : > { %p7021_p4 = pneg %p7020_p2 }
  0x5e   : > { %p7028_p11 = pnand %p7027_p7, %p7021_p4 }
  0x60   : > { %7031 = shalt.err (!%p7028_p11)
}
  0x61   : > { %s10308_s20 = sld [smem:[#allocation104_spill]]  ;;  %s7255_s3 = smov [#allocation7]  }
  0x62   : > { %s628_s1 = sshll.u32 %s7255_s3, 4  ;;  %s7256_s0 = smov [#allocation10]   ;;  %s629_s1 = int_to_ptr.vmem [resolvable:$true] %s628_s1 }
  0x63   : > { %s660_s27 = sshll.u32 %s7256_s0, 4  ;;  %s7043_s25 = scalar_lea.vmem %s629_s1, 16  ;;  %s661_s27 = int_to_ptr.vmem [resolvable:$true] %s660_s27 }
  0x64   : > { %p7044_p0 = scmp.ne.s32.totalorder %s629_s1, %s7043_s25  ;;  %s7050_s5 = scalar_lea.vmem %s629_s1, 32 }
  0x65   : > { %p7051_p2 = scmp.lt.s32.totalorder %s629_s1, %s629_s1  ;;  %p7052_p4 = scmp.lt.s32.totalorder %s7050_s5, %s7043_s25 }
  0x66   : > { %p7046_p3 = pnand %p7044_p0, %p7456_p13 }
  0x67   : > { %6582 = dma.hbm_to_vmem [thread:$0]  (!%p7450_p12), %s10308_s20, 1024, %s599_s7, [#allocation3], %s7251_s4, %s7251_s4, %s7252_s30  }
  0x68   : > { %p7047_p1 = pneg %p7046_p3  ;;  %p7053_p9 = por %p7052_p4, %p7051_p2 }
  0x6a   : > { %p7054_p8 = pnand %p7053_p9, %p7047_p1 }
  0x6c   : > { %7057 = shalt.err (!%p7054_p8)
}
  0x6d   : > { %s10309_s28 = sld [smem:[#allocation107_spill]]  ;;  %s7069_s20 = scalar_lea.vmem %s661_s27, 1024 }
  0x6e   : > { %p7070_p7 = scmp.ne.s32.totalorder %s661_s27, %s7069_s20  ;;  %p7077_p3 = scmp.lt.s32.totalorder %s661_s27, %s661_s27 }
  0x6f   : > { %p7078_p6 = scmp.lt.s32.totalorder %s7069_s20, %s7069_s20 }
  0x70   : > { %p7072_p11 = pnand %p7070_p7, %p7456_p13 }
  0x71   : > { %p7079_p5 = por %p7078_p6, %p7077_p3 }
  0x72   : > { %p7073_p0 = pneg %p7072_p11 }
  0x73   : > { %6588 = dma.hbm_to_vmem [thread:$0]  (!%p7450_p12), %s10309_s28, 16, %s629_s1, [#allocation6]  }
  0x74   : > { %p7080_p10 = pnand %p7079_p5, %p7073_p0 }
  0x76   : > { %7083 = shalt.err (!%p7080_p10)
}
  0x77   : > { %6594 = dma.hbm_to_vmem [thread:$0]  (!%p7450_p12), %s10177_s10, 1024, %s661_s27, [#allocation9], %s7251_s4, %s7251_s4, %s7252_s30  }
  0x78   : > { %s7257_s1 = smov [#allocation13]   ;;  %s7258_s5 = smov [#allocation16]  }
  0x79   : > { %s701_s25 = sshll.u32 %s7257_s1, 4  ;;  %s733_s24 = sshll.u32 %s7258_s5, 4  ;;  %s702_s25 = int_to_ptr.vmem [resolvable:$true] %s701_s25  ;;  %s734_s24 = int_to_ptr.vmem [resolvable:$true] %s733_s24 }
  0x7a   : > { %s7095_s7 = scalar_lea.vmem %s702_s25, 1024  ;;  %p7103_p10 = scmp.lt.s32.totalorder %s702_s25, %s702_s25 }
  0x7b   : > { %p7096_p1 = scmp.ne.s32.totalorder %s702_s25, %s7095_s7  ;;  %p7104_p2 = scmp.lt.s32.totalorder %s7095_s7, %s7095_s7 }
  0x7d   : > { %p7098_p5 = pnand %p7096_p1, %p7456_p13  ;;  %p7105_p4 = por %p7104_p2, %p7103_p10 }
  0x7f   : > { %p7099_p6 = pneg %p7098_p5 }
  0x81   : > { %p7106_p9 = pnand %p7105_p4, %p7099_p6 }
  0x83   : > { %7109 = shalt.err (!%p7106_p9)
}
  0x84   : > { %6600 = dma.hbm_to_vmem [thread:$0]  (!%p7450_p12), %s10184_s17, 1024, %s702_s25, [#allocation12], %s7251_s4, %s7251_s4, %s7252_s30  }
  0x85   : > { %s7121_s20 = scalar_lea.vmem %s734_s24, 1024  ;;  %p7129_p0 = scmp.lt.s32.totalorder %s734_s24, %s734_s24 }
  0x86   : > { %p7122_p8 = scmp.ne.s32.totalorder %s734_s24, %s7121_s20  ;;  %p7130_p3 = scmp.lt.s32.totalorder %s7121_s20, %s7121_s20 }
  0x88   : > { %p7124_p7 = pnand %p7122_p8, %p7456_p13  ;;  %p7131_p1 = por %p7130_p3, %p7129_p0 }
  0x8a   : > { %p7125_p11 = pneg %p7124_p7 }
  0x8c   : > { %p7132_p5 = pnand %p7131_p1, %p7125_p11 }
  0x8e   : > { %7135 = shalt.err (!%p7132_p5)
}
  0x8f   : > { %6606 = dma.hbm_to_vmem [thread:$0]  (!%p7450_p12), %s10188_s21, 1024, %s734_s24, [#allocation15], %s7251_s4, %s7251_s4, %s7252_s30  }
  0x90   : > { %s7259_s1 = smov [#allocation17]  }
  0x91   : > { %s746_s25 = sshll.u32 %s7259_s1, 4  ;;  %s747_s25 = int_to_ptr.vmem [resolvable:$true] %s746_s25 }
  0x92   : > { %s7147_s5 = scalar_lea.vmem %s747_s25, 1024  ;;  %p7155_p4 = scmp.lt.s32.totalorder %s747_s25, %s747_s25 }
  0x93   : > { %p7148_p6 = scmp.ne.s32.totalorder %s747_s25, %s7147_s5  ;;  %p7156_p9 = scmp.lt.s32.totalorder %s7147_s5, %s7147_s5 }
  0x95   : > { %p7150_p10 = pnand %p7148_p6, %p7456_p13  ;;  %p7157_p8 = por %p7156_p9, %p7155_p4 }
  0x97   : > { %p7151_p2 = pneg %p7150_p10 }
  0x99   : > { %p7158_p7 = pnand %p7157_p8, %p7151_p2 }
  0x9b   : > { %7161 = shalt.err (!%p7158_p7)
}
  0x9c   : > { %6609 = dma.hbm_to_vmem [thread:$0]  (!%p7450_p12), %s10189_s22, 1024, %s747_s25, [#allocation18], %s7251_s4, %s7251_s4, %s7252_s30  }
  0x9d   : > { %p10310_p11 = scmp.ne.s32.totalorder %s10303_s8, 0 }
  0x9f   : > { %775 = sbr.rel (%p10310_p11) target bundleno = 2595 (0xa23), region = 116 }
  0xa4   : > { %p10311_p13 = scmp.eq.s32.totalorder %s7414_s6, 0 }
  0xa6   : > { %7205 = dma.done.wait (%p10311_p13), [#allocation3], 1024   ;;  %p10312_p0 = pmov %p10311_p13 }
  0xa8   : > { %7207 = vsyncadd (%p10312_p0), [#allocation3], 4294966272  ;;  %p10313_p3 = pmov %p10312_p0 }
  0xa9   : > { %p10314_p1 = pmov %p10312_p0 }
  0xaa   : > { %7209 = dma.done.wait (%p10313_p3), [#allocation6], 1040  }
  0xab   : > { %7211 = vsyncadd (%p10314_p1), [#allocation6], 4294966256  ;;  %p10315_p5 = pmov %p10312_p0 }
  0xac   : > { %p10316_p12 = pmov %p10312_p0 }
  0xad   : > { %7213 = dma.done.wait (%p10315_p5), [#allocation9], 2048  }
  0xae   : > { %7215 = vsyncadd (%p10316_p12), [#allocation9], 4294965248  ;;  %p10317_p6 = pmov %p10312_p0 }
  0xaf   : > { %p10318_p10 = pmov %p10312_p0 }
  0xb0   : > { %7217 = dma.done.wait (%p10317_p6), [#allocation12], 2048  }
  0xb1   : > { %7219 = vsyncadd (%p10318_p10), [#allocation12], 4294965248  ;;  %p10319_p2 = pmov %p10312_p0 }
  0xb2   : > { %p10320_p4 = pmov %p10312_p0 }
  0xb3   : > { %7221 = dma.done.wait (%p10319_p2), [#allocation15], 2048  }
  0xb4   : > { %7223 = vsyncadd (%p10320_p4), [#allocation15], 4294965248  ;;  %p10321_p9 = pmov %p10312_p0 }
  0xb5   : > { %p10322_p8 = pmov %p10312_p0 }
  0xb6   : > { %7225 = dma.done.wait (%p10321_p9), [#allocation18], 1024  }
  0xb7   : > { %7227 = vsyncadd (%p10322_p8), [#allocation18], 4294966272  ;;  %s5762_s29 = sshll.u32 %s7414_s6, 1  ;;  %v6706_v0 = vld [vmem:[#allocation2 + $0x38] sm:$0xff]   ;;  %v6707_v1 = vld [vmem:[#allocation2 + $0x30] sm:$0xff]   ;;  %s10323_s30 = sld [smem:[#allocation102_spill]] }
  0xb8   : > { %p879_p7 = scmp.lt.s32.totalorder %s5762_s29, 3  ;;  %6085 = vmatprep.subr.bf16.mxu0 %v6706_v0  ;;  %v6708_v2 = vld [vmem:[#allocation2 + $0x28] sm:$0xff]   ;;  %v6709_v3 = vld [vmem:[#allocation2 + $0x20] sm:$0xff]   ;;  %v6710_v12 = vld [vmem:[#allocation2 + $0x18] sm:$0xff]   ;;  %s10327_s3 = sld [smem:[#allocation103_spill]]  ;;  %vm1581_vm0 = vcmask 523264  }
  0xb9   : > { %6086 = vmatpush3.bf16.msra.mxu0 %v6706_v0  ;;  %v6711_v24 = vld [vmem:[#allocation2 + $0x10] sm:$0xff]   ;;  %v6712_v41 = vld [vmem:[#allocation2 + $0x8] sm:$0xff]   ;;  %v6713_v61 = vld [vmem:[#allocation2] sm:$0xff]   ;;  %s10342_s25 = sld [smem:[#allocation108_spill]]  ;;  %vm7263_vm1 = vmmov 0   ;;  %vm4367_vm2 = vcmask 130112  }
  0xba   : > { %s10496_s29 = smov (!%p879_p7, %s5762_s29), 3  ;;  %6087 = vmatprep.subr.bf16.mxu0 %v6707_v1  ;;  %s10432_s9 = sld [smem:[#allocation111_spill]]  ;;  %vm4374_vm3 = vcmask 195712   ;;  %vm4381_vm4 = vcmask 261312   ;;  %vm4388_vm5 = vcmask 326912   ;;  %vm4395_vm6 = vcmask 392512  }
  0xbb   : > { %s5865_s8 = sshll.u32 %s10496_s29, 6  ;;  %vm4402_vm7 = vcmask 458112   ;;  %vm4409_vm8 = vcmask 523712   ;;  %vm4416_vm9 = vcmask 589312   ;;  %vm4423_vm10 = vcmask 654912   ;;  %s875_s7 = sand.u32 1, %s7238_s26  }
  0xbc   : > { %vm4430_vm11 = vcmask 720512   ;;  %vm4437_vm12 = vcmask 786112   ;;  %vm4444_vm13 = vcmask 851712   ;;  %vm4451_vm14 = vcmask 917312   ;;  %s5761_s2 = sshll.u32 %s875_s7, 7  ;;  %s5867_s28 = sshll.u32 %s7414_s6, 11 }
  0xbd   : > { %s7587_s27 = scalar_lea.vmem %s10323_s30, %s5865_s8  ;;  %6088 = vmatpush3.bf16.msra.mxu0 %v6707_v1  ;;  %s10375_s8 = sld [smem:[#allocation105_spill]]  ;;  %vm4458_vm15 = vcmask 982912  }
  0xbe   : > { %6089 = vmatprep.subr.bf16.mxu0 %v6708_v2  ;;  %v7590_v4 = vld [vmem:[%s7587_s27] sm:$0xff]  ;;  %v7593_v5 = vld [vmem:[%s7587_s27 + $0x8] sm:$0xff]  ;;  %v7596_v6 = vld [vmem:[%s7587_s27 + $0x10] sm:$0xff]  ;;  %s10377_s30 = sld [smem:[#allocation110_spill]]  ;;  %s10072_s4 = scalar_lea.vmem [#allocation19], %s5761_s2 }
  0xbf   : > { %v7599_v7 = vld [vmem:[%s7587_s27 + $0x18] sm:$0xff]  ;;  %v1099_v8 = vadd.f32 %v7593_v5, %v7590_v4  ;;  %v1128_v9 = vmul.f32 %v7590_v4, %v7590_v4  ;;  %v1129_v10 = vmul.f32 %v7593_v5, %v7593_v5  ;;  %v1130_v11 = vmul.f32 %v7596_v6, %v7596_v6  ;;  %v7610_v13 = vld [vmem:[%s7587_s27 + $0x20] sm:$0xff]  ;;  %v7619_v18 = vld [vmem:[%s7587_s27 + $0x48] sm:$0xff]  ;;  %s5577_s20 = sshll.u32 %s10072_s4, 4  ;;  %s10484_s1 = sld [smem:[#allocation113_spill]]  ;;  %s10121_s20 = int_to_ptr.vmem [resolvable:$true] %s5577_s20 }
  0xc0   : > { %v1131_v15 = vmul.f32 %v7599_v7, %v7599_v7  ;;  %v7616_v17 = vld [vmem:[%s7587_s27 + $0x40] sm:$0xff]  ;;  %v7622_v19 = vld [vmem:[%s7587_s27 + $0x50] sm:$0xff]  ;;  %v7625_v20 = vld [vmem:[%s7587_s27 + $0x28] sm:$0xff]  ;;  %v1132_v26 = vmul.f32 %v7610_v13, %v7610_v13  ;;  %v1137_v30 = vmul.f32 %v7619_v18, %v7619_v18  ;;  %s10127_s6 = scalar_lea.sflag [#allocation4], %s875_s7  ;;  %s7162_s24 = scalar_lea.vmem %s10121_s20, 2048 }
  0xc1   : > { %6090 = vmatpush3.bf16.msra.mxu0 %v6708_v2  ;;  %v1100_v14 = vadd.f32 %v1099_v8, %v7596_v6  ;;  %v1144_v16 = vadd.f32 %v1129_v10, %v1128_v9  ;;  %v7628_v21 = vld [vmem:[%s7587_s27 + $0x30] sm:$0xff]  ;;  %v1112_v22 = vadd.f32 %v7619_v18, %v7616_v17  ;;  %v1136_v23 = vmul.f32 %v7616_v17, %v7616_v17  ;;  %v7638_v28 = vld [vmem:[%s7587_s27 + $0x58] sm:$0xff]  ;;  %v7641_v29 = vld [vmem:[%s7587_s27 + $0x60] sm:$0xff]  ;;  %p7163_p11 = scmp.ne.s32.totalorder %s10121_s20, %s7162_s24  ;;  %s7265_s29 = smov [#allocation19]  }
  0xc2   : > { %6091 = vmatprep.subr.bf16.mxu0 %v6709_v3  ;;  %v7646_v31 = vld [vmem:[%s7587_s27 + $0x38] sm:$0xff]  ;;  %v1138_v33 = vmul.f32 %v7622_v19, %v7622_v19  ;;  %v1133_v35 = vmul.f32 %v7625_v20, %v7625_v20  ;;  %v7655_v37 = vld [vmem:[%s7587_s27 + $0x68] sm:$0xff]  ;;  %v1139_v39 = vmul.f32 %v7638_v28, %v7638_v28  ;;  %v1134_v43 = vmul.f32 %v7628_v21, %v7628_v21  ;;  %v7664_v45 = vld [vmem:[%s7587_s27 + $0x70] sm:$0xff] }
  0xc3   : > { %v1101_v25 = vadd.f32 %v1100_v14, %v7599_v7  ;;  %v1145_v27 = vadd.f32 %v1144_v16, %v1130_v11  ;;  %v1113_v32 = vadd.f32 %v1112_v22, %v7622_v19  ;;  %v1157_v40 = vadd.f32 %v1137_v30, %v1136_v23  ;;  %v7673_v52 = vld [vmem:[%s7587_s27 + $0x78] sm:$0xff] }
  0xc4   : > { %v1140_v47 = vmul.f32 %v7641_v29, %v7641_v29  ;;  %v1135_v50 = vmul.f32 %v7646_v31, %v7646_v31  ;;  %v1141_v54 = vmul.f32 %v7655_v37, %v7655_v37  ;;  %v1142_v59 = vmul.f32 %v7664_v45, %v7664_v45 }
  0xc5   : > { %6092 = vmatpush3.bf16.msra.mxu0 %v6709_v3  ;;  %v1102_v34 = vadd.f32 %v1101_v25, %v7610_v13  ;;  %v1146_v36 = vadd.f32 %v1145_v27, %v1131_v15  ;;  %v1114_v38 = vadd.f32 %v1113_v32, %v7638_v28  ;;  %v1158_v48 = vadd.f32 %v1157_v40, %v1138_v33  ;;  %s10119_s5 = scalar_lea.hbm %s10484_s1, %s5867_s28 }
  0xc6   : > { %6093 = vmatprep.subr.bf16.mxu0 %v6710_v12  ;;  %v1143_v1 = vmul.f32 %v7673_v52, %v7673_v52 }
  0xc7   : > { %v1103_v42 = vadd.f32 %v1102_v34, %v7625_v20  ;;  %v1147_v44 = vadd.f32 %v1146_v36, %v1132_v26  ;;  %v1115_v46 = vadd.f32 %v1114_v38, %v7641_v29  ;;  %v1159_v55 = vadd.f32 %v1158_v48, %v1139_v39 }
  0xc8   : > { %v10206_v39 = vlaneseq }
  0xc9   : > { %6094 = vmatpush3.bf16.msra.mxu0 %v6710_v12  ;;  %v1104_v49 = vadd.f32 %v1103_v42, %v7628_v21  ;;  %v1148_v51 = vadd.f32 %v1147_v44, %v1133_v35  ;;  %v1116_v53 = vadd.f32 %v1115_v46, %v7655_v37  ;;  %v1160_v60 = vadd.f32 %v1159_v55, %v1140_v47 }
  0xca   : > { %6095 = vmatprep.subr.bf16.mxu0 %v6711_v24  ;;  %v7688_v47 = vshrl.u32 %v10206_v39, 7 }
  0xcb   : > { %v1105_v56 = vadd.f32 %v1104_v49, %v7646_v31  ;;  %v1149_v57 = vadd.f32 %v1148_v51, %v1134_v43  ;;  %v1117_v58 = vadd.f32 %v1116_v53, %v7664_v45  ;;  %v1161_v2 = vadd.f32 %v1160_v60, %v1141_v54  ;;  %v887_v60 = vld [vmem:[%s10327_s3] sm:$0x3] }
  0xcc   : > { %10324 = vst [vmem:[#allocation34_spill] sm:$0xff] %v7688_v47  ;;  %v7693_v54 = vsub.s32 0, %v7688_v47 }
  0xcd   : > { %6096 = vmatpush3.bf16.msra.mxu0 %v6711_v24  ;;  %v1106_v62 = vrot.slane %v1105_v56, 4  ;;  %v1150_v63 = vadd.f32 %v1149_v57, %v1135_v50  ;;  %v1118_v0 = vadd.f32 %v1117_v58, %v7673_v52  ;;  %v1162_v10 = vadd.f32 %v1161_v2, %v1142_v59 }
  0xce   : > { %6097 = vmatprep.subr.bf16.mxu0 %v6712_v41  ;;  %10325 = vst [vmem:[#allocation35_spill] sm:$0xff] %v7693_v54  ;;  %v7696_v57 = vsub.s32 1, %v7688_v47 }
  0xcf   : > { %v1107_v3 = vadd.f32 %v1106_v62, %v1105_v56  ;;  %v1151_v8 = vrot.slane %v1150_v63, 4  ;;  %v1119_v9 = vrot.slane %v1118_v0, 4  ;;  %v1163_v15 = vadd.f32 %v1162_v10, %v1143_v1 }
  0xd0   : > { %10326 = vst [vmem:[#allocation36_spill] sm:$0xff] %v7696_v57  ;;  %v7713_v10 = vrot.slane %v887_v60, %v7696_v57 }
  0xd1   : > { %6098 = vmatpush3.bf16.msra.mxu0 %v6712_v41  ;;  %v1108_v11 = vrot.slane %v1107_v3, 2  ;;  %v1152_v12 = vadd.f32 %v1151_v8, %v1150_v63  ;;  %v1120_v14 = vadd.f32 %v1119_v9, %v1118_v0  ;;  %v1164_v24 = vrot.slane %v1163_v15, 4 }
  0xd2   : > { %6099 = vmatprep.subr.bf16.mxu0 %v6713_v61  ;;  %v7710_v9 = vrot.slane %v887_v60, %v7693_v54 }
  0xd3   : > { %v1109_v16 = vadd.f32 %v1108_v11, %v1107_v3  ;;  %v1153_v22 = vrot.slane %v1152_v12, 2  ;;  %v1121_v23 = vrot.slane %v1120_v14, 2  ;;  %v1165_v30 = vadd.f32 %v1164_v24, %v1163_v15 }
  0xd5   : > { %6100 = vmatpush3.bf16.msra.mxu0 %v6713_v61  ;;  %v1110_v25 = vrot.slane %v1109_v16, 1  ;;  %v1154_v26 = vadd.f32 %v1153_v22, %v1152_v12  ;;  %v1122_v27 = vadd.f32 %v1121_v23, %v1120_v14  ;;  %v1166_v35 = vrot.slane %v1165_v30, 2 }
  0xd7   : > { %v1111_v32 = vadd.f32 %v1110_v25, %v1109_v16  ;;  %v1155_v33 = vrot.slane %v1154_v26, 1  ;;  %v1123_v34 = vrot.slane %v1122_v27, 1  ;;  %v1167_v41 = vadd.f32 %v1166_v35, %v1165_v30 }
  0xd9   : > { %v1126_v36 = vmul.f32 0.015625, %v1111_v32  ;;  %v1156_v38 = vadd.f32 %v1155_v33, %v1154_v26  ;;  %v1124_v40 = vadd.f32 %v1123_v34, %v1122_v27  ;;  %v1168_v48 = vrot.slane %v1167_v41, 1 }
  0xdb   : > { %v1170_v42 = vmul.f32 0.015625, %v1156_v38  ;;  %v1172_v43 = vmul.f32 %v1126_v36, %v1126_v36  ;;  %v7685_v46 = vmul.f32 0.015625, %v1124_v40  ;;  %v1169_v50 = vadd.f32 %v1168_v48, %v1167_v41 }
  0xdc   : > { %v1178_v61 = vsub.f32 %v7590_v4, %v1126_v36  ;;  %v1179_v62 = vsub.f32 %v7593_v5, %v1126_v36  ;;  %v1180_v63 = vsub.f32 %v7596_v6, %v1126_v36  ;;  %v1181_v0 = vsub.f32 %v7599_v7, %v1126_v36 }
  0xdd   : > { %v1174_v44 = vsub.f32 %v1170_v42, %v1172_v43  ;;  %v1173_v51 = vmul.f32 %v7685_v46, %v7685_v46  ;;  %v1171_v55 = vmul.f32 0.015625, %v1169_v50  ;;  %v1182_v1 = vsub.f32 %v7610_v13, %v1126_v36 }
  0xde   : > { %v1183_v2 = vsub.f32 %v7625_v20, %v1126_v36  ;;  %v1184_v3 = vsub.f32 %v7628_v21, %v1126_v36  ;;  %v1185_v8 = vsub.f32 %v7646_v31, %v1126_v36  ;;  %v1186_v12 = vsub.f32 %v7616_v17, %v7685_v46 }
  0xdf   : > { %v1176_v49 = vmax.f32 %v1174_v44, 0.0  ;;  %v1175_v56 = vsub.f32 %v1171_v55, %v1173_v51  ;;  %v1187_v14 = vsub.f32 %v7619_v18, %v7685_v46  ;;  %v1188_v15 = vsub.f32 %v7622_v19, %v7685_v46 }
  0xe0   : > { %v1189_v16 = vsub.f32 %v7638_v28, %v7685_v46  ;;  %v1190_v35 = vsub.f32 %v7641_v29, %v7685_v46  ;;  %v1191_v36 = vsub.f32 %v7655_v37, %v7685_v46 }
  0xe1   : > { %v1194_v53 = vadd.f32 0.001, %v1176_v49  ;;  %v1177_v58 = vmax.f32 %v1175_v56, 0.0 }
  0xe3   : > { %6778 = vrsqrt.f32 %v1194_v53  ;;  %v1195_v59 = vadd.f32 0.001, %v1177_v58 }
  0xe5   : > { %6780 = vrsqrt.f32 %v1195_v59 }
  0xf0   : > { %v6779_v11 = vpop.eup %6778 }
  0xf1   : > { %v7723_v22 = vmul.f32 %v6779_v11, %v1178_v61  ;;  %v7725_v23 = vmul.f32 %v6779_v11, %v1179_v62  ;;  %v7727_v24 = vmul.f32 %v6779_v11, %v1180_v63  ;;  %v7729_v25 = vmul.f32 %v6779_v11, %v1181_v0 }
  0xf2   : > { %v7731_v26 = vmul.f32 %v6779_v11, %v1182_v1  ;;  %v7733_v17 = vmul.f32 %v6779_v11, %v1183_v2  ;;  %v7735_v27 = vmul.f32 %v6779_v11, %v1184_v3  ;;  %v7737_v18 = vmul.f32 %v6779_v11, %v1185_v8  ;;  %v6781_v50 = vpop.eup %6780 }
  0xf3   : > { %10328 = vst [vmem:[#allocation37_spill] sm:$0xff] %v7723_v22  ;;  %10329 = vst [vmem:[#allocation38_spill] sm:$0xff] %v7725_v23  ;;  %v1218_v19 = vmul.f32 %v7710_v9, %v7723_v22  ;;  %v1219_v28 = vmul.f32 %v7710_v9, %v7725_v23  ;;  %v1220_v30 = vmul.f32 %v7710_v9, %v7727_v24 }
  0xf4   : > { %10330 = vst [vmem:[#allocation39_spill] sm:$0xff] %v7731_v26  ;;  %10331 = vst [vmem:[#allocation40_spill] sm:$0xff] %v7733_v17  ;;  %v1221_v32 = vmul.f32 %v7710_v9, %v7729_v25  ;;  %v1222_v33 = vmul.f32 %v7710_v9, %v7731_v26  ;;  %v1223_v34 = vmul.f32 %v7710_v9, %v7733_v17 }
  0xf5   : > { %10332 = vst [vmem:[#allocation41_spill] sm:$0xff] %v7735_v27  ;;  %10333 = vst [vmem:[#allocation42_spill] sm:$0xff] %v7737_v18  ;;  %v1238_v38 = vadd.f32 %v7713_v10, %v1218_v19  ;;  %v1239_v40 = vadd.f32 %v7713_v10, %v1219_v28  ;;  %v1240_v41 = vadd.f32 %v7713_v10, %v1220_v30 }
  0xf6   : > { %v1241_v42 = vadd.f32 %v7713_v10, %v1221_v32  ;;  %v1242_v43 = vadd.f32 %v7713_v10, %v1222_v33  ;;  %v1243_v44 = vadd.f32 %v7713_v10, %v1223_v34  ;;  %v1224_v48 = vmul.f32 %v7710_v9, %v7735_v27 }
  0xf7   : > { %v1225_v49 = vmul.f32 %v7710_v9, %v7737_v18  ;;  %v1254_v51 = vmax.f32 %v1238_v38, 0.0  ;;  %v1255_v53 = vmax.f32 %v1239_v40, 0.0  ;;  %v1256_v55 = vmax.f32 %v1240_v41, 0.0 }
  0xf8   : > { %v1257_v56 = vmax.f32 %v1241_v42, 0.0  ;;  %v1258_v58 = vmax.f32 %v1242_v43, 0.0  ;;  %v1259_v59 = vmax.f32 %v1243_v44, 0.0  ;;  %v1244_v60 = vadd.f32 %v7713_v10, %v1224_v48 }
  0xf9   : > { %v1245_v61 = vadd.f32 %v7713_v10, %v1225_v49  ;;  %v1270_v62 = vpack.c.bf16 %v1255_v53, %v1254_v51  ;;  %v7767_v0 = vmul.f32 %v6781_v50, %v1186_v12  ;;  %v7769_v1 = vmul.f32 %v6781_v50, %v1187_v14 }
  0xfa   : > { %v1271_v63 = vpack.c.bf16 %v1257_v56, %v1256_v55  ;;  %v1272_v2 = vpack.c.bf16 %v1259_v59, %v1258_v58  ;;  %v1260_v3 = vmax.f32 %v1244_v60, 0.0  ;;  %v7771_v11 = vmul.f32 %v6781_v50, %v1188_v15 }
  0xfb   : > { %10334 = vst [vmem:[#allocation43_spill] sm:$0xff] %v7767_v0  ;;  %10335 = vst [vmem:[#allocation44_spill] sm:$0xff] %v7769_v1  ;;  %v1261_v8 = vmax.f32 %v1245_v61, 0.0  ;;  %6101 = vmatprep.mubr.bf16.mxu0 %v1270_v62  ;;  %v1226_v19 = vmul.f32 %v7710_v9, %v7767_v0  ;;  %v1227_v28 = vmul.f32 %v7710_v9, %v7769_v1 }
  0xfc   : > { %10336 = vst [vmem:[#allocation45_spill] sm:$0xff] %v7771_v11  ;;  %v7777_v30 = vmul.f32 %v6781_v50, %v1189_v16  ;;  %v7779_v32 = vmul.f32 %v6781_v50, %v1190_v35  ;;  %6102 = vmatmul.mubr.bf16.vlgmr.msra.gmra.mxu0 %v1271_v63  ;;  %v1228_v12 = vmul.f32 %v7710_v9, %v7771_v11 }
  0xfd   : > { %v7783_v14 = vmul.f32 %v6781_v50, %v1191_v36  ;;  %v1192_v15 = vsub.f32 %v7664_v45, %v7685_v46  ;;  %v1193_v33 = vsub.f32 %v7673_v52, %v7685_v46  ;;  %6105 = vmatprep.mubr.bf16.mxu0 %v1272_v2  ;;  %v1246_v34 = vadd.f32 %v7713_v10, %v1226_v19 }
  0xfe   : > { %10337 = vst [vmem:[#allocation46_spill] sm:$0xff] %v7777_v30  ;;  %10338 = vst [vmem:[#allocation47_spill] sm:$0xff] %v7779_v32  ;;  %v1247_v16 = vadd.f32 %v7713_v10, %v1227_v28  ;;  %v1229_v35 = vmul.f32 %v7710_v9, %v7777_v30  ;;  %v1230_v38 = vmul.f32 %v7710_v9, %v7779_v32 }
  0xff   : > { %10339 = vst [vmem:[#allocation48_spill] sm:$0xff] %v7783_v14  ;;  %v1231_v36 = vmul.f32 %v7710_v9, %v7783_v14  ;;  %v1273_v40 = vpack.c.bf16 %v1261_v8, %v1260_v3  ;;  %v1262_v41 = vmax.f32 %v1246_v34, 0.0  ;;  %v1248_v43 = vadd.f32 %v7713_v10, %v1228_v12 }
 0x100   : > { %v1263_v42 = vmax.f32 %v1247_v16, 0.0  ;;  %v1249_v46 = vadd.f32 %v7713_v10, %v1229_v35  ;;  %v7799_v44 = vmul.f32 %v6781_v50, %v1192_v15  ;;  %v7801_v48 = vmul.f32 %v6781_v50, %v1193_v33 }
 0x101   : > { %v1250_v51 = vadd.f32 %v7713_v10, %v1230_v38  ;;  %v1251_v53 = vadd.f32 %v7713_v10, %v1231_v36  ;;  %v1264_v55 = vmax.f32 %v1248_v43, 0.0 }
 0x102   : > { %10340 = vst [vmem:[#allocation49_spill] sm:$0xff] %v7799_v44  ;;  %10341 = vst [vmem:[#allocation50_spill] sm:$0xff] %v7801_v48  ;;  %v1274_v49 = vpack.c.bf16 %v1263_v42, %v1262_v41  ;;  %v1265_v56 = vmax.f32 %v1249_v46, 0.0  ;;  %v1232_v58 = vmul.f32 %v7710_v9, %v7799_v44  ;;  %v1233_v59 = vmul.f32 %v7710_v9, %v7801_v48 }
 0x103   : > { %v1266_v60 = vmax.f32 %v1250_v51, 0.0  ;;  %v1267_v61 = vmax.f32 %v1251_v53, 0.0  ;;  %v1094_v42 = vpack.c.bf16 %v7646_v31, %v7628_v21 }
 0x104   : > { %6106 = vmatmul.mubr.bf16.gmra.mxu0 %v1273_v40  ;;  %v1275_v62 = vpack.c.bf16 %v1265_v56, %v1264_v55  ;;  %v1252_v50 = vadd.f32 %v7713_v10, %v1232_v58  ;;  %v1253_v63 = vadd.f32 %v7713_v10, %v1233_v59 }
 0x105   : > { %6109 = vmatprep.mubr.bf16.mxu0 %v1274_v49  ;;  %v1276_v2 = vpack.c.bf16 %v1267_v61, %v1266_v60  ;;  %6117 = vmatprep.subr.bf16.mxu1 %v1094_v42 }
 0x106   : > { %v1268_v3 = vmax.f32 %v1252_v50, 0.0  ;;  %v1269_v8 = vmax.f32 %v1253_v63, 0.0  ;;  %6118 = vmatpush3.bf16.msra.mxu1 %v1094_v42 }
 0x108   : > { %v1277_v19 = vpack.c.bf16 %v1269_v8, %v1268_v3 }
 0x10c   : > { %6110 = vmatmul.mubr.bf16.gmra.mxu0 %v1275_v62 }
 0x10d   : > { %6113 = vmatprep.mubr.bf16.mxu0 %v1276_v2 }
 0x114   : > { %6114 = vmatmul.mubr.bf16.gmra.mxu0 %v1277_v19 }
 0x1bc   : > { %v6103_v28 = vpop.f32.mrf.mxu0 }
 0x1be   : > { %v1360_v12 = vpop.f32.mrf.mxu0 }
 0x1bf   : > { %v1423_v16 = vmax.f32 %v1360_v12, %v6103_v28 }
 0x1c0   : > { %v6104_v15 = vpop.f32.mrf.mxu0 }
 0x1c2   : > { %v1363_v33 = vpop.f32.mrf.mxu0 }
 0x1c3   : > { %v1424_v38 = vmax.f32 %v1363_v33, %v6104_v15 }
 0x1c4   : > { %v6107_v9 = vpop.f32.mrf.mxu0 }
 0x1c6   : > { %v1376_v34 = vpop.f32.mrf.mxu0 }
 0x1c7   : > { %v1425_v36 = vmax.f32 %v1423_v16, %v1376_v34 }
 0x1c8   : > { %v6108_v35 = vpop.f32.mrf.mxu0 }
 0x1c9   : > { %v1427_v43 = vmax.f32 %v1425_v36, %v6107_v9 }
 0x1ca   : > { %v1379_v40 = vpop.f32.mrf.mxu0 }
 0x1cb   : > { %v1426_v41 = vmax.f32 %v1424_v38, %v1379_v40 }
 0x1cc   : > { %v7811_v10 = vpop.f32.mrf.mxu0 }
 0x1cd   : > { %v1428_v46 = vmax.f32 %v1426_v41, %v6108_v35 }
 0x1ce   : > { %v1392_v49 = vpop.f32.mrf.mxu0 }
 0x1cf   : > { %v1429_v51 = vmax.f32 %v1427_v43, %v1428_v46  ;;  %v1436_v59 = vmax.f32 %v1392_v49, %v7811_v10 }
 0x1d0   : > { %v7815_v53 = vpop.f32.mrf.mxu0 }
 0x1d1   : > { %v1430_v55 = vrot.slane %v1429_v51, 4 }
 0x1d2   : > { %v1395_v56 = vpop.f32.mrf.mxu0 }
 0x1d3   : > { %v1431_v58 = vmax.f32 %v1429_v51, %v1430_v55  ;;  %v1437_v21 = vmax.f32 %v1395_v56, %v7815_v53 }
 0x1d4   : > { %v7818_v60 = vpop.f32.mrf.mxu0 }
 0x1d5   : > { %v1432_v61 = vrot.slane %v1431_v58, 2 }
 0x1d6   : > { %v7820_v62 = vpop.f32.mrf.mxu0 }
 0x1d7   : > { %v1433_v50 = vmax.f32 %v1431_v58, %v1432_v61  ;;  %v1438_v31 = vmax.f32 %v1436_v59, %v7820_v62 }
 0x1d8   : > { %v7824_v63 = vpop.f32.mrf.mxu0 }
 0x1d9   : > { %v1434_v2 = vrot.slane %v1433_v50, 1  ;;  %v1440_v16 = vmax.f32 %v1438_v31, %v7818_v60 }
 0x1da   : > { %v7826_v3 = vpop.f32.mrf.mxu0 }
 0x1db   : > { %v1435_v8 = vmax.f32 %v1433_v50, %v1434_v2  ;;  %v1439_v19 = vmax.f32 %v1437_v21, %v7826_v3 }
 0x1dd   : > { %v1441_v38 = vmax.f32 %v1439_v19, %v7824_v63  ;;  %v1449_v36 = vsub.f32 %v1360_v12, %v1435_v8  ;;  %v1450_v41 = vsub.f32 %v1363_v33, %v1435_v8  ;;  %v1451_v43 = vsub.f32 %v6103_v28, %v1435_v8 }
 0x1de   : > { %v1452_v55 = vsub.f32 %v6104_v15, %v1435_v8  ;;  %v1453_v61 = vsub.f32 %v1376_v34, %v1435_v8  ;;  %v1454_v50 = vsub.f32 %v1379_v40, %v1435_v8  ;;  %v1455_v31 = vsub.f32 %v6107_v9, %v1435_v8 }
 0x1df   : > { %v1442_v42 = vmax.f32 %v1440_v16, %v1441_v38  ;;  %v1465_v51 = vmul.f32 1.442695, %v1449_v36  ;;  %v1467_v58 = vmul.f32 1.442695, %v1450_v41  ;;  %v1469_v39 = vmul.f32 1.442695, %v1451_v43 }
 0x1e0   : > { %v1471_v2 = vmul.f32 1.442695, %v1452_v55  ;;  %v1473_v48 = vmul.f32 1.442695, %v1453_v61  ;;  %v1456_v33 = vsub.f32 %v6108_v35, %v1435_v8  ;;  %v1475_v28 = vmul.f32 1.442695, %v1454_v50 }
 0x1e1   : > { %v1443_v46 = vrot.slane %v1442_v42, 4  ;;  %6782 = vpow2.f32 %v1465_v51  ;;  %v1477_v15 = vmul.f32 1.442695, %v1455_v31 }
 0x1e2   : > { %6784 = vpow2.f32 %v1467_v58  ;;  %v1479_v16 = vmul.f32 1.442695, %v1456_v33 }
 0x1e3   : > { %v1444_v59 = vmax.f32 %v1442_v42, %v1443_v46  ;;  %6786 = vpow2.f32 %v1469_v39 }
 0x1e4   : > { %6788 = vpow2.f32 %v1471_v2 }
 0x1e5   : > { %v1445_v47 = vrot.slane %v1444_v59, 2  ;;  %6790 = vpow2.f32 %v1473_v48 }
 0x1e6   : > { %6792 = vpow2.f32 %v1475_v28 }
 0x1e7   : > { %v1446_v21 = vmax.f32 %v1444_v59, %v1445_v47  ;;  %6794 = vpow2.f32 %v1477_v15 }
 0x1e8   : > { %6796 = vpow2.f32 %v1479_v16 }
 0x1e9   : > { %v1447_v12 = vrot.slane %v1446_v21, 1 }
 0x1eb   : > { %v1448_v19 = vmax.f32 %v1446_v21, %v1447_v12 }
 0x1ed   : > { %v1457_v34 = vsub.f32 %v1392_v49, %v1448_v19  ;;  %v1458_v38 = vsub.f32 %v1395_v56, %v1448_v19  ;;  %v1459_v40 = vsub.f32 %v7811_v10, %v1448_v19  ;;  %v1460_v39 = vsub.f32 %v7815_v53, %v1448_v19 }
 0x1ee   : > { %v7832_v36 = vpop.eup %6782  ;;  %v1461_v49 = vsub.f32 %v7820_v62, %v1448_v19  ;;  %v1462_v42 = vsub.f32 %v7826_v3, %v1448_v19  ;;  %v1463_v51 = vsub.f32 %v7818_v60, %v1448_v19  ;;  %v1464_v59 = vsub.f32 %v7824_v63, %v1448_v19 }
 0x1ef   : > { %v1481_v47 = vmul.f32 1.442695, %v1457_v34  ;;  %v7834_v9 = vpop.eup %6784  ;;  %v1483_v35 = vmul.f32 1.442695, %v1458_v38  ;;  %v1485_v56 = vmul.f32 1.442695, %v1459_v40 }
 0x1f0   : > { %v1497_v48 = vadd.f32 %v7834_v9, %v7832_v36  ;;  %v7839_v8 = vpop.eup %6786  ;;  %v1487_v43 = vmul.f32 1.442695, %v1460_v39  ;;  %v1489_v55 = vmul.f32 1.442695, %v1461_v49  ;;  %v1491_v61 = vmul.f32 1.442695, %v1462_v42 }
 0x1f1   : > { %6798 = vpow2.f32 %v1481_v47  ;;  %v7843_v10 = vpop.eup %6788  ;;  %v1493_v2 = vmul.f32 1.442695, %v1463_v51  ;;  %v1495_v60 = vmul.f32 1.442695, %v1464_v59 }
 0x1f2   : > { %v1498_v41 = vadd.f32 %v7839_v8, %v1497_v48  ;;  %6800 = vpow2.f32 %v1483_v35  ;;  %v7847_v46 = vpop.eup %6790 }
 0x1f3   : > { %6802 = vpow2.f32 %v1485_v56  ;;  %v7851_v58 = vpop.eup %6792 }
 0x1f4   : > { %v1499_v53 = vadd.f32 %v7843_v10, %v1498_v41  ;;  %6804 = vpow2.f32 %v1487_v43  ;;  %v7855_v50 = vpop.eup %6794 }
 0x1f5   : > { %6806 = vpow2.f32 %v1489_v55  ;;  %v7858_v31 = vpop.eup %6796 }
 0x1f6   : > { %v1500_v62 = vadd.f32 %v7847_v46, %v1499_v53  ;;  %6808 = vpow2.f32 %v1491_v61 }
 0x1f7   : > { %6810 = vpow2.f32 %v1493_v2  ;;  %v1093_v2 = vpack.c.bf16 %v7625_v20, %v7610_v13  ;;  %v1091_v13 = vpack.c.bf16 %v7593_v5, %v7590_v4 }
 0x1f8   : > { %v1501_v3 = vadd.f32 %v7851_v58, %v1500_v62  ;;  %6812 = vpow2.f32 %v1495_v60 }
 0x1f9   : > { %6119 = vmatprep.subr.bf16.mxu1 %v1093_v2 }
 0x1fa   : > { %v1502_v21 = vadd.f32 %v7855_v50, %v1501_v3  ;;  %6120 = vmatpush3.bf16.msra.mxu1 %v1093_v2 }
 0x1fc   : > { %v1503_v12 = vadd.f32 %v7858_v31, %v1502_v21 }
 0x1fe   : > { %v1504_v33 = vrot.slane %v1503_v12, 4  ;;  %v6799_v28 = vpop.eup %6798 }
 0x1ff   : > { %v6801_v63 = vpop.eup %6800 }
 0x200   : > { %v1505_v19 = vadd.f32 %v1504_v33, %v1503_v12  ;;  %v1510_v15 = vadd.f32 %v6801_v63, %v6799_v28  ;;  %v6803_v16 = vpop.eup %6802 }
 0x201   : > { %v6805_v40 = vpop.eup %6804 }
 0x202   : > { %v1506_v34 = vrot.slane %v1505_v19, 2  ;;  %v1511_v38 = vadd.f32 %v6803_v16, %v1510_v15  ;;  %v6807_v35 = vpop.eup %6806 }
 0x203   : > { %v6809_v56 = vpop.eup %6808 }
 0x204   : > { %v1507_v47 = vadd.f32 %v1506_v34, %v1505_v19  ;;  %v1512_v39 = vadd.f32 %v6805_v40, %v1511_v38  ;;  %v6811_v43 = vpop.eup %6810  ;;  %v1092_v19 = vpack.c.bf16 %v7599_v7, %v7596_v6 }
 0x205   : > { %v6813_v51 = vpop.eup %6812 }
 0x206   : > { %v1508_v48 = vrot.slane %v1507_v47, 1  ;;  %v1513_v49 = vadd.f32 %v6807_v35, %v1512_v39  ;;  %6121 = vmatprep.subr.bf16.mxu1 %v1092_v19 }
 0x207   : > { %6122 = vmatpush3.bf16.msra.mxu1 %v1092_v19 }
 0x208   : > { %v1509_v41 = vadd.f32 %v1508_v48, %v1507_v47  ;;  %v1514_v42 = vadd.f32 %v6809_v56, %v1513_v49  ;;  %6123 = vmatprep.subr.bf16.mxu1 %v1091_v13  ;;  %v1097_v48 = vpack.c.bf16 %v7655_v37, %v7641_v29  ;;  %v6898_v49 = vld [vmem:[%s7587_s27 + $0x50] sm:$0xff] }
 0x20a   : > { %6814 = vrcp.f32 %v1509_v41  ;;  %v1515_v53 = vadd.f32 %v6811_v43, %v1514_v42 }
 0x20b   : > { %6124 = vmatpush3.bf16.msra.mxu1 %v1091_v13 }
 0x20c   : > { %v1516_v55 = vadd.f32 %v6813_v51, %v1515_v53 }
 0x20e   : > { %v1517_v62 = vrot.slane %v1516_v55, 4 }
 0x210   : > { %v1518_v59 = vadd.f32 %v1517_v62, %v1516_v55  ;;  %v6901_v55 = vld [vmem:[%s7587_s27 + $0x48] sm:$0xff] }
 0x212   : > { %v1519_v61 = vrot.slane %v1518_v59, 2 }
 0x214   : > { %v1520_v3 = vadd.f32 %v1519_v61, %v1518_v59 }
 0x216   : > { %v1521_v60 = vrot.slane %v1520_v3, 1 }
 0x217   : > { %v6815_v21 = vpop.eup %6814 }
 0x218   : > { %v1524_v12 = vmul.f32 %v6815_v21, %v7832_v36  ;;  %v1522_v33 = vadd.f32 %v1521_v60, %v1520_v3  ;;  %v1525_v15 = vmul.f32 %v6815_v21, %v7834_v9  ;;  %v1526_v20 = vmul.f32 %v6815_v21, %v7839_v8 }
 0x219   : > { %v1527_v36 = vmul.f32 %v6815_v21, %v7843_v10  ;;  %v1528_v6 = vmul.f32 %v6815_v21, %v7847_v46  ;;  %v1529_v9 = vmul.f32 %v6815_v21, %v7851_v58  ;;  %v1530_v4 = vmul.f32 %v6815_v21, %v7855_v50 }
 0x21a   : > { %1541 = vxpose.xlu0.b32.start [1/8] (short) %v1524_v12, 128  ;;  %6816 = vrcp.f32 %v1522_v33  ;;  %v1531_v8 = vmul.f32 %v6815_v21, %v7858_v31  ;;  %v1098_v58 = vpack.c.bf16 %v7673_v52, %v7664_v45 }
 0x21c   : > { %6141 = vmatprep.subr.bf16.mxu1 %v1098_v58 }
 0x21e   : > { %1542 = vxpose.xlu0.b32.cont [2/8] (short) %v1525_v15, 128 }
 0x222   : > { %1543 = vxpose.xlu0.b32.cont [3/8] (short) %v1526_v20, 128 }
 0x226   : > { %1544 = vxpose.xlu0.b32.cont [4/8] (short) %v1527_v36, 128 }
 0x227   : > { %v6817_v34 = vpop.eup %6816 }
 0x228   : > { %v1533_v7 = vmul.f32 %v6817_v34, %v6799_v28  ;;  %v1534_v38 = vmul.f32 %v6817_v34, %v6801_v63  ;;  %v1535_v5 = vmul.f32 %v6817_v34, %v6803_v16  ;;  %v1536_v10 = vmul.f32 %v6817_v34, %v6805_v40 }
 0x229   : > { %v1537_v47 = vmul.f32 %v6817_v34, %v6807_v35  ;;  %v1538_v46 = vmul.f32 %v6817_v34, %v6809_v56  ;;  %v1539_v28 = vmul.f32 %v6817_v34, %v6811_v43  ;;  %v1540_v63 = vmul.f32 %v6817_v34, %v6813_v51  ;;  %v6899_v56 = vld [vmem:[%s7587_s27 + $0x58] sm:$0xff]  ;;  %v6900_v51 = vld [vmem:[%s7587_s27 + $0x40] sm:$0xff]  ;;  %s10483_s27 = sld [smem:[#allocation32_spill]] }
 0x22a   : > { %1545 = vxpose.xlu0.b32.cont [5/8] (short) %v1528_v6, 128  ;;  %1703 = vxpose.xlu1.b32.start [1/8] (short) %v1533_v7, 128  ;;  %v1096_v41 = vpack.c.bf16 %v6899_v56, %v6898_v49  ;;  %v1095_v62 = vpack.c.bf16 %v6901_v55, %v6900_v51  ;;  %v6715_v49 = vld [vmem:[#allocation5 + $0x30] sm:$0xff]   ;;  %v6716_v56 = vld [vmem:[#allocation5 + $0x28] sm:$0xff]   ;;  %v7261_v55 = vmov 1  }
 0x22b   : > { %v6719_v51 = vld [vmem:[#allocation5 + $0x10] sm:$0xff]  }
 0x22e   : > { %1546 = vxpose.xlu0.b32.cont [6/8] (short) %v1529_v9, 128  ;;  %1704 = vxpose.xlu1.b32.cont [2/8] (short) %v1534_v38, 128 }
 0x22f   : > { %p10485_p13 = scmp.ne.s32.totalorder %s10483_s27, 0 }
 0x231   : > { %p7164_p0 = pnand %p7163_p11, %p10485_p13 }
 0x232   : > { %1547 = vxpose.xlu0.b32.cont [7/8] (short) %v1530_v4, 128  ;;  %1705 = vxpose.xlu1.b32.cont [3/8] (short) %v1535_v5, 128 }
 0x233   : > { %p7165_p3 = pneg %p7164_p0 }
 0x236   : > { %1548 = vxpose.xlu0.b32.end [8/8] (short) %v1531_v8, 128  ;;  %1706 = vxpose.xlu1.b32.cont [4/8] (short) %v1536_v10, 128 }
 0x23a   : > { %1707 = vxpose.xlu1.b32.cont [5/8] (short) %v1537_v47, 128 }
 0x23e   : > { %1708 = vxpose.xlu1.b32.cont [6/8] (short) %v1538_v46, 128 }
 0x242   : > { %1709 = vxpose.xlu1.b32.cont [7/8] (short) %v1539_v28, 128 }
 0x246   : > { %1710 = vxpose.xlu1.b32.end [8/8] (short) %v1540_v63, 128 }
 0x296   : > { %v1557_v50 = vpop.trf.xlu0 }
 0x29a   : > { %v1558_v16 = vpop.trf.xlu0 }
 0x29b   : > { %v1573_v31 = vpack.c.bf16 %v1558_v16, %v1557_v50 }
 0x29d   : > { %6125 = vmatprep.mubr.msk.bf16.mxu1 %vm1581_vm0, %v1573_v31 }
 0x29e   : > { %v1559_v40 = vpop.trf.xlu0 }
 0x2a2   : > { %v1560_v39 = vpop.trf.xlu0 }
 0x2a3   : > { %v1574_v35 = vpack.c.bf16 %v1560_v39, %v1559_v40 }
 0x2a5   : > { %6126 = vmatmul.mubr.msk.bf16.vlgmr.msra.gmra.mxu1 %vm1581_vm0, %v1574_v35 }
 0x2a6   : > { %v1561_v45 = vpop.trf.xlu0  ;;  %6142 = vmatpush3.bf16.msra.mxu1 %v1098_v58  ;;  %v1719_v52 = vpop.trf.xlu1 }
 0x2a7   : > { %6143 = vmatprep.subr.bf16.mxu1 %v1097_v48 }
 0x2aa   : > { %v1562_v42 = vpop.trf.xlu0  ;;  %6144 = vmatpush3.bf16.msra.mxu1 %v1097_v48  ;;  %v1720_v53 = vpop.trf.xlu1 }
 0x2ab   : > { %v1575_v43 = vpack.c.bf16 %v1562_v42, %v1561_v45  ;;  %6145 = vmatprep.subr.bf16.mxu1 %v1096_v41  ;;  %v1735_v47 = vpack.c.bf16 %v1720_v53, %v1719_v52  ;;  %v6714_v52 = vld [vmem:[#allocation5 + $0x38] sm:$0xff]  }
 0x2ac   : > { %6165 = vmatprep.subr.bf16.mxu0 %v6714_v52  ;;  %v6718_v42 = vld [vmem:[#allocation5 + $0x18] sm:$0xff]  }
 0x2ad   : > { %6129 = vmatprep.mubr.msk.bf16.mxu1 %vm1581_vm0, %v1575_v43  ;;  %6166 = vmatpush3.bf16.msra.mxu0 %v6714_v52  ;;  %v7260_v43 = vmov 0   ;;  %v937_v53 = vld [vmem:[%s10342_s25 + $0x78] sm:$0xff] }
 0x2ae   : > { %v1563_v29 = vpop.trf.xlu0  ;;  %6146 = vmatpush3.bf16.msra.mxu1 %v1096_v41  ;;  %v1721_v37 = vpop.trf.xlu1  ;;  %6167 = vmatprep.subr.bf16.mxu0 %v6715_v49  ;;  %v6717_v41 = vld [vmem:[#allocation5 + $0x20] sm:$0xff]  }
 0x2af   : > { %6147 = vmatprep.subr.bf16.mxu1 %v1095_v62  ;;  %6687 = vset.pattern.permute.xlu1 %v7260_v43 }
 0x2b0   : > { %6686 = vset.pattern.permute.xlu0 %v7260_v43  ;;  %2503 = vperm.xlu1 %6687, %v937_v53  }
 0x2b1   : > { %6168 = vmatpush3.bf16.msra.mxu0 %v6715_v49  ;;  %v927_v49 = vld [vmem:[%s10342_s25 + $0x28] sm:$0xff] }
 0x2b2   : > { %v1564_v59 = vpop.trf.xlu0  ;;  %6148 = vmatpush3.bf16.msra.mxu1 %v1095_v62  ;;  %v1722_v3 = vpop.trf.xlu1  ;;  %6169 = vmatprep.subr.bf16.mxu0 %v6716_v56  ;;  %v936_v62 = vld [vmem:[%s10342_s25 + $0x70] sm:$0xff] }
 0x2b3   : > { %v1576_v61 = vpack.c.bf16 %v1564_v59, %v1563_v29  ;;  %v1736_v28 = vpack.c.bf16 %v1722_v3, %v1721_v37  ;;  %v6720_v29 = vld [vmem:[#allocation5 + $0x8] sm:$0xff]   ;;  %2498 = vperm.xlu0 %6686, %v936_v62   ;;  %v6721_v37 = vld [vmem:[#allocation5] sm:$0xff]  }
 0x2b4   : > { %6688 = vset.pattern.permute.xlu1 %v7261_v55  ;;  %v934_v59 = vld [vmem:[%s10342_s25 + $0x60] sm:$0xff] }
 0x2b5   : > { %6130 = vmatmul.mubr.msk.bf16.gmra.mxu1 %vm1581_vm0, %v1576_v61  ;;  %6170 = vmatpush3.bf16.msra.mxu0 %v6716_v56  ;;  %v932_v61 = vld [vmem:[%s10342_s25 + $0x50] sm:$0xff] }
 0x2b6   : > { %v1565_v2 = vpop.trf.xlu0  ;;  %v1723_v21 = vpop.trf.xlu1  ;;  %6171 = vmatprep.subr.bf16.mxu0 %v6717_v41  ;;  %2595 = vperm.xlu1 %6688, %v936_v62  }
 0x2b9   : > { %6172 = vmatpush3.bf16.msra.mxu0 %v6717_v41 }
 0x2ba   : > { %v1566_v60 = vpop.trf.xlu0  ;;  %v1724_v33 = vpop.trf.xlu1  ;;  %6173 = vmatprep.subr.bf16.mxu0 %v6718_v42  ;;  %2599 = vperm.xlu1 %6688, %v937_v53  }
 0x2bb   : > { %v1577_v12 = vpack.c.bf16 %v1566_v60, %v1565_v2  ;;  %v1737_v58 = vpack.c.bf16 %v1724_v33, %v1723_v21  ;;  %v933_v2 = vld [vmem:[%s10342_s25 + $0x58] sm:$0xff] }
 0x2bd   : > { %6133 = vmatprep.mubr.msk.bf16.mxu1 %vm1581_vm0, %v1577_v12  ;;  %6174 = vmatpush3.bf16.msra.mxu0 %v6718_v42  ;;  %v931_v12 = vld [vmem:[%s10342_s25 + $0x48] sm:$0xff] }
 0x2be   : > { %v1567_v19 = vpop.trf.xlu0  ;;  %v1725_v15 = vpop.trf.xlu1  ;;  %6175 = vmatprep.subr.bf16.mxu0 %v6719_v51  ;;  %6689 = vset.pattern.permute.xlu1 %v7260_v43 }
 0x2bf   : > { %2488 = vperm.xlu1 %6689, %v934_v59  }
 0x2c1   : > { %6176 = vmatpush3.bf16.msra.mxu0 %v6719_v51 }
 0x2c2   : > { %v1568_v13 = vpop.trf.xlu0  ;;  %v1726_v36 = vpop.trf.xlu1  ;;  %6177 = vmatprep.subr.bf16.mxu0 %v6720_v29 }
 0x2c3   : > { %v1578_v20 = vpack.c.bf16 %v1568_v13, %v1567_v19  ;;  %v1738_v50 = vpack.c.bf16 %v1726_v36, %v1725_v15  ;;  %6690 = vset.pattern.permute.xlu1 %v7261_v55  ;;  %v935_v19 = vld [vmem:[%s10342_s25 + $0x68] sm:$0xff]  ;;  %v930_v15 = vld [vmem:[%s10342_s25 + $0x40] sm:$0xff] }
 0x2c4   : > { %2587 = vperm.xlu1 %6690, %v934_v59   ;;  %2493 = vperm.xlu0 %6686, %v935_v19  }
 0x2c5   : > { %6134 = vmatmul.mubr.msk.bf16.gmra.mxu1 %vm1581_vm0, %v1578_v20  ;;  %6178 = vmatpush3.bf16.msra.mxu0 %v6720_v29 }
 0x2c6   : > { %v1569_v34 = vpop.trf.xlu0  ;;  %v1727_v6 = vpop.trf.xlu1  ;;  %6179 = vmatprep.subr.bf16.mxu0 %v6721_v37 }
 0x2c8   : > { %6691 = vset.pattern.permute.xlu1 %v7260_v43  ;;  %2468 = vperm.xlu0 %6686, %v930_v15  }
 0x2c9   : > { %6180 = vmatpush3.bf16.msra.mxu0 %v6721_v37  ;;  %2478 = vperm.xlu1 %6691, %v932_v61  }
 0x2ca   : > { %v1570_v7 = vpop.trf.xlu0  ;;  %v1728_v38 = vpop.trf.xlu1 }
 0x2cb   : > { %v1579_v9 = vpack.c.bf16 %v1570_v7, %v1569_v34  ;;  %v1739_v16 = vpack.c.bf16 %v1728_v38, %v1727_v6  ;;  %v928_v7 = vld [vmem:[%s10342_s25 + $0x30] sm:$0xff] }
 0x2cd   : > { %6137 = vmatprep.mubr.msk.bf16.mxu1 %vm1581_vm0, %v1579_v9  ;;  %2483 = vperm.xlu1 %6691, %v933_v2  }
 0x2ce   : > { %v1571_v4 = vpop.trf.xlu0  ;;  %v1729_v8 = vpop.trf.xlu1 }
 0x2d1   : > { %6692 = vset.pattern.permute.xlu1 %v7261_v55 }
 0x2d2   : > { %v1572_v5 = vpop.trf.xlu0  ;;  %v1730_v46 = vpop.trf.xlu1  ;;  %2583 = vperm.xlu1 %6692, %v933_v2  }
 0x2d3   : > { %v1580_v10 = vpack.c.bf16 %v1572_v5, %v1571_v4  ;;  %v1740_v39 = vpack.c.bf16 %v1730_v46, %v1729_v8  ;;  %v926_v4 = vld [vmem:[%s10342_s25 + $0x20] sm:$0xff] }
 0x2d4   : > { %2448 = vperm.xlu0 %6686, %v926_v4  }
 0x2d5   : > { %6138 = vmatmul.mubr.msk.bf16.gmra.mxu1 %vm1581_vm0, %v1580_v10  ;;  %v929_v10 = vld [vmem:[%s10342_s25 + $0x38] sm:$0xff] }
 0x2d6   : > { %6149 = vmatprep.mubr.msk.bf16.mxu1 %vm1581_vm0, %v1735_v47  ;;  %v1731_v63 = vpop.trf.xlu1  ;;  %6693 = vset.pattern.permute.xlu1 %v7260_v43  ;;  %v7968_v47 = vld [vmem:[%s10342_s25] sm:$0xff] }
 0x2d7   : > { %2473 = vperm.xlu1 %6693, %v931_v12  }
 0x2d8   : > { %2428 = vperm.xlu0 %6686, %v7968_v47  }
 0x2da   : > { %v1732_v31 = vpop.trf.xlu1 }
 0x2db   : > { %v1741_v35 = vpack.c.bf16 %v1732_v31, %v1731_v63  ;;  %6694 = vset.pattern.permute.xlu1 %v7261_v55 }
 0x2dc   : > { %2571 = vperm.xlu1 %6694, %v930_v15   ;;  %6701 = vset.pattern.permute.xlu0 %v7261_v55 }
 0x2dd   : > { %6150 = vmatmul.mubr.msk.bf16.vlgmr.msra.gmra.mxu1 %vm1581_vm0, %v1736_v28  ;;  %2591 = vperm.xlu0 %6701, %v935_v19  }
 0x2de   : > { %6153 = vmatprep.mubr.msk.bf16.mxu1 %vm1581_vm0, %v1737_v58  ;;  %v1733_v40 = vpop.trf.xlu1 }
 0x2e0   : > { %6695 = vset.pattern.permute.xlu1 %v7260_v43 }
 0x2e1   : > { %2458 = vperm.xlu1 %6695, %v928_v7   ;;  %2579 = vperm.xlu0 %6701, %v932_v61  }
 0x2e2   : > { %v1734_v48 = vpop.trf.xlu1 }
 0x2e3   : > { %v1742_v45 = vpack.c.bf16 %v1734_v48, %v1733_v40 }
 0x2e5   : > { %6154 = vmatmul.mubr.msk.bf16.gmra.mxu1 %vm1581_vm0, %v1738_v50  ;;  %2463 = vperm.xlu1 %6695, %v929_v10  }
 0x2e6   : > { %6157 = vmatprep.mubr.msk.bf16.mxu1 %vm1581_vm0, %v1739_v16  ;;  %2575 = vperm.xlu0 %6701, %v931_v12  }
 0x2e9   : > { %6696 = vset.pattern.permute.xlu1 %v7261_v55 }
 0x2ea   : > { %2567 = vperm.xlu1 %6696, %v929_v10   ;;  %2563 = vperm.xlu0 %6701, %v928_v7  }
 0x2ed   : > { %6158 = vmatmul.mubr.msk.bf16.gmra.mxu1 %vm1581_vm0, %v1740_v39 }
 0x2ee   : > { %6161 = vmatprep.mubr.msk.bf16.mxu1 %vm1581_vm0, %v1741_v35  ;;  %6697 = vset.pattern.permute.xlu1 %v7260_v43 }
 0x2ef   : > { %2453 = vperm.xlu1 %6697, %v927_v49   ;;  %2559 = vperm.xlu0 %6701, %v927_v49  }
 0x2f3   : > { %6698 = vset.pattern.permute.xlu1 %v7261_v55 }
 0x2f4   : > { %2555 = vperm.xlu1 %6698, %v926_v4   ;;  %v925_v4 = vld [vmem:[%s10342_s25 + $0x18] sm:$0xff] }
 0x2f5   : > { %6162 = vmatmul.mubr.msk.bf16.gmra.mxu1 %vm1581_vm0, %v1742_v45  ;;  %vm4465_vm0 = vcmask 1048512  }
 0x2f8   : > { %6699 = vset.pattern.permute.xlu1 %v7260_v43 }
 0x365   : > { %v7917_v3 = vpop.f32.mrf.mxu1 }
 0x366   : > { %10343 = vst [vmem:[#allocation51_spill] sm:$0xff] %v7917_v3  ;;  %v1911_v5 = vmul.f32 %v7917_v3, %v7917_v3 }
 0x367   : > { %v7922_v21 = vpop.f32.mrf.mxu1 }
 0x368   : > { %10344 = vst [vmem:[#allocation52_spill] sm:$0xff] %v7922_v21  ;;  %v1909_v34 = vmul.f32 %v7922_v21, %v7922_v21 }
 0x369   : > { %v7925_v60 = vpop.f32.mrf.mxu1 }
 0x36a   : > { %10345 = vst [vmem:[#allocation53_spill] sm:$0xff] %v7925_v60  ;;  %v1912_v58 = vmul.f32 %v7925_v60, %v7925_v60 }
 0x36b   : > { %v7931_v33 = vpop.f32.mrf.mxu1 }
 0x36c   : > { %10346 = vst [vmem:[#allocation54_spill] sm:$0xff] %v7931_v33  ;;  %v1910_v20 = vmul.f32 %v7931_v33, %v7931_v33  ;;  %v1864_v6 = vadd.f32 %v7931_v33, %v7922_v21 }
 0x36e   : > { %v1941_v9 = vadd.f32 %v1910_v20, %v1909_v34  ;;  %v1865_v8 = vadd.f32 %v7917_v3, %v1864_v6  ;;  %v924_v20 = vld [vmem:[%s10342_s25 + $0x10] sm:$0xff] }
 0x36f   : > { %2438 = vperm.xlu1 %6699, %v924_v20   ;;  %2547 = vperm.xlu0 %6701, %v924_v20  }
 0x370   : > { %v1942_v46 = vadd.f32 %v1941_v9, %v1911_v5  ;;  %v1866_v63 = vadd.f32 %v7925_v60, %v1865_v8 }
 0x372   : > { %v1943_v31 = vadd.f32 %v1942_v46, %v1912_v58 }
 0x373   : > { %2443 = vperm.xlu1 %6699, %v925_v4  }
 0x375   : > { %v7939_v13 = vpop.f32.mrf.mxu1 }
 0x376   : > { %10347 = vst [vmem:[#allocation55_spill] sm:$0xff] %v7939_v13  ;;  %v1915_v56 = vmul.f32 %v7939_v13, %v7939_v13 }
 0x377   : > { %v7944_v36 = vpop.f32.mrf.mxu1  ;;  %6700 = vset.pattern.permute.xlu1 %v7261_v55 }
 0x378   : > { %10348 = vst [vmem:[#allocation56_spill] sm:$0xff] %v7944_v36  ;;  %v1913_v50 = vmul.f32 %v7944_v36, %v7944_v36  ;;  %v1867_v16 = vadd.f32 %v1866_v63, %v7944_v36  ;;  %2551 = vperm.xlu1 %6700, %v925_v4  }
 0x379   : > { %v7953_v38 = vpop.f32.mrf.mxu1 }
 0x37a   : > { %10349 = vst [vmem:[#allocation57_spill] sm:$0xff] %v7953_v38  ;;  %v1944_v39 = vadd.f32 %v1943_v31, %v1913_v50  ;;  %v1916_v62 = vmul.f32 %v7953_v38, %v7953_v38 }
 0x37b   : > { %v7970_v28 = vpop.f32.mrf.mxu1 }
 0x37c   : > { %10350 = vst [vmem:[#allocation58_spill] sm:$0xff] %v7970_v28  ;;  %v1914_v40 = vmul.f32 %v7970_v28, %v7970_v28  ;;  %v1868_v35 = vadd.f32 %v1867_v16, %v7970_v28  ;;  %6702 = vset.pattern.permute.xlu1 %v7260_v43 }
 0x37e   : > { %v1945_v45 = vadd.f32 %v1944_v39, %v1914_v40  ;;  %v1869_v41 = vadd.f32 %v7939_v13, %v1868_v35  ;;  %v923_v35 = vld [vmem:[%s10342_s25 + $0x8] sm:$0xff] }
 0x37f   : > { %2543 = vperm.xlu0 %6701, %v923_v35   ;;  %2433 = vperm.xlu1 %6702, %v923_v35  }
 0x380   : > { %v1946_v53 = vadd.f32 %v1945_v45, %v1915_v56  ;;  %v1870_v29 = vadd.f32 %v7953_v38, %v1869_v41 }
 0x382   : > { %v1947_v2 = vadd.f32 %v1946_v53, %v1916_v62 }
 0x383   : > { %6705 = vset.pattern.permute.xlu0 %v7260_v43  ;;  %6703 = vset.pattern.permute.xlu1 %v7261_v55 }
 0x384   : > { %2539 = vperm.xlu1 %6703, %v7968_v47  }
 0x385   : > { %v7984_v48 = vpop.f32.mrf.mxu1 }
 0x386   : > { %10351 = vst [vmem:[#allocation59_spill] sm:$0xff] %v7984_v48  ;;  %v1919_v12 = vmul.f32 %v7984_v48, %v7984_v48 }
 0x387   : > { %v7986_v52 = vpop.f32.mrf.mxu1 }
 0x388   : > { %10352 = vst [vmem:[#allocation60_spill] sm:$0xff] %v7986_v52  ;;  %v1917_v37 = vmul.f32 %v7986_v52, %v7986_v52  ;;  %v1871_v59 = vadd.f32 %v1870_v29, %v7986_v52  ;;  %6704 = vset.pattern.permute.xlu1 %v7260_v43 }
 0x389   : > { %v7994_v42 = vpop.f32.mrf.mxu1 }
 0x38a   : > { %10353 = vst [vmem:[#allocation61_spill] sm:$0xff] %v7994_v42  ;;  %v1948_v61 = vadd.f32 %v1947_v2, %v1917_v37  ;;  %v1920_v7 = vmul.f32 %v7994_v42, %v7994_v42 }
 0x38b   : > { %v7997_v51 = vpop.f32.mrf.mxu1 }
 0x38c   : > { %10354 = vst [vmem:[#allocation62_spill] sm:$0xff] %v7997_v51  ;;  %v1918_v19 = vmul.f32 %v7997_v51, %v7997_v51  ;;  %v1872_v15 = vadd.f32 %v1871_v59, %v7997_v51 }
 0x38e   : > { %v1949_v34 = vadd.f32 %v1948_v61, %v1918_v19  ;;  %v1873_v6 = vadd.f32 %v7984_v48, %v1872_v15 }
 0x390   : > { %v1950_v5 = vadd.f32 %v1949_v34, %v1919_v12  ;;  %v1874_v10 = vadd.f32 %v7994_v42, %v1873_v6 }
 0x392   : > { %v1951_v50 = vadd.f32 %v1950_v5, %v1920_v7 }
 0x395   : > { %v8016_v9 = vpop.f32.mrf.mxu1 }
 0x396   : > { %10355 = vst [vmem:[#allocation63_spill] sm:$0xff] %v8016_v9  ;;  %v1923_v49 = vmul.f32 %v8016_v9, %v8016_v9 }
 0x397   : > { %v8021_v8 = vpop.f32.mrf.mxu1 }
 0x398   : > { %10356 = vst [vmem:[#allocation64_spill] sm:$0xff] %v8021_v8  ;;  %v1921_v46 = vmul.f32 %v8021_v8, %v8021_v8  ;;  %v1875_v63 = vadd.f32 %v1874_v10, %v8021_v8 }
 0x399   : > { %v8028_v58 = vpop.f32.mrf.mxu1 }
 0x39a   : > { %10357 = vst [vmem:[#allocation65_spill] sm:$0xff] %v8028_v58  ;;  %v1952_v31 = vadd.f32 %v1951_v50, %v1921_v46  ;;  %v1924_v62 = vmul.f32 %v8028_v58, %v8028_v58 }
 0x39b   : > { %v8031_v16 = vpop.f32.mrf.mxu1 }
 0x39c   : > { %10358 = vst [vmem:[#allocation66_spill] sm:$0xff] %v8031_v16  ;;  %v1876_v40 = vadd.f32 %v1875_v63, %v8031_v16  ;;  %v1922_v39 = vmul.f32 %v8031_v16, %v8031_v16 }
 0x39d   : > { %v8040_v45 = vpop.f32.mrf.mxu1 }
 0x39e   : > { %10359 = vst [vmem:[#allocation67_spill] sm:$0xff] %v8040_v45  ;;  %v1877_v56 = vadd.f32 %v8016_v9, %v1876_v40  ;;  %v1953_v41 = vadd.f32 %v1952_v31, %v1922_v39  ;;  %v1927_v4 = vmul.f32 %v8040_v45, %v8040_v45 }
 0x39f   : > { %v8045_v53 = vpop.f32.mrf.mxu1 }
 0x3a0   : > { %10360 = vst [vmem:[#allocation68_spill] sm:$0xff] %v8045_v53  ;;  %v1878_v29 = vadd.f32 %v8028_v58, %v1877_v56  ;;  %v1954_v37 = vadd.f32 %v1953_v41, %v1923_v49  ;;  %v1925_v61 = vmul.f32 %v8045_v53, %v8045_v53 }
 0x3a1   : > { %v8050_v59 = vpop.f32.mrf.mxu1 }
 0x3a2   : > { %10361 = vst [vmem:[#allocation69_spill] sm:$0xff] %v8050_v59  ;;  %v1879_v2 = vrot.slane %v1878_v29, 4  ;;  %v1955_v19 = vadd.f32 %v1954_v37, %v1924_v62  ;;  %v1928_v50 = vmul.f32 %v8050_v59, %v8050_v59 }
 0x3a3   : > { %v8056_v15 = vpop.f32.mrf.mxu1 }
 0x3a4   : > { %10362 = vst [vmem:[#allocation70_spill] sm:$0xff] %v8056_v15  ;;  %v1880_v20 = vadd.f32 %v1879_v2, %v1878_v29  ;;  %v1956_v34 = vrot.slane %v1955_v19, 4  ;;  %v1885_v12 = vadd.f32 %v8056_v15, %v8045_v53  ;;  %v1926_v6 = vmul.f32 %v8056_v15, %v8056_v15 }
 0x3a5   : > { %v8064_v5 = vpop.f32.mrf.mxu1 }
 0x3a6   : > { %10363 = vst [vmem:[#allocation71_spill] sm:$0xff] %v8064_v5  ;;  %v1881_v7 = vrot.slane %v1880_v20, 2  ;;  %v1957_v10 = vadd.f32 %v1956_v34, %v1955_v19  ;;  %v1886_v46 = vadd.f32 %v8040_v45, %v1885_v12  ;;  %v1962_v63 = vadd.f32 %v1926_v6, %v1925_v61 }
 0x3a7   : > { %v8070_v31 = vpop.f32.mrf.mxu1 }
 0x3a8   : > { %10364 = vst [vmem:[#allocation72_spill] sm:$0xff] %v8070_v31  ;;  %v1882_v40 = vadd.f32 %v1881_v7, %v1880_v20  ;;  %v1958_v39 = vrot.slane %v1957_v10, 2  ;;  %v1963_v35 = vadd.f32 %v1962_v63, %v1927_v4  ;;  %v1887_v49 = vadd.f32 %v8050_v59, %v1886_v46 }
 0x3a9   : > { %v1929_v56 = vmul.f32 %v8070_v31, %v8070_v31  ;;  %v8076_v41 = vpop.f32.mrf.mxu1 }
 0x3aa   : > { %10365 = vst [vmem:[#allocation73_spill] sm:$0xff] %v8076_v41  ;;  %v1883_v62 = vrot.slane %v1882_v40, 1  ;;  %v1959_v29 = vadd.f32 %v1958_v39, %v1957_v10  ;;  %v1888_v55 = vadd.f32 %v1887_v49, %v8070_v31  ;;  %v1964_v37 = vadd.f32 %v1963_v35, %v1928_v50 }
 0x3ab   : > { %v8079_v2 = vpop.f32.mrf.mxu1  ;;  %v1931_v10 = vmul.f32 %v8064_v5, %v8064_v5  ;;  %v1932_v39 = vmul.f32 %v8076_v41, %v8076_v41 }
 0x3ac   : > { %10366 = vst [vmem:[#allocation74_spill] sm:$0xff] %v8079_v2  ;;  %v1884_v47 = vadd.f32 %v1883_v62, %v1882_v40  ;;  %v1960_v19 = vrot.slane %v1959_v29, 1  ;;  %v1965_v61 = vadd.f32 %v1964_v37, %v1929_v56  ;;  %v1889_v20 = vadd.f32 %v1888_v55, %v8079_v2 }
 0x3ad   : > { %v1930_v34 = vmul.f32 %v8079_v2, %v8079_v2  ;;  %v8085_v12 = vpop.f32.mrf.mxu1 }
 0x3ae   : > { %10367 = vst [vmem:[#allocation75_spill] sm:$0xff] %v8085_v12  ;;  %v8087_v6 = vmul.f32 0.0078125, %v1884_v47  ;;  %v1961_v4 = vadd.f32 %v1960_v19, %v1959_v29  ;;  %v1890_v7 = vadd.f32 %v8064_v5, %v1889_v20 }
 0x3af   : > { %v1966_v46 = vadd.f32 %v1965_v61, %v1930_v34  ;;  %v8092_v43 = vpop.f32.mrf.mxu1 }
 0x3b0   : > { %10368 = vst [vmem:[#allocation76_spill] sm:$0xff] %v8092_v43  ;;  %v1983_v63 = vmul.f32 0.0078125, %v1961_v4  ;;  %v1985_v50 = vmul.f32 %v8087_v6, %v8087_v6  ;;  %v1891_v40 = vadd.f32 %v8076_v41, %v1890_v7  ;;  %v1933_v29 = vmul.f32 %v8092_v43, %v8092_v43 }
 0x3b1   : > { %v1967_v35 = vadd.f32 %v1966_v46, %v1931_v10  ;;  %v8099_v49 = vpop.f32.mrf.mxu1  ;;  %v1935_v10 = vmul.f32 %v8085_v12, %v8085_v12 }
 0x3b2   : > { %10369 = vst [vmem:[#allocation77_spill] sm:$0xff] %v8099_v49  ;;  %v1987_v56 = vsub.f32 %v1983_v63, %v1985_v50  ;;  %v1892_v62 = vadd.f32 %v1891_v40, %v8092_v43  ;;  %v1936_v40 = vmul.f32 %v8099_v49, %v8099_v49 }
 0x3b3   : > { %v1968_v55 = vadd.f32 %v1967_v35, %v1932_v39  ;;  %v8104_v37 = vpop.f32.mrf.mxu1 }
 0x3b4   : > { %10370 = vst [vmem:[#allocation78_spill] sm:$0xff] %v8104_v37  ;;  %v1989_v47 = vmax.f32 %v1987_v56, 0.0  ;;  %v1893_v19 = vadd.f32 %v1892_v62, %v8104_v37  ;;  %v1934_v61 = vmul.f32 %v8104_v37, %v8104_v37 }
 0x3b5   : > { %v1969_v20 = vadd.f32 %v1968_v55, %v1933_v29  ;;  %v8109_v34 = vpop.f32.mrf.mxu1 }
 0x3b6   : > { %10371 = vst [vmem:[#allocation79_spill] sm:$0xff] %v8109_v34  ;;  %v2023_v4 = vadd.f32 0.001, %v1989_v47  ;;  %v1894_v7 = vadd.f32 %v8085_v12, %v1893_v19 }
 0x3b7   : > { %v1970_v46 = vadd.f32 %v1969_v20, %v1934_v61  ;;  %v8114_v63 = vpop.f32.mrf.mxu1  ;;  %v904_v61 = vld [vmem:[%s10375_s8] sm:$0x3]  ;;  %s10482_s8 = sld [smem:[#allocation112_spill]] }
 0x3b8   : > { %10372 = vst [vmem:[#allocation80_spill] sm:$0xff] %v8114_v63  ;;  %6818 = vrsqrt.f32 %v2023_v4  ;;  %v1895_v50 = vadd.f32 %v8099_v49, %v1894_v7  ;;  %v1937_v62 = vmul.f32 %v8114_v63, %v8114_v63  ;;  %v1939_v7 = vmul.f32 %v8109_v34, %v8109_v34 }
 0x3b9   : > { %v1971_v39 = vadd.f32 %v1970_v46, %v1935_v10  ;;  %v8119_v35 = vpop.f32.mrf.mxu1  ;;  %v8136_v46 = vrot.slane %v904_v61, %v7693_v54 }
 0x3ba   : > { %10373 = vst [vmem:[#allocation81_spill] sm:$0xff] %v8119_v35  ;;  %v1896_v56 = vadd.f32 %v1895_v50, %v8114_v63  ;;  %v8139_v50 = vrot.slane %v904_v61, %v7696_v57  ;;  %v1993_v61 = vsub.f32 %v7917_v3, %v8087_v6  ;;  %v1999_v3 = vsub.f32 %v7986_v52, %v8087_v6 }
 0x3bb   : > { %v1972_v29 = vadd.f32 %v1971_v39, %v1936_v40  ;;  %v8124_v55 = vpop.f32.mrf.mxu1  ;;  %v2004_v39 = vsub.f32 %v8031_v16, %v8087_v6  ;;  %v1995_v16 = vsub.f32 %v7944_v36, %v8087_v6  ;;  %v2001_v36 = vsub.f32 %v7984_v48, %v8087_v6 }
 0x3bc   : > { %10374 = vst [vmem:[#allocation82_spill] sm:$0xff] %v8124_v55  ;;  %v1897_v47 = vadd.f32 %v1896_v56, %v8124_v55  ;;  %v1938_v19 = vmul.f32 %v8124_v55, %v8124_v55  ;;  %v1940_v56 = vmul.f32 %v8119_v35, %v8119_v35 }
 0x3bd   : > { %v1973_v20 = vadd.f32 %v1972_v29, %v1937_v62  ;;  %v1991_v29 = vsub.f32 %v7922_v21, %v8087_v6 }
 0x3be   : > { %v1898_v4 = vadd.f32 %v8109_v34, %v1897_v47 }
 0x3bf   : > { %v1974_v10 = vadd.f32 %v1973_v20, %v1938_v19  ;;  %v1992_v19 = vsub.f32 %v7931_v33, %v8087_v6  ;;  %v1994_v20 = vsub.f32 %v7925_v60, %v8087_v6  ;;  %v1998_v33 = vsub.f32 %v7953_v38, %v8087_v6 }
 0x3c0   : > { %v1899_v40 = vadd.f32 %v8119_v35, %v1898_v4  ;;  %v2000_v60 = vsub.f32 %v7997_v51, %v8087_v6 }
 0x3c1   : > { %v1975_v62 = vadd.f32 %v1974_v10, %v1939_v7  ;;  %v1996_v7 = vsub.f32 %v7970_v28, %v8087_v6  ;;  %v1997_v10 = vsub.f32 %v7939_v13, %v8087_v6  ;;  %v2002_v28 = vsub.f32 %v7994_v42, %v8087_v6 }
 0x3c2   : > { %v1900_v47 = vrot.slane %v1899_v40, 4 }
 0x3c3   : > { %v1976_v4 = vadd.f32 %v1975_v62, %v1940_v56 }
 0x3c4   : > { %v1901_v21 = vadd.f32 %v1900_v47, %v1899_v40  ;;  %v2003_v40 = vsub.f32 %v8021_v8, %v8087_v6 }
 0x3c5   : > { %v8166_v56 = vpop.eup %6818  ;;  %v1977_v62 = vrot.slane %v1976_v4, 4 }
 0x3c6   : > { %v1902_v47 = vrot.slane %v1901_v21, 2  ;;  %v2027_v38 = vmul.f32 %v8166_v56, %v1991_v29  ;;  %v2028_v52 = vmul.f32 %v8166_v56, %v1992_v19  ;;  %v2029_v44 = vmul.f32 %v8166_v56, %v1993_v61 }
 0x3c7   : > { %v1978_v13 = vadd.f32 %v1977_v62, %v1976_v4  ;;  %v2030_v14 = vmul.f32 %v8166_v56, %v1994_v20  ;;  %v2031_v48 = vmul.f32 %v8166_v56, %v1995_v16  ;;  %v2032_v30 = vmul.f32 %v8166_v56, %v1996_v7 }
 0x3c8   : > { %v1903_v32 = vadd.f32 %v1902_v47, %v1901_v21  ;;  %v2063_v42 = vmul.f32 %v8136_v46, %v2027_v38  ;;  %v2064_v8 = vmul.f32 %v8136_v46, %v2028_v52  ;;  %v2065_v19 = vmul.f32 %v8136_v46, %v2029_v44 }
 0x3c9   : > { %v1979_v29 = vrot.slane %v1978_v13, 2  ;;  %v2066_v11 = vmul.f32 %v8136_v46, %v2030_v14  ;;  %v2067_v4 = vmul.f32 %v8136_v46, %v2031_v48  ;;  %v2068_v21 = vmul.f32 %v8136_v46, %v2032_v30 }
 0x3ca   : > { %v1904_v62 = vrot.slane %v1903_v32, 1  ;;  %v2099_v61 = vadd.f32 %v8139_v50, %v2063_v42  ;;  %v2100_v20 = vadd.f32 %v8139_v50, %v2064_v8  ;;  %v2101_v38 = vadd.f32 %v8139_v50, %v2065_v19 }
 0x3cb   : > { %v1980_v16 = vadd.f32 %v1979_v29, %v1978_v13  ;;  %v2102_v52 = vadd.f32 %v8139_v50, %v2066_v11  ;;  %v2103_v7 = vadd.f32 %v8139_v50, %v2067_v4  ;;  %v2104_v14 = vadd.f32 %v8139_v50, %v2068_v21 }
 0x3cc   : > { %v1905_v47 = vadd.f32 %v1904_v62, %v1903_v32  ;;  %v2131_v44 = vmax.f32 %v2099_v61, 0.0  ;;  %v2132_v51 = vmax.f32 %v2100_v20, 0.0  ;;  %v2133_v1 = vmax.f32 %v2101_v38, 0.0 }
 0x3cd   : > { %v1981_v48 = vrot.slane %v1980_v16, 1  ;;  %v2134_v0 = vmax.f32 %v2102_v52, 0.0  ;;  %v2135_v42 = vmax.f32 %v2103_v7, 0.0  ;;  %v2136_v30 = vmax.f32 %v2104_v14, 0.0 }
 0x3ce   : > { %v8194_v18 = vmul.f32 0.0078125, %v1905_v47  ;;  %v2163_v8 = vpack.c.bf16 %v2132_v51, %v2131_v44  ;;  %v2033_v13 = vmul.f32 %v8166_v56, %v1997_v10  ;;  %v2034_v11 = vmul.f32 %v8166_v56, %v1998_v33 }
 0x3cf   : > { %v1982_v29 = vadd.f32 %v1981_v48, %v1980_v16  ;;  %v2164_v19 = vpack.c.bf16 %v2134_v0, %v2133_v1  ;;  %v2035_v32 = vmul.f32 %v8166_v56, %v1999_v3  ;;  %v2040_v4 = vmul.f32 %v8166_v56, %v2004_v39 }
 0x3d0   : > { %v1986_v62 = vmul.f32 %v8194_v18, %v8194_v18  ;;  %6181 = vmatprep.mubr.bf16.mxu0 %v2163_v8  ;;  %v2165_v61 = vpack.c.bf16 %v2136_v30, %v2135_v42  ;;  %v2069_v20 = vmul.f32 %v8136_v46, %v2033_v13  ;;  %v2070_v51 = vmul.f32 %v8136_v46, %v2034_v11 }
 0x3d1   : > { %v1984_v21 = vmul.f32 0.0078125, %v1982_v29  ;;  %6182 = vmatmul.mubr.bf16.vlgmr.msra.gmra.mxu0 %v2164_v19  ;;  %v2036_v10 = vmul.f32 %v8166_v56, %v2000_v60  ;;  %v2071_v0 = vmul.f32 %v8136_v46, %v2035_v32  ;;  %v2037_v3 = vmul.f32 %v8166_v56, %v2001_v36 }
 0x3d2   : > { %6185 = vmatprep.mubr.bf16.mxu0 %v2165_v61  ;;  %v2105_v1 = vadd.f32 %v8139_v50, %v2069_v20  ;;  %v2038_v33 = vmul.f32 %v8166_v56, %v2002_v28  ;;  %v2039_v39 = vmul.f32 %v8166_v56, %v2003_v40  ;;  %v2106_v38 = vadd.f32 %v8139_v50, %v2070_v51 }
 0x3d3   : > { %v1988_v16 = vsub.f32 %v1984_v21, %v1986_v62  ;;  %v2072_v52 = vmul.f32 %v8136_v46, %v2036_v10  ;;  %v2107_v7 = vadd.f32 %v8139_v50, %v2071_v0  ;;  %v2073_v60 = vmul.f32 %v8136_v46, %v2037_v3 }
 0x3d4   : > { %v2137_v47 = vmax.f32 %v2105_v1, 0.0  ;;  %v2074_v44 = vmul.f32 %v8136_v46, %v2038_v33  ;;  %v2075_v14 = vmul.f32 %v8136_v46, %v2039_v39  ;;  %v2138_v36 = vmax.f32 %v2106_v38, 0.0 }
 0x3d5   : > { %v1990_v48 = vmax.f32 %v1988_v16, 0.0  ;;  %v2108_v28 = vadd.f32 %v8139_v50, %v2072_v52  ;;  %v2139_v42 = vmax.f32 %v2107_v7, 0.0  ;;  %v2109_v40 = vadd.f32 %v8139_v50, %v2073_v60 }
 0x3d6   : > { %v2110_v8 = vadd.f32 %v8139_v50, %v2074_v44  ;;  %v2076_v30 = vmul.f32 %v8136_v46, %v2040_v4  ;;  %v2006_v13 = vsub.f32 %v8028_v58, %v8087_v6  ;;  %v2166_v19 = vpack.c.bf16 %v2138_v36, %v2137_v47 }
 0x3d7   : > { %v2024_v29 = vadd.f32 0.001, %v1990_v48  ;;  %v2140_v11 = vmax.f32 %v2108_v28, 0.0  ;;  %v10376_v32 = vsub.f32 %v8016_v9, %v8087_v6  ;;  %v2111_v61 = vadd.f32 %v8139_v50, %v2075_v14 }
 0x3d8   : > { %v2112_v20 = vadd.f32 %v8139_v50, %v2076_v30  ;;  %v2042_v4 = vmul.f32 %v8166_v56, %v2006_v13  ;;  %v2141_v51 = vmax.f32 %v2109_v40, 0.0  ;;  %v2142_v10 = vmax.f32 %v2110_v8, 0.0 }
 0x3d9   : > { %v2041_v62 = vmul.f32 %v8166_v56, %v10376_v32  ;;  %6820 = vrsqrt.f32 %v2024_v29  ;;  %6186 = vmatmul.mubr.bf16.gmra.mxu0 %v2166_v19  ;;  %v2167_v21 = vpack.c.bf16 %v2140_v11, %v2139_v42  ;;  %v2143_v3 = vmax.f32 %v2111_v61, 0.0 }
 0x3da   : > { %v2078_v1 = vmul.f32 %v8136_v46, %v2042_v4  ;;  %v2144_v6 = vmax.f32 %v2112_v20, 0.0  ;;  %v2168_v33 = vpack.c.bf16 %v2142_v10, %v2141_v51  ;;  %v2020_v56 = vsub.f32 %v8124_v55, %v8194_v18  ;;  %v969_v55 = vld [vmem:[%s10377_s30 + $0x78] sm:$0xff] }
 0x3db   : > { %6189 = vmatprep.mubr.bf16.mxu0 %v2167_v21  ;;  %v2077_v0 = vmul.f32 %v8136_v46, %v2041_v62  ;;  %v2007_v47 = vsub.f32 %v8045_v53, %v8194_v18  ;;  %v2008_v60 = vsub.f32 %v8056_v15, %v8194_v18  ;;  %v2009_v44 = vsub.f32 %v8040_v45, %v8194_v18 }
 0x3dc   : > { %v2114_v16 = vadd.f32 %v8139_v50, %v2078_v1  ;;  %v2169_v38 = vpack.c.bf16 %v2144_v6, %v2143_v3  ;;  %v2010_v14 = vsub.f32 %v8050_v59, %v8194_v18  ;;  %v2011_v48 = vsub.f32 %v8070_v31, %v8194_v18 }
 0x3dd   : > { %v2113_v39 = vadd.f32 %v8139_v50, %v2077_v0  ;;  %v2012_v36 = vsub.f32 %v8079_v2, %v8194_v18  ;;  %v2013_v28 = vsub.f32 %v8064_v5, %v8194_v18  ;;  %v2014_v40 = vsub.f32 %v8076_v41, %v8194_v18 }
 0x3de   : > { %v2146_v7 = vmax.f32 %v2114_v16, 0.0  ;;  %v2015_v8 = vsub.f32 %v8092_v43, %v8194_v18  ;;  %v2016_v30 = vsub.f32 %v8104_v37, %v8194_v18  ;;  %v2017_v13 = vsub.f32 %v8085_v12, %v8194_v18 }
 0x3df   : > { %v2145_v52 = vmax.f32 %v2113_v39, 0.0 }
 0x3e1   : > { %6190 = vmatmul.mubr.bf16.gmra.mxu0 %v2168_v33  ;;  %v2170_v29 = vpack.c.bf16 %v2146_v7, %v2145_v52 }
 0x3e2   : > { %6193 = vmatprep.mubr.bf16.mxu0 %v2169_v38 }
 0x3e6   : > { %v8249_v42 = vpop.eup %6820 }
 0x3e7   : > { %v2043_v19 = vmul.f32 %v8249_v42, %v2007_v47  ;;  %v2044_v11 = vmul.f32 %v8249_v42, %v2008_v60  ;;  %v2045_v32 = vmul.f32 %v8249_v42, %v2009_v44  ;;  %v2046_v62 = vmul.f32 %v8249_v42, %v2010_v14 }
 0x3e8   : > { %v2047_v61 = vmul.f32 %v8249_v42, %v2011_v48  ;;  %v2048_v20 = vmul.f32 %v8249_v42, %v2012_v36  ;;  %v2049_v21 = vmul.f32 %v8249_v42, %v2013_v28  ;;  %v2050_v0 = vmul.f32 %v8249_v42, %v2014_v40 }
 0x3e9   : > { %6194 = vmatmul.mubr.bf16.gmra.mxu0 %v2170_v29  ;;  %v2079_v4 = vmul.f32 %v8136_v46, %v2043_v19  ;;  %v2080_v51 = vmul.f32 %v8136_v46, %v2044_v11  ;;  %v2081_v10 = vmul.f32 %v8136_v46, %v2045_v32  ;;  %v2082_v1 = vmul.f32 %v8136_v46, %v2046_v62 }
 0x3ea   : > { %v2083_v3 = vmul.f32 %v8136_v46, %v2047_v61  ;;  %v2084_v6 = vmul.f32 %v8136_v46, %v2048_v20  ;;  %v2085_v33 = vmul.f32 %v8136_v46, %v2049_v21  ;;  %v2086_v52 = vmul.f32 %v8136_v46, %v2050_v0 }
 0x3eb   : > { %v2115_v39 = vadd.f32 %v8139_v50, %v2079_v4  ;;  %v2116_v16 = vadd.f32 %v8139_v50, %v2080_v51  ;;  %v2117_v38 = vadd.f32 %v8139_v50, %v2081_v10  ;;  %v2118_v7 = vadd.f32 %v8139_v50, %v2082_v1 }
 0x3ec   : > { %v2119_v47 = vadd.f32 %v8139_v50, %v2083_v3  ;;  %v2120_v60 = vadd.f32 %v8139_v50, %v2084_v6  ;;  %v2018_v44 = vsub.f32 %v8099_v49, %v8194_v18  ;;  %v2019_v28 = vsub.f32 %v8114_v63, %v8194_v18 }
 0x3ed   : > { %v2147_v14 = vmax.f32 %v2115_v39, 0.0  ;;  %v2148_v48 = vmax.f32 %v2116_v16, 0.0  ;;  %v2149_v36 = vmax.f32 %v2117_v38, 0.0  ;;  %v2150_v40 = vmax.f32 %v2118_v7, 0.0 }
 0x3ee   : > { %v2151_v29 = vmax.f32 %v2119_v47, 0.0  ;;  %v2152_v19 = vmax.f32 %v2120_v60, 0.0  ;;  %v2121_v11 = vadd.f32 %v8139_v50, %v2085_v33  ;;  %v2122_v62 = vadd.f32 %v8139_v50, %v2086_v52 }
 0x3ef   : > { %v2171_v32 = vpack.c.bf16 %v2148_v48, %v2147_v14  ;;  %v2051_v61 = vmul.f32 %v8249_v42, %v2015_v8  ;;  %v2052_v20 = vmul.f32 %v8249_v42, %v2016_v30  ;;  %v2056_v21 = vmul.f32 %v8249_v42, %v2020_v56 }
 0x3f0   : > { %v2172_v4 = vpack.c.bf16 %v2150_v40, %v2149_v36  ;;  %v2053_v51 = vmul.f32 %v8249_v42, %v2017_v13  ;;  %v2054_v10 = vmul.f32 %v8249_v42, %v2018_v44  ;;  %v2173_v0 = vpack.c.bf16 %v2152_v19, %v2151_v29 }
 0x3f1   : > { %6197 = vmatprep.mubr.bf16.mxu0 %v2171_v32  ;;  %v2087_v1 = vmul.f32 %v8136_v46, %v2051_v61  ;;  %v2088_v3 = vmul.f32 %v8136_v46, %v2052_v20  ;;  %v2055_v6 = vmul.f32 %v8249_v42, %v2019_v28  ;;  %v2153_v8 = vmax.f32 %v2121_v11, 0.0 }
 0x3f2   : > { %6198 = vmatmul.mubr.bf16.gmra.mxu0 %v2172_v4  ;;  %v2154_v33 = vmax.f32 %v2122_v62, 0.0  ;;  %v2089_v13 = vmul.f32 %v8136_v46, %v2053_v51  ;;  %v2090_v39 = vmul.f32 %v8136_v46, %v2054_v10  ;;  %v2092_v7 = vmul.f32 %v8136_v46, %v2056_v21 }
 0x3f3   : > { %6201 = vmatprep.mubr.bf16.mxu0 %v2173_v0  ;;  %v2123_v30 = vadd.f32 %v8139_v50, %v2087_v1  ;;  %v2124_v56 = vadd.f32 %v8139_v50, %v2088_v3  ;;  %v2091_v52 = vmul.f32 %v8136_v46, %v2055_v6  ;;  %v2021_v47 = vsub.f32 %v8109_v34, %v8194_v18  ;;  %v8315_v3 = vpop.permute.xlu1 %2503  ;;  %v8317_v6 = vld [vmem:[#allocation8] sm:$0xff]  }
 0x3f4   : > { %v2022_v60 = vsub.f32 %v8119_v35, %v8194_v18  ;;  %v2174_v44 = vpack.c.bf16 %v2154_v33, %v2153_v8  ;;  %v2125_v14 = vadd.f32 %v8139_v50, %v2089_v13  ;;  %v2126_v48 = vadd.f32 %v8139_v50, %v2090_v39  ;;  %6229 = vmatprep.mubr.bf16.mxu1 %v8317_v6  ;;  %v954_v13 = vld [vmem:[%s10377_s30] sm:$0xff] }
 0x3f5   : > { %v2155_v16 = vmax.f32 %v2123_v30, 0.0  ;;  %v2156_v38 = vmax.f32 %v2124_v56, 0.0  ;;  %v2057_v36 = vmul.f32 %v8249_v42, %v2021_v47  ;;  %v2127_v29 = vadd.f32 %v8139_v50, %v2091_v52  ;;  %2926 = vperm.xlu1 %6704, %v954_v13   ;;  %v8343_v52 = vpop.permute.xlu0 %2498  ;;  %v958_v47 = vld [vmem:[%s10377_s30 + $0x20] sm:$0xff] }
 0x3f6   : > { %v2058_v28 = vmul.f32 %v8249_v42, %v2022_v60  ;;  %v2128_v19 = vadd.f32 %v8139_v50, %v2092_v7  ;;  %v2157_v11 = vmax.f32 %v2125_v14, 0.0  ;;  %v2158_v32 = vmax.f32 %v2126_v48, 0.0  ;;  %v956_v14 = vld [vmem:[%s10377_s30 + $0x10] sm:$0xff]  ;;  %v8439_v35 = vld [vmem:[#allocation7] ss:$0 sm:$0xff] }
 0x3f7   : > { %v2175_v40 = vpack.c.bf16 %v2156_v38, %v2155_v16  ;;  %v2093_v18 = vmul.f32 %v8136_v46, %v2057_v36  ;;  %v2159_v61 = vmax.f32 %v2127_v29, 0.0  ;;  %v955_v16 = vld [vmem:[%s10377_s30 + $0x8] sm:$0xff]  ;;  %v957_v38 = vld [vmem:[%s10377_s30 + $0x18] sm:$0xff]  ;;  %v960_v48 = vld [vmem:[%s10377_s30 + $0x30] sm:$0xff]  ;;  %2936 = vperm.xlu0 %6705, %v956_v14  }
 0x3f8   : > { %v2094_v62 = vmul.f32 %v8136_v46, %v2058_v28  ;;  %v2160_v20 = vmax.f32 %v2128_v19, 0.0  ;;  %v2176_v21 = vpack.c.bf16 %v2158_v32, %v2157_v11  ;;  %v8320_v46 = vpop.permute.xlu1 %2595  ;;  %v988_v36 = vld [vmem:[%s10179_s12] sm:$0x3]  ;;  %v959_v11 = vld [vmem:[%s10377_s30 + $0x28] sm:$0xff] }
 0x3f9   : > { %v2129_v4 = vadd.f32 %v8139_v50, %v2093_v18  ;;  %2931 = vperm.xlu1 %6704, %v955_v16   ;;  %v8350_v60 = vpop.permute.xlu0 %2493  ;;  %v962_v32 = vld [vmem:[%s10377_s30 + $0x40] sm:$0xff] }
 0x3fa   : > { %6202 = vmatmul.mubr.bf16.gmra.mxu0 %v2174_v44  ;;  %v2130_v42 = vadd.f32 %v8139_v50, %v2094_v62  ;;  %v2177_v51 = vpack.c.bf16 %v2160_v20, %v2159_v61  ;;  %v961_v62 = vld [vmem:[%s10377_s30 + $0x38] sm:$0xff]  ;;  %v964_v61 = vld [vmem:[%s10377_s30 + $0x50] sm:$0xff]  ;;  %v966_v16 = vld [vmem:[%s10377_s30 + $0x60] sm:$0xff] }
 0x3fb   : > { %6205 = vmatprep.mubr.bf16.mxu0 %v2175_v40  ;;  %v2161_v10 = vmax.f32 %v2129_v4, 0.0  ;;  %v8366_v40 = vrot.slane %v988_v36, %v7693_v54  ;;  %2951 = vperm.xlu0 %6705, %v959_v11  }
 0x3fc   : > { %v2162_v0 = vmax.f32 %v2130_v42, 0.0  ;;  %v8322_v8 = vpop.permute.xlu1 %2599 }
 0x3fd   : > { %2941 = vperm.xlu1 %6704, %v957_v38   ;;  %v8363_v28 = vpop.permute.xlu0 %2468  ;;  %10378 = vst [vmem:[#allocation83_spill] sm:$0xff] %v8366_v40  ;;  %v3683_v20 = vmul.f32 %v8366_v40, %v7727_v24 }
 0x3fe   : > { %v2178_v1 = vpack.c.bf16 %v2162_v0, %v2161_v10  ;;  %v8399_v0 = vrot.slane %v988_v36, %v7696_v57  ;;  %v968_v36 = vld [vmem:[%s10377_s30 + $0x70] sm:$0xff] }
 0x3ff   : > { %2961 = vperm.xlu0 %6705, %v961_v62  }
 0x400   : > { %v8324_v33 = vpop.permute.xlu1 %2488  ;;  %10379 = vst [vmem:[#allocation84_spill] sm:$0xff] %v8399_v0  ;;  %v3703_v24 = vadd.f32 %v8399_v0, %v3683_v20 }
 0x401   : > { %2946 = vperm.xlu1 %6704, %v958_v47   ;;  %v8392_v42 = vpop.permute.xlu0 %2448 }
 0x402   : > { %6206 = vmatmul.mubr.bf16.gmra.mxu0 %v2176_v21  ;;  %v3684_v21 = vmul.f32 %v8366_v40, %v7729_v25  ;;  %v963_v25 = vld [vmem:[%s10377_s30 + $0x48] sm:$0xff]  ;;  %v3719_v47 = vmax.f32 %v3703_v24, 0.0 }
 0x403   : > { %6209 = vmatprep.mubr.bf16.mxu0 %v2177_v51  ;;  %2971 = vperm.xlu0 %6705, %v963_v25   ;;  %v967_v24 = vld [vmem:[%s10377_s30 + $0x68] sm:$0xff] }
 0x404   : > { %v8326_v50 = vpop.permute.xlu1 %2587  ;;  %v3704_v13 = vadd.f32 %v8399_v0, %v3684_v21 }
 0x405   : > { %2956 = vperm.xlu1 %6704, %v960_v48   ;;  %v965_v48 = vld [vmem:[%s10377_s30 + $0x58] sm:$0xff]  ;;  %v8419_v11 = vpop.permute.xlu0 %2428 }
 0x406   : > { %v3720_v14 = vmax.f32 %v3704_v13, 0.0 }
 0x407   : > { %2981 = vperm.xlu0 %6705, %v965_v48  }
 0x408   : > { %v8328_v30 = vpop.permute.xlu1 %2478 }
 0x409   : > { %2966 = vperm.xlu1 %6704, %v962_v32   ;;  %v8428_v13 = vpop.permute.xlu0 %2591 }
 0x40a   : > { %6210 = vmatmul.mubr.bf16.gmra.mxu0 %v2178_v1 }
 0x40b   : > { %2991 = vperm.xlu0 %6705, %v967_v24  }
 0x40c   : > { %v8330_v56 = vpop.permute.xlu1 %2483 }
 0x40d   : > { %2976 = vperm.xlu1 %6704, %v964_v61   ;;  %v8423_v61 = vpack.c.bf16 %v3720_v14, %v3719_v47  ;;  %v8435_v48 = vpop.permute.xlu0 %2579 }
 0x40f   : > { %10380 = vst [vmem:[#allocation85_spill] sm:$0xff] %v8423_v61  ;;  %3001 = vperm.xlu0 %6705, %v969_v55  }
 0x410   : > { %v8335_v39 = vpop.permute.xlu1 %2583 }
 0x411   : > { %2986 = vperm.xlu1 %6704, %v966_v16   ;;  %v8455_v2 = vpop.permute.xlu0 %2575 }
 0x414   : > { %v8345_v7 = vpop.permute.xlu1 %2473 }
 0x415   : > { %2996 = vperm.xlu1 %6704, %v968_v36  }
 0x418   : > { %v8352_v44 = vpop.permute.xlu1 %2571 }
 0x41c   : > { %v8368_v29 = vpop.permute.xlu1 %2458 }
 0x420   : > { %v8394_v51 = vpop.permute.xlu1 %2463 }
 0x424   : > { %v8421_v32 = vpop.permute.xlu1 %2567 }
 0x428   : > { %v8430_v25 = vpop.permute.xlu1 %2453 }
 0x42c   : > { %v8437_v36 = vpop.permute.xlu1 %2555 }
 0x491   : > { %v8370_v19 = vpop.f32.mrf.mxu0 }
 0x493   : > { %v8378_v18 = vpop.f32.mrf.mxu0 }
 0x495   : > { %v8390_v4 = vpop.f32.mrf.mxu0 }
 0x497   : > { %v8396_v10 = vpop.f32.mrf.mxu0 }
 0x499   : > { %v8401_v1 = vpop.f32.mrf.mxu0 }
 0x49b   : > { %v8411_v38 = vpop.f32.mrf.mxu0 }
 0x49d   : > { %v6188_v62 = vpop.f32.mrf.mxu0 }
 0x49e   : > { %v8487_v9 = vadd.f32 %v6188_v62, %v8439_v35 }
 0x49f   : > { %v2280_v20 = vpop.f32.mrf.mxu0 }
 0x4a0   : > { %10389 = vst [vmem:[#allocation94_spill] sm:$0xff] %v8487_v9 }
 0x4a1   : > { %v6191_v21 = vpop.f32.mrf.mxu0 }
 0x4a2   : > { %v8453_v43 = vadd.f32 %v6191_v21, %v8439_v35 }
 0x4a3   : > { %v2293_v16 = vpop.f32.mrf.mxu0 }
 0x4a4   : > { %10384 = vst [vmem:[#allocation89_spill] sm:$0xff] %v8453_v43  ;;  %v8478_v53 = vadd.f32 %v8439_v35, %v2293_v16 }
 0x4a5   : > { %v6192_v47 = vpop.f32.mrf.mxu0 }
 0x4a6   : > { %v8445_v24 = vadd.f32 %v6192_v47, %v8439_v35  ;;  %v8462_v47 = vpop.permute.xlu1 %2438  ;;  %10388 = vst [vmem:[#allocation93_spill] sm:$0xff] %v8478_v53 }
 0x4a7   : > { %v2296_v14 = vpop.f32.mrf.mxu0 }
 0x4a8   : > { %10382 = vst [vmem:[#allocation87_spill] sm:$0xff] %v8445_v24  ;;  %v2517_v31 = vmul.f32 %v8330_v56, %v8445_v24  ;;  %v2513_v24 = vmul.f32 %v8394_v51, %v8487_v9 }
 0x4a9   : > { %v6195_v34 = vpop.f32.mrf.mxu0 }
 0x4aa   : > { %v8442_v63 = vadd.f32 %v6195_v34, %v8439_v35 }
 0x4ab   : > { %v2309_v37 = vpop.f32.mrf.mxu0 }
 0x4ac   : > { %10381 = vst [vmem:[#allocation86_spill] sm:$0xff] %v8442_v63  ;;  %v2520_v49 = vmul.f32 %v8343_v52, %v8442_v63  ;;  %v8450_v55 = vadd.f32 %v8439_v35, %v2309_v37  ;;  %v8467_v37 = vadd.f32 %v8439_v35, %v2296_v14  ;;  %v8497_v63 = vpop.permute.xlu0 %2563 }
 0x4ad   : > { %v6196_v12 = vpop.f32.mrf.mxu0 }
 0x4ae   : > { %10383 = vst [vmem:[#allocation88_spill] sm:$0xff] %v8450_v55  ;;  %v2518_v34 = vmul.f32 %v8324_v33, %v8450_v55  ;;  %v8460_v41 = vadd.f32 %v6196_v12, %v8439_v35  ;;  %10386 = vst [vmem:[#allocation91_spill] sm:$0xff] %v8467_v37  ;;  %v2616_v21 = vadd.f32 %v8320_v46, %v2520_v49 }
 0x4af   : > { %v2312_v5 = vpop.f32.mrf.mxu0  ;;  %v2516_v12 = vmul.f32 %v8328_v30, %v8453_v43  ;;  %v2515_v57 = vmul.f32 %v8345_v7, %v8467_v37  ;;  %v8511_v37 = vadd.f32 %v8439_v35, %v2280_v20 }
 0x4b0   : > { %10385 = vst [vmem:[#allocation90_spill] sm:$0xff] %v8460_v41  ;;  %v2521_v15 = vmul.f32 %v8315_v3, %v8460_v41  ;;  %v8473_v59 = vadd.f32 %v8439_v35, %v2312_v5  ;;  %v2614_v45 = vadd.f32 %v8326_v50, %v2518_v34  ;;  %v2613_v5 = vadd.f32 %v8335_v39, %v2517_v31 }
 0x4b1   : > { %v2648_v54 = vmax.f32 %v2616_v21, 0.0  ;;  %v2612_v62 = vadd.f32 %v8435_v48, %v2516_v12  ;;  %v2514_v31 = vmul.f32 %v8363_v28, %v8478_v53  ;;  %10391 = vst [vmem:[#allocation96_spill] sm:$0xff] %v8511_v37  ;;  %v8540_v53 = vadd.f32 %v8370_v19, %v8439_v35 }
 0x4b2   : > { %10387 = vst [vmem:[#allocation92_spill] sm:$0xff] %v8473_v59  ;;  %v2617_v58 = vadd.f32 %v8322_v8, %v2521_v15  ;;  %v2519_v14 = vmul.f32 %v8350_v60, %v8473_v59  ;;  %v8484_v49 = vpop.f32.mrf.mxu0  ;;  %v8495_v15 = vpop.permute.xlu1 %2443  ;;  %v8501_v59 = vadd.f32 %v8401_v1, %v8439_v35  ;;  %v2646_v55 = vmax.f32 %v2614_v45, 0.0 }
 0x4b3   : > { %v2645_v43 = vmax.f32 %v2613_v5, 0.0  ;;  %v2611_v1 = vadd.f32 %v8455_v2, %v2515_v57  ;;  %v8527_v57 = vpop.permute.xlu0 %2559  ;;  %10394 = vst [vmem:[#allocation99_spill] sm:$0xff] %v8540_v53 }
 0x4b4   : > { %v2649_v16 = vmax.f32 %v2617_v58, 0.0  ;;  %v2615_v41 = vadd.f32 %v8428_v13, %v2519_v14  ;;  %v8493_v34 = vpop.f32.mrf.mxu0  ;;  %10390 = vst [vmem:[#allocation95_spill] sm:$0xff] %v8501_v59  ;;  %v2512_v45 = vmul.f32 %v8368_v29, %v8501_v59 }
 0x4b6   : > { %v2647_v21 = vmax.f32 %v2615_v41, 0.0  ;;  %v8506_v58 = vpop.f32.mrf.mxu0  ;;  %v2673_v14 = vpack.c.bf16 %v2649_v16, %v2648_v54  ;;  %v8520_v54 = vadd.f32 %v8439_v35, %v8411_v38  ;;  %v2644_v41 = vmax.f32 %v2612_v62, 0.0  ;;  %v8525_v5 = vpop.permute.xlu1 %2551 }
 0x4b7   : > { %v2610_v16 = vadd.f32 %v8352_v44, %v2514_v31  ;;  %v2511_v38 = vmul.f32 %v8430_v25, %v8511_v37  ;;  %v2608_v9 = vadd.f32 %v8497_v63, %v2512_v45  ;;  %v8558_v37 = vpop.permute.xlu0 %2547 }
 0x4b8   : > { %v8514_v61 = vpop.f32.mrf.mxu0  ;;  %6213 = vmatprep.subr.bf16.mxu1 %v2673_v14  ;;  %v2672_v12 = vpack.c.bf16 %v2647_v21, %v2646_v55  ;;  %10392 = vst [vmem:[#allocation97_spill] sm:$0xff] %v8520_v54  ;;  %v8531_v55 = vadd.f32 %v8390_v4, %v8439_v35  ;;  %v2609_v21 = vadd.f32 %v8421_v32, %v2513_v24 }
 0x4b9   : > { %6214 = vmatpush3.bf16.msra.mxu1 %v2673_v14  ;;  %v2643_v14 = vmax.f32 %v2611_v1, 0.0  ;;  %v2671_v31 = vpack.c.bf16 %v2645_v43, %v2644_v41  ;;  %v2510_v4 = vmul.f32 %v8392_v42, %v8520_v54  ;;  %v2642_v59 = vmax.f32 %v2610_v16, 0.0 }
 0x4ba   : > { %v8523_v20 = vpop.f32.mrf.mxu0  ;;  %6215 = vmatprep.subr.bf16.mxu1 %v2672_v12  ;;  %10393 = vst [vmem:[#allocation98_spill] sm:$0xff] %v8531_v55  ;;  %v2509_v24 = vmul.f32 %v8495_v15, %v8531_v55  ;;  %v8551_v43 = vadd.f32 %v8439_v35, %v8396_v10  ;;  %v2641_v1 = vmax.f32 %v2609_v21, 0.0  ;;  %v2607_v19 = vadd.f32 %v8527_v57, %v2511_v38  ;;  %v8556_v41 = vpop.permute.xlu1 %2433 }
 0x4bb   : > { %v2670_v45 = vpack.c.bf16 %v2643_v14, %v2642_v59  ;;  %v2508_v16 = vmul.f32 %v8462_v47, %v8540_v53  ;;  %v8564_v54 = vadd.f32 %v8439_v35, %v8378_v18  ;;  %v2640_v10 = vmax.f32 %v2608_v9, 0.0  ;;  %v8570_v26 = vpop.permute.xlu0 %2543 }
 0x4bc   : > { %v8536_v62 = vpop.f32.mrf.mxu0  ;;  %10395 = vst [vmem:[#allocation100_spill] sm:$0xff] %v8551_v43  ;;  %v2606_v21 = vadd.f32 %v8437_v36, %v2510_v4  ;;  %v2605_v38 = vadd.f32 %v8525_v5, %v2509_v24  ;;  %v2507_v59 = vmul.f32 %v8556_v41, %v8551_v43  ;;  %v2639_v14 = vmax.f32 %v2607_v19, 0.0 }
 0x4bd   : > { %6216 = vmatpush3.bf16.msra.mxu1 %v2672_v12  ;;  %10396 = vst [vmem:[#allocation101_spill] sm:$0xff] %v8564_v54  ;;  %v2506_v18 = vmul.f32 %v8419_v11, %v8564_v54  ;;  %v2604_v9 = vadd.f32 %v8558_v37, %v2508_v16 }
 0x4be   : > { %v8545_v27 = vpop.f32.mrf.mxu0  ;;  %6217 = vmatprep.subr.bf16.mxu1 %v2671_v31  ;;  %v2638_v53 = vmax.f32 %v2606_v21, 0.0  ;;  %v8575_v0 = vpop.permute.xlu1 %2539  ;;  %v2637_v24 = vmax.f32 %v2605_v38, 0.0  ;;  %v2603_v23 = vadd.f32 %v8570_v26, %v2507_v59 }
 0x4c0   : > { %v8554_v12 = vpop.f32.mrf.mxu0  ;;  %v2668_v19 = vpack.c.bf16 %v2639_v14, %v2638_v53  ;;  %v2635_v16 = vmax.f32 %v2603_v23, 0.0 }
 0x4c1   : > { %6218 = vmatpush3.bf16.msra.mxu1 %v2671_v31  ;;  %v2669_v31 = vpack.c.bf16 %v2641_v1, %v2640_v10  ;;  %v2636_v1 = vmax.f32 %v2604_v9, 0.0  ;;  %v2602_v10 = vadd.f32 %v8575_v0, %v2506_v18 }
 0x4c2   : > { %v6207_v55 = vpop.f32.mrf.mxu0  ;;  %6219 = vmatprep.subr.bf16.mxu1 %v2670_v45 }
 0x4c3   : > { %v2667_v22 = vpack.c.bf16 %v2637_v24, %v2636_v1  ;;  %v2634_v59 = vmax.f32 %v2602_v10, 0.0  ;;  %v8591_v14 = vadd.f32 %v6207_v55, %v8439_v35  ;;  %v8623_v10 = vld [vmem:[#allocation8 + $0x8] sm:$0xff]  }
 0x4c4   : > { %v2357_v17 = vpop.f32.mrf.mxu0 }
 0x4c5   : > { %6220 = vmatpush3.bf16.msra.mxu1 %v2670_v45 }
 0x4c6   : > { %v6208_v4 = vpop.f32.mrf.mxu0  ;;  %6221 = vmatprep.subr.bf16.mxu1 %v2669_v31 }
 0x4c7   : > { %v8583_v21 = vadd.f32 %v6208_v4, %v8439_v35  ;;  %v2666_v4 = vpack.c.bf16 %v2635_v16, %v2634_v59 }
 0x4c8   : > { %v2360_v43 = vpop.f32.mrf.mxu0 }
 0x4c9   : > { %6222 = vmatpush3.bf16.msra.mxu1 %v2669_v31  ;;  %v2533_v9 = vmul.f32 %v8330_v56, %v8583_v21  ;;  %v8612_v56 = vadd.f32 %v8439_v35, %v2357_v17 }
 0x4ca   : > { %v6211_v45 = vpop.f32.mrf.mxu0  ;;  %6223 = vmatprep.subr.bf16.mxu1 %v2668_v19 }
 0x4cb   : > { %v8580_v54 = vadd.f32 %v6211_v45, %v8439_v35 }
 0x4cc   : > { %v2373_v40 = vpop.f32.mrf.mxu0 }
 0x4cd   : > { %v2536_v38 = vmul.f32 %v8343_v52, %v8580_v54  ;;  %v8588_v53 = vadd.f32 %v8439_v35, %v2373_v40  ;;  %6224 = vmatpush3.bf16.msra.mxu1 %v2668_v19  ;;  %v8601_v40 = vadd.f32 %v8439_v35, %v2360_v43 }
 0x4ce   : > { %v6212_v31 = vpop.f32.mrf.mxu0  ;;  %6225 = vmatprep.subr.bf16.mxu1 %v2667_v22 }
 0x4cf   : > { %v2534_v23 = vmul.f32 %v8324_v33, %v8588_v53  ;;  %v8596_v18 = vadd.f32 %v6212_v31, %v8439_v35  ;;  %v2632_v24 = vadd.f32 %v8320_v46, %v2536_v38  ;;  %v2532_v33 = vmul.f32 %v8328_v30, %v8591_v14 }
 0x4d0   : > { %v2376_v52 = vpop.f32.mrf.mxu0  ;;  %v2531_v30 = vmul.f32 %v8345_v7, %v8601_v40 }
 0x4d1   : > { %v2537_v55 = vmul.f32 %v8315_v3, %v8596_v18  ;;  %v8607_v19 = vadd.f32 %v8439_v35, %v2376_v52  ;;  %6226 = vmatpush3.bf16.msra.mxu1 %v2667_v22  ;;  %v2630_v1 = vadd.f32 %v8326_v50, %v2534_v23  ;;  %v8620_v3 = vadd.f32 %v8545_v27, %v8439_v35 }
 0x4d2   : > { %6227 = vmatprep.subr.bf16.mxu1 %v2666_v4  ;;  %v2629_v22 = vadd.f32 %v8335_v39, %v2533_v9  ;;  %v2664_v17 = vmax.f32 %v2632_v24, 0.0  ;;  %v2628_v27 = vadd.f32 %v8435_v48, %v2532_v33  ;;  %v2530_v39 = vmul.f32 %v8363_v28, %v8612_v56 }
 0x4d3   : > { %v2633_v43 = vadd.f32 %v8322_v8, %v2537_v55  ;;  %v2535_v46 = vmul.f32 %v8350_v60, %v8607_v19  ;;  %v8628_v8 = vld [vmem:[#allocation8 + $0x10] sm:$0xff]   ;;  %v8632_v60 = vadd.f32 %v8523_v20, %v8439_v35  ;;  %v2662_v16 = vmax.f32 %v2630_v1, 0.0  ;;  %v8662_v55 = vld [vmem:[#allocation8 + $0x20] sm:$0xff]  }
 0x4d4   : > { %v2529_v7 = vmul.f32 %v8394_v51, %v8620_v3  ;;  %v2661_v31 = vmax.f32 %v2629_v22, 0.0  ;;  %v2627_v20 = vadd.f32 %v8455_v2, %v2531_v30  ;;  %v8650_v51 = vadd.f32 %v8439_v35, %v8536_v62  ;;  %v8657_v2 = vld [vmem:[#allocation8 + $0x18] sm:$0xff]  }
 0x4d5   : > { %v2665_v45 = vmax.f32 %v2633_v43, 0.0  ;;  %v2631_v50 = vadd.f32 %v8428_v13, %v2535_v46  ;;  %6228 = vmatpush3.bf16.msra.mxu1 %v2666_v4  ;;  %v8642_v13 = vadd.f32 %v8439_v35, %v8554_v12  ;;  %v2528_v28 = vmul.f32 %v8368_v29, %v8632_v60 }
 0x4d6   : > { %v2660_v23 = vmax.f32 %v2628_v27, 0.0  ;;  %v2626_v9 = vadd.f32 %v8352_v44, %v2530_v39  ;;  %v8655_v12 = vadd.f32 %v8506_v58, %v8439_v35  ;;  %v2625_v52 = vadd.f32 %v8421_v32, %v2529_v7  ;;  %v6729_v39 = vld [vmem:[#allocation8 + $0x38] sm:$0xff]   ;;  %v6733_v7 = vld [vmem:[#allocation11 + $0x20] sm:$0xff]  }
 0x4d7   : > { %v2663_v38 = vmax.f32 %v2631_v50, 0.0  ;;  %v2681_v59 = vpack.c.bf16 %v2665_v45, %v2664_v17  ;;  %v2527_v4 = vmul.f32 %v8430_v25, %v8642_v13  ;;  %v2659_v29 = vmax.f32 %v2627_v20, 0.0  ;;  %v6728_v45 = vld [vmem:[#allocation8 + $0x30] sm:$0xff]  }
 0x4d8   : > { %6230 = vmatmul.mubr.bf16.vlgmr.msra.gmra.mxu1 %v8623_v10  ;;  %v2679_v24 = vpack.c.bf16 %v2661_v31, %v2660_v23  ;;  %v8666_v44 = vadd.f32 %v8484_v49, %v8439_v35  ;;  %v2624_v62 = vadd.f32 %v8497_v63, %v2528_v28  ;;  %v2526_v58 = vmul.f32 %v8392_v42, %v8650_v51  ;;  %v10398_v31 = vld [vmem:[#allocation83_spill] sm:$0xff] }
 0x4d9   : > { %6245 = vmatprep.subr.bf16.mxu1 %v2681_v59  ;;  %v2680_v48 = vpack.c.bf16 %v2663_v38, %v2662_v16  ;;  %6233 = vmatprep.mubr.bf16.mxu1 %v8628_v8  ;;  %v2658_v33 = vmax.f32 %v2626_v9, 0.0  ;;  %v2525_v32 = vmul.f32 %v8495_v15, %v8655_v12  ;;  %v8676_v25 = vadd.f32 %v8439_v35, %v8514_v61  ;;  %v6727_v61 = vld [vmem:[#allocation8 + $0x28] sm:$0xff]  }
 0x4da   : > { %6246 = vmatpush3.bf16.msra.mxu1 %v2681_v59  ;;  %v2657_v1 = vmax.f32 %v2625_v52, 0.0  ;;  %v2623_v49 = vadd.f32 %v8527_v57, %v2527_v4  ;;  %v2524_v63 = vmul.f32 %v8462_v47, %v8666_v44  ;;  %v8684_v42 = vadd.f32 %v8439_v35, %v8493_v34  ;;  %v6731_v59 = vld [vmem:[#allocation11 + $0x30] sm:$0xff]  }
 0x4db   : > { %6247 = vmatprep.subr.bf16.mxu1 %v2680_v48  ;;  %v2678_v43 = vpack.c.bf16 %v2659_v29, %v2658_v33  ;;  %v2656_v15 = vmax.f32 %v2624_v62, 0.0  ;;  %v2622_v46 = vadd.f32 %v8437_v36, %v2526_v58  ;;  %v2621_v22 = vadd.f32 %v8525_v5, %v2525_v32  ;;  %v6735_v52 = vld [vmem:[#allocation11 + $0x10] sm:$0xff]   ;;  %v10401_v29 = vld [vmem:[#allocation39_spill] sm:$0xff] }
 0x4dc   : > { %v2523_v57 = vmul.f32 %v8556_v41, %v8676_v25  ;;  %v2655_v30 = vmax.f32 %v2623_v49, 0.0  ;;  %v2620_v47 = vadd.f32 %v8558_v37, %v2524_v63  ;;  %v2522_v35 = vmul.f32 %v8419_v11, %v8684_v42  ;;  %v6736_v58 = vld [vmem:[#allocation11 + $0x8] sm:$0xff]   ;;  %v6737_v49 = vld [vmem:[#allocation11] sm:$0xff]  }
 0x4dd   : > { %v2677_v17 = vpack.c.bf16 %v2657_v1, %v2656_v15  ;;  %v2654_v34 = vmax.f32 %v2622_v46, 0.0  ;;  %v2653_v36 = vmax.f32 %v2621_v22, 0.0  ;;  %v10404_v15 = vld [vmem:[#allocation42_spill] sm:$0xff] }
 0x4de   : > { %6248 = vmatpush3.bf16.msra.mxu1 %v2680_v48  ;;  %v2619_v50 = vadd.f32 %v8570_v26, %v2523_v57  ;;  %v2652_v5 = vmax.f32 %v2620_v47, 0.0  ;;  %v2618_v41 = vadd.f32 %v8575_v0, %v2522_v35  ;;  %v6730_v26 = vld [vmem:[#allocation11 + $0x38] sm:$0xff]   ;;  %v6732_v0 = vld [vmem:[#allocation11 + $0x28] sm:$0xff]   ;;  %v10399_v48 = vld [vmem:[#allocation38_spill] sm:$0xff]  ;;  %v3688_v46 = vmul.f32 %v10398_v31, %v10404_v15 }
 0x4df   : > { %6249 = vmatprep.subr.bf16.mxu1 %v2679_v24  ;;  %v2676_v27 = vpack.c.bf16 %v2655_v30, %v2654_v34  ;;  %v3682_v28 = vmul.f32 %v10398_v31, %v10399_v48  ;;  %v10405_v57 = vld [vmem:[#allocation43_spill] sm:$0xff] }
 0x4e0   : > { %6234 = vmatmul.mubr.bf16.gmra.mxu1 %v8657_v2  ;;  %v2651_v16 = vmax.f32 %v2619_v50, 0.0  ;;  %v2675_v38 = vpack.c.bf16 %v2653_v36, %v2652_v5  ;;  %v2650_v37 = vmax.f32 %v2618_v41, 0.0  ;;  %v3689_v30 = vmul.f32 %v10398_v31, %v10405_v57  ;;  %v6743_v57 = vld [vmem:[#allocation10 + $0x10] sm:$0xff]  }
 0x4e1   : > { %6237 = vmatprep.mubr.bf16.mxu1 %v8662_v55 }
 0x4e2   : > { %6250 = vmatpush3.bf16.msra.mxu1 %v2679_v24  ;;  %v2674_v11 = vpack.c.bf16 %v2651_v16, %v2650_v37  ;;  %v3685_v24 = vmul.f32 %v10398_v31, %v10401_v29 }
 0x4e3   : > { %6251 = vmatprep.subr.bf16.mxu1 %v2678_v43 }
 0x4e6   : > { %6252 = vmatpush3.bf16.msra.mxu1 %v2678_v43  ;;  %v10403_v43 = vld [vmem:[#allocation41_spill] sm:$0xff] }
 0x4e7   : > { %6253 = vmatprep.subr.bf16.mxu1 %v2677_v17  ;;  %v3687_v63 = vmul.f32 %v10398_v31, %v10403_v43 }
 0x4e8   : > { %6238 = vmatmul.mubr.bf16.gmra.mxu1 %v6727_v61 }
 0x4e9   : > { %6241 = vmatprep.mubr.bf16.mxu1 %v6728_v45 }
 0x4ea   : > { %6254 = vmatpush3.bf16.msra.mxu1 %v2677_v17  ;;  %v10406_v17 = vld [vmem:[#allocation44_spill] sm:$0xff] }
 0x4eb   : > { %6255 = vmatprep.subr.bf16.mxu1 %v2676_v27 }
 0x4ee   : > { %6256 = vmatpush3.bf16.msra.mxu1 %v2676_v27  ;;  %v10407_v27 = vld [vmem:[#allocation85_spill] sm:$0xff] }
 0x4ef   : > { %6257 = vmatprep.subr.bf16.mxu1 %v2675_v38 }
 0x4f0   : > { %6242 = vmatmul.mubr.bf16.gmra.mxu1 %v6729_v39 }
 0x4f1   : > { %6261 = vmatprep.mubr.bf16.mxu1 %v8317_v6  ;;  %v10397_v6 = vld [vmem:[#allocation37_spill] sm:$0xff] }
 0x4f2   : > { %6258 = vmatpush3.bf16.msra.mxu1 %v2675_v38  ;;  %v3681_v20 = vmul.f32 %v10398_v31, %v10397_v6  ;;  %v10409_v38 = vld [vmem:[#allocation46_spill] sm:$0xff] }
 0x4f3   : > { %6259 = vmatprep.subr.bf16.mxu1 %v2674_v11  ;;  %v3692_v37 = vmul.f32 %v10398_v31, %v10409_v38 }
 0x4f6   : > { %6260 = vmatpush3.bf16.msra.mxu1 %v2674_v11 }
 0x4f7   : > { %6325 = vmatprep.subr.bf16.mxu1 %v6730_v26 }
 0x4f9   : > { %6262 = vmatmul.mubr.bf16.vlgmr.msra.gmra.mxu1 %v8623_v10  ;;  %v6734_v10 = vld [vmem:[#allocation11 + $0x18] sm:$0xff]  }
 0x4fa   : > { %6326 = vmatpush3.bf16.msra.mxu1 %v6730_v26  ;;  %6265 = vmatprep.mubr.bf16.mxu1 %v8628_v8  ;;  %v10400_v8 = vld [vmem:[#allocation84_spill] sm:$0xff] }
 0x4fb   : > { %6327 = vmatprep.subr.bf16.mxu1 %v6731_v59  ;;  %v3701_v23 = vadd.f32 %v10400_v8, %v3681_v20  ;;  %v3702_v9 = vadd.f32 %v10400_v8, %v3682_v28  ;;  %v3705_v32 = vadd.f32 %v10400_v8, %v3685_v24  ;;  %v3707_v47 = vadd.f32 %v10400_v8, %v3687_v63  ;;  %v10413_v24 = vld [vmem:[#allocation50_spill] sm:$0xff] }
 0x4fc   : > { %v3708_v35 = vadd.f32 %v10400_v8, %v3688_v46  ;;  %v3709_v36 = vadd.f32 %v10400_v8, %v3689_v30  ;;  %v3712_v28 = vadd.f32 %v10400_v8, %v3692_v37  ;;  %v6738_v46 = vld [vmem:[#allocation10 + $0x38] sm:$0xff]   ;;  %v6744_v30 = vld [vmem:[#allocation10 + $0x8] sm:$0xff]  }
 0x4fd   : > { %v3718_v4 = vmax.f32 %v3702_v9, 0.0  ;;  %v3723_v5 = vmax.f32 %v3707_v47, 0.0  ;;  %6277 = vmatprep.subr.bf16.mxu0 %v6738_v46 }
 0x4fe   : > { %6328 = vmatpush3.bf16.msra.mxu1 %v6731_v59  ;;  %v3724_v41 = vmax.f32 %v3708_v35, 0.0  ;;  %v3725_v11 = vmax.f32 %v3709_v36, 0.0  ;;  %v10410_v59 = vld [vmem:[#allocation47_spill] sm:$0xff]  ;;  %6278 = vmatpush3.bf16.msra.mxu0 %v6738_v46 }
 0x4ff   : > { %6329 = vmatprep.subr.bf16.mxu1 %v6732_v0 }
 0x500   : > { %v3736_v20 = vpack.c.bf16 %v3724_v41, %v3723_v5 }
 0x501   : > { %6266 = vmatmul.mubr.bf16.gmra.mxu1 %v8657_v2  ;;  %v3717_v2 = vmax.f32 %v3701_v23, 0.0 }
 0x502   : > { %6330 = vmatpush3.bf16.msra.mxu1 %v6732_v0  ;;  %6269 = vmatprep.mubr.bf16.mxu1 %v8662_v55  ;;  %v10402_v55 = vld [vmem:[#allocation40_spill] sm:$0xff]  ;;  %v3693_v0 = vmul.f32 %v10398_v31, %v10410_v59  ;;  %v10414_v59 = vld [vmem:[#allocation101_spill] sm:$0xff] }
 0x503   : > { %6331 = vmatprep.subr.bf16.mxu1 %v6733_v7  ;;  %v3686_v62 = vmul.f32 %v10398_v31, %v10402_v55  ;;  %v3733_v33 = vpack.c.bf16 %v3718_v4, %v3717_v2  ;;  %v3728_v2 = vmax.f32 %v3712_v28, 0.0  ;;  %v10412_v4 = vld [vmem:[#allocation49_spill] sm:$0xff]  ;;  %v3696_v55 = vmul.f32 %v10398_v31, %v10413_v24 }
 0x504   : > { %v3713_v23 = vadd.f32 %v10400_v8, %v3693_v0  ;;  %v3695_v29 = vmul.f32 %v10398_v31, %v10412_v4 }
 0x505   : > { %v3706_v1 = vadd.f32 %v10400_v8, %v3686_v62 }
 0x506   : > { %6332 = vmatpush3.bf16.msra.mxu1 %v6733_v7  ;;  %v10411_v7 = vld [vmem:[#allocation48_spill] sm:$0xff]  ;;  %v3729_v62 = vmax.f32 %v3713_v23, 0.0 }
 0x507   : > { %6333 = vmatprep.subr.bf16.mxu1 %v6734_v10  ;;  %v3722_v22 = vmax.f32 %v3706_v1, 0.0  ;;  %v3694_v6 = vmul.f32 %v10398_v31, %v10411_v7  ;;  %v3716_v1 = vadd.f32 %v10400_v8, %v3696_v55 }
 0x509   : > { %6270 = vmatmul.mubr.bf16.gmra.mxu1 %v6727_v61  ;;  %v3721_v61 = vmax.f32 %v3705_v32, 0.0  ;;  %v3714_v9 = vadd.f32 %v10400_v8, %v3694_v6  ;;  %v3715_v32 = vadd.f32 %v10400_v8, %v3695_v29  ;;  %v3732_v63 = vmax.f32 %v3716_v1, 0.0 }
 0x50a   : > { %6334 = vmatpush3.bf16.msra.mxu1 %v6734_v10  ;;  %6273 = vmatprep.mubr.bf16.mxu1 %v6728_v45  ;;  %v3690_v45 = vmul.f32 %v10398_v31, %v10406_v17  ;;  %v6745_v17 = vld [vmem:[#allocation10] sm:$0xff]  }
 0x50b   : > { %6335 = vmatprep.subr.bf16.mxu1 %v6735_v52  ;;  %v3735_v34 = vpack.c.bf16 %v3722_v22, %v3721_v61  ;;  %v3731_v43 = vmax.f32 %v3715_v32, 0.0  ;;  %v6739_v61 = vld [vmem:[#allocation10 + $0x30] sm:$0xff]   ;;  %v6741_v22 = vld [vmem:[#allocation10 + $0x20] sm:$0xff]  }
 0x50c   : > { %v3710_v50 = vadd.f32 %v10400_v8, %v3690_v45  ;;  %6279 = vmatprep.subr.bf16.mxu0 %v6739_v61  ;;  %v8743_v45 = vpop.permute.xlu1 %2926 }
 0x50d   : > { %v3740_v15 = vpack.c.bf16 %v3732_v63, %v3731_v43  ;;  %6280 = vmatpush3.bf16.msra.mxu0 %v6739_v61  ;;  %v10418_v43 = vld [vmem:[#allocation97_spill] sm:$0xff] }
 0x50e   : > { %6336 = vmatpush3.bf16.msra.mxu1 %v6735_v52  ;;  %v3726_v26 = vmax.f32 %v3710_v50, 0.0 }
 0x50f   : > { %6337 = vmatprep.subr.bf16.mxu1 %v6736_v58 }
 0x510   : > { %v3737_v10 = vpack.c.bf16 %v3726_v26, %v3725_v11  ;;  %v8745_v47 = vpop.permute.xlu1 %2931 }
 0x511   : > { %6274 = vmatmul.mubr.bf16.gmra.mxu1 %v6729_v39  ;;  %v10408_v39 = vld [vmem:[#allocation45_spill] sm:$0xff] }
 0x512   : > { %6338 = vmatpush3.bf16.msra.mxu1 %v6736_v58  ;;  %6341 = vmatprep.mubr.bf16.mxu1 %v3733_v33  ;;  %v3691_v16 = vmul.f32 %v10398_v31, %v10408_v39  ;;  %v3730_v58 = vmax.f32 %v3714_v9, 0.0  ;;  %v6740_v31 = vld [vmem:[#allocation10 + $0x28] sm:$0xff]   ;;  %v10417_v9 = vld [vmem:[#allocation98_spill] sm:$0xff] }
 0x513   : > { %6339 = vmatprep.subr.bf16.mxu1 %v6737_v49  ;;  %6281 = vmatprep.subr.bf16.mxu0 %v6740_v31 }
 0x514   : > { %v3711_v48 = vadd.f32 %v10400_v8, %v3691_v16  ;;  %6282 = vmatpush3.bf16.msra.mxu0 %v6740_v31  ;;  %v6742_v8 = vld [vmem:[#allocation10 + $0x18] sm:$0xff]   ;;  %v8747_v35 = vpop.permute.xlu1 %2941 }
 0x515   : > { %6283 = vmatprep.subr.bf16.mxu0 %v6741_v22 }
 0x516   : > { %6340 = vmatpush3.bf16.msra.mxu1 %v6737_v49  ;;  %v3727_v52 = vmax.f32 %v3711_v48, 0.0  ;;  %v3739_v49 = vpack.c.bf16 %v3730_v58, %v3729_v62  ;;  %v10415_v48 = vld [vmem:[#allocation99_spill] sm:$0xff] }
 0x518   : > { %v3738_v33 = vpack.c.bf16 %v3728_v2, %v3727_v52  ;;  %6284 = vmatpush3.bf16.msra.mxu0 %v6741_v22  ;;  %v8751_v36 = vpop.permute.xlu1 %2946 }
 0x519   : > { %6342 = vmatmul.mubr.bf16.vlgmr.msra.gmra.mxu1 %v10407_v27  ;;  %6285 = vmatprep.subr.bf16.mxu0 %v6742_v8 }
 0x51a   : > { %6345 = vmatprep.mubr.bf16.mxu1 %v3735_v34  ;;  %v8749_v34 = vpop.permute.xlu0 %2936 }
 0x51c   : > { %6286 = vmatpush3.bf16.msra.mxu0 %v6742_v8  ;;  %v8755_v41 = vpop.permute.xlu1 %2956 }
 0x51d   : > { %6287 = vmatprep.subr.bf16.mxu0 %v6743_v57 }
 0x51e   : > { %v8753_v50 = vpop.permute.xlu0 %2951 }
 0x520   : > { %6288 = vmatpush3.bf16.msra.mxu0 %v6743_v57 }
 0x521   : > { %6346 = vmatmul.mubr.bf16.gmra.mxu1 %v3736_v20  ;;  %6289 = vmatprep.subr.bf16.mxu0 %v6744_v30  ;;  %v8766_v20 = vpop.permute.xlu1 %2966 }
 0x522   : > { %6349 = vmatprep.mubr.bf16.mxu1 %v3737_v10  ;;  %v8758_v38 = vpop.permute.xlu0 %2961  ;;  %v10416_v10 = vld [vmem:[#allocation100_spill] sm:$0xff] }
 0x524   : > { %6290 = vmatpush3.bf16.msra.mxu0 %v6744_v30  ;;  %v10419_v30 = vld [vmem:[#allocation95_spill] sm:$0xff] }
 0x525   : > { %6291 = vmatprep.subr.bf16.mxu0 %v6745_v17  ;;  %v8795_v61 = vpop.permute.xlu1 %2976 }
 0x526   : > { %v8777_v4 = vpop.permute.xlu0 %2971 }
 0x528   : > { %6292 = vmatpush3.bf16.msra.mxu0 %v6745_v17 }
 0x529   : > { %6350 = vmatmul.mubr.bf16.gmra.mxu1 %v3738_v33 }
 0x52a   : > { %6353 = vmatprep.mubr.bf16.mxu1 %v3739_v49 }
 0x531   : > { %6354 = vmatmul.mubr.bf16.gmra.mxu1 %v3740_v15 }
 0x598   : > { %v6231_v27 = vpop.f32.mrf.mxu1 }
 0x599   : > { %v3006_v37 = vadd.f32 %v6231_v27, %v8749_v34 }
 0x59a   : > { %v2764_v5 = vpop.f32.mrf.mxu1 }
 0x59b   : > { %v3004_v39 = vadd.f32 %v8743_v45, %v2764_v5  ;;  %v8769_v28 = vadd.f32 %v3006_v37, %v10415_v48  ;;  %v8803_v5 = vpop.permute.xlu0 %2981 }
 0x59c   : > { %v6232_v16 = vpop.f32.mrf.mxu1 }
 0x59d   : > { %v3007_v11 = vadd.f32 %v6232_v16, %v8747_v35  ;;  %v8763_v0 = vadd.f32 %v3004_v39, %v10414_v59  ;;  %v3114_v32 = vmul.f32 %v8769_v28, %v8769_v28 }
 0x59e   : > { %v2767_v26 = vpop.f32.mrf.mxu1 }
 0x59f   : > { %v3005_v7 = vadd.f32 %v8745_v47, %v2767_v26  ;;  %v8775_v52 = vadd.f32 %v3007_v11, %v10417_v9  ;;  %v3112_v29 = vmul.f32 %v8763_v0, %v8763_v0  ;;  %v10420_v11 = vld [vmem:[#allocation96_spill] sm:$0xff] }
 0x5a0   : > { %v6235_v6 = vpop.f32.mrf.mxu1 }
 0x5a1   : > { %v8772_v23 = vadd.f32 %v3005_v7, %v10416_v10  ;;  %v3010_v58 = vadd.f32 %v6235_v6, %v8755_v41  ;;  %v3115_v15 = vmul.f32 %v8775_v52, %v8775_v52  ;;  %v10421_v6 = vld [vmem:[#allocation94_spill] sm:$0xff] }
 0x5a2   : > { %v2780_v2 = vpop.f32.mrf.mxu1 }
 0x5a3   : > { %v3068_v24 = vadd.f32 %v8772_v23, %v8763_v0  ;;  %v3113_v55 = vmul.f32 %v8772_v23, %v8772_v23  ;;  %v3008_v62 = vadd.f32 %v8751_v36, %v2780_v2  ;;  %v8801_v17 = vadd.f32 %v3010_v58, %v10419_v30 }
 0x5a4   : > { %v6236_v33 = vpop.f32.mrf.mxu1 }
 0x5a5   : > { %v3069_v1 = vadd.f32 %v3068_v24, %v8769_v28  ;;  %v3144_v49 = vadd.f32 %v3113_v55, %v3112_v29  ;;  %v8791_v63 = vadd.f32 %v3008_v62, %v10418_v43  ;;  %v3011_v8 = vadd.f32 %v6236_v33, %v8758_v38  ;;  %v8819_v55 = vpop.permute.xlu1 %2986 }
 0x5a6   : > { %v2783_v46 = vpop.f32.mrf.mxu1  ;;  %v3118_v62 = vmul.f32 %v8801_v17, %v8801_v17 }
 0x5a7   : > { %v3145_v31 = vadd.f32 %v3144_v49, %v3114_v32  ;;  %v3070_v22 = vadd.f32 %v3069_v1, %v8775_v52  ;;  %v3009_v57 = vadd.f32 %v8753_v50, %v2783_v46  ;;  %v3116_v16 = vmul.f32 %v8791_v63, %v8791_v63  ;;  %v10422_v32 = vld [vmem:[#allocation93_spill] sm:$0xff] }
 0x5a8   : > { %v6239_v27 = vpop.f32.mrf.mxu1  ;;  %v8812_v48 = vadd.f32 %v3011_v8, %v10421_v6 }
 0x5a9   : > { %v3071_v39 = vadd.f32 %v3070_v22, %v8791_v63  ;;  %v3146_v37 = vadd.f32 %v3145_v31, %v3115_v15  ;;  %v8809_v26 = vadd.f32 %v3009_v57, %v10420_v11  ;;  %v3014_v2 = vadd.f32 %v6239_v27, %v8795_v61  ;;  %v8828_v15 = vpop.permute.xlu0 %2991  ;;  %v10423_v57 = vld [vmem:[#allocation89_spill] sm:$0xff]  ;;  %v10424_v11 = vld [vmem:[#allocation91_spill] sm:$0xff] }
 0x5aa   : > { %v2796_v59 = vpop.f32.mrf.mxu1  ;;  %v3119_v46 = vmul.f32 %v8812_v48, %v8812_v48 }
 0x5ab   : > { %v3147_v7 = vadd.f32 %v3146_v37, %v3116_v16  ;;  %v3072_v10 = vadd.f32 %v3071_v39, %v8809_v26  ;;  %v3117_v9 = vmul.f32 %v8809_v26, %v8809_v26  ;;  %v3012_v29 = vadd.f32 %v8766_v20, %v2796_v59 }
 0x5ac   : > { %v6240_v24 = vpop.f32.mrf.mxu1  ;;  %v8835_v30 = vadd.f32 %v3014_v2, %v10423_v57 }
 0x5ad   : > { %v3073_v58 = vadd.f32 %v3072_v10, %v8801_v17  ;;  %v3148_v33 = vadd.f32 %v3147_v7, %v3117_v9  ;;  %v8825_v1 = vadd.f32 %v3012_v29, %v10422_v32  ;;  %v3015_v49 = vadd.f32 %v6240_v24, %v8803_v5  ;;  %v10425_v7 = vld [vmem:[#allocation87_spill] sm:$0xff]  ;;  %v8846_v9 = vpop.permute.xlu1 %2996 }
 0x5ae   : > { %v2799_v43 = vpop.f32.mrf.mxu1  ;;  %v3122_v32 = vmul.f32 %v8835_v30, %v8835_v30 }
 0x5af   : > { %v3149_v31 = vadd.f32 %v3148_v33, %v3118_v62  ;;  %v3074_v22 = vadd.f32 %v3073_v58, %v8812_v48  ;;  %v3013_v8 = vadd.f32 %v8777_v4, %v2799_v43  ;;  %v3120_v16 = vmul.f32 %v8825_v1, %v8825_v1  ;;  %v8852_v33 = vpop.permute.xlu0 %3001 }
 0x5b0   : > { %v6243_v27 = vpop.f32.mrf.mxu1  ;;  %v8844_v6 = vadd.f32 %v3015_v49, %v10425_v7 }
 0x5b1   : > { %v3075_v39 = vadd.f32 %v3074_v22, %v8825_v1  ;;  %v3150_v37 = vadd.f32 %v3149_v31, %v3119_v46  ;;  %v8841_v59 = vadd.f32 %v3013_v8, %v10424_v11  ;;  %v10427_v46 = vld [vmem:[#allocation88_spill] sm:$0xff]  ;;  %v3018_v22 = vadd.f32 %v6243_v27, %v8846_v9 }
 0x5b2   : > { %10426 = vst [vmem:[#allocation37_spill] sm:$0xff] %v8844_v6  ;;  %v2812_v10 = vpop.f32.mrf.mxu1  ;;  %v3123_v57 = vmul.f32 %v8844_v6, %v8844_v6 }
 0x5b3   : > { %v3151_v29 = vadd.f32 %v3150_v37, %v3120_v16  ;;  %v3076_v2 = vadd.f32 %v3075_v39, %v8841_v59  ;;  %v3121_v24 = vmul.f32 %v8841_v59, %v8841_v59  ;;  %v3016_v62 = vadd.f32 %v8819_v55, %v2812_v10 }
 0x5b4   : > { %v6244_v58 = vpop.f32.mrf.mxu1 }
 0x5b5   : > { %v3077_v49 = vadd.f32 %v3076_v2, %v8835_v30  ;;  %v3152_v43 = vadd.f32 %v3151_v29, %v3121_v24  ;;  %v8858_v31 = vadd.f32 %v3016_v62, %v10427_v46  ;;  %v3019_v37 = vadd.f32 %v6244_v58, %v8852_v33  ;;  %v10428_v24 = vld [vmem:[#allocation86_spill] sm:$0xff]  ;;  %v10429_v62 = vld [vmem:[#allocation92_spill] sm:$0xff] }
 0x5b6   : > { %v2815_v8 = vpop.f32.mrf.mxu1  ;;  %v8870_v27 = vadd.f32 %v3018_v22, %v10428_v24 }
 0x5b7   : > { %v3153_v39 = vadd.f32 %v3152_v43, %v3122_v32  ;;  %v3078_v16 = vadd.f32 %v3077_v49, %v8844_v6  ;;  %v3017_v11 = vadd.f32 %v8828_v15, %v2815_v8  ;;  %v3124_v10 = vmul.f32 %v8858_v31, %v8858_v31  ;;  %v10430_v49 = vld [vmem:[#allocation90_spill] sm:$0xff] }
 0x5b8   : > { %v8876_v6 = vadd.f32 %v3019_v37, %v10430_v49  ;;  %v3126_v22 = vmul.f32 %v8870_v27, %v8870_v27 }
 0x5b9   : > { %v3079_v7 = vadd.f32 %v3078_v16, %v8858_v31  ;;  %v3154_v29 = vadd.f32 %v3153_v39, %v3123_v57  ;;  %v6263_v2 = vpop.f32.mrf.mxu1  ;;  %v8873_v46 = vadd.f32 %v3017_v11, %v10429_v62 }
 0x5ba   : > { %v3022_v57 = vadd.f32 %v6263_v2, %v8749_v34  ;;  %v3127_v24 = vmul.f32 %v8876_v6, %v8876_v6 }
 0x5bb   : > { %v3155_v32 = vadd.f32 %v3154_v29, %v3124_v10  ;;  %v2861_v43 = vpop.f32.mrf.mxu1  ;;  %v3080_v58 = vadd.f32 %v3079_v7, %v8873_v46  ;;  %v3125_v8 = vmul.f32 %v8873_v46, %v8873_v46 }
 0x5bc   : > { %v3020_v16 = vadd.f32 %v8743_v45, %v2861_v43  ;;  %v8895_v2 = vadd.f32 %v3022_v57, %v8666_v44 }
 0x5bd   : > { %v6264_v39 = vpop.f32.mrf.mxu1  ;;  %v3081_v11 = vadd.f32 %v3080_v58, %v8870_v27  ;;  %v3156_v10 = vadd.f32 %v3155_v32, %v3125_v8 }
 0x5be   : > { %v8887_v29 = vadd.f32 %v3020_v16, %v8684_v42  ;;  %v3023_v37 = vadd.f32 %v6264_v39, %v8747_v35  ;;  %v3130_v57 = vmul.f32 %v8895_v2, %v8895_v2 }
 0x5bf   : > { %v2864_v7 = vpop.f32.mrf.mxu1  ;;  %v3082_v45 = vadd.f32 %v3081_v11, %v8876_v6  ;;  %v3157_v62 = vadd.f32 %v3156_v10, %v3126_v22 }
 0x5c0   : > { %v3021_v34 = vadd.f32 %v8745_v47, %v2864_v7  ;;  %v3128_v35 = vmul.f32 %v8887_v29, %v8887_v29  ;;  %v8903_v58 = vadd.f32 %v3023_v37, %v8655_v12 }
 0x5c1   : > { %v6267_v43 = vpop.f32.mrf.mxu1  ;;  %v3083_v49 = vrot.slane %v3082_v45, 4  ;;  %v3158_v32 = vadd.f32 %v3157_v62, %v3127_v24 }
 0x5c2   : > { %v8898_v42 = vadd.f32 %v3021_v34, %v8676_v25  ;;  %v3131_v7 = vmul.f32 %v8903_v58, %v8903_v58  ;;  %v3026_v24 = vadd.f32 %v6267_v43, %v8755_v41 }
 0x5c3   : > { %v2877_v8 = vpop.f32.mrf.mxu1  ;;  %v3084_v16 = vadd.f32 %v3083_v49, %v3082_v45  ;;  %v3159_v39 = vrot.slane %v3158_v32, 4 }
 0x5c4   : > { %10431 = vst [vmem:[#allocation83_spill] sm:$0xff] %v8898_v42  ;;  %v3089_v47 = vadd.f32 %v8898_v42, %v8887_v29  ;;  %v3129_v44 = vmul.f32 %v8898_v42, %v8898_v42  ;;  %v3024_v25 = vadd.f32 %v8751_v36, %v2877_v8  ;;  %v8926_v43 = vadd.f32 %v3026_v24, %v8632_v60 }
 0x5c5   : > { %v6268_v22 = vpop.f32.mrf.mxu1  ;;  %v3085_v11 = vrot.slane %v3084_v16, 2  ;;  %v3160_v10 = vadd.f32 %v3159_v39, %v3158_v32 }
 0x5c6   : > { %v3090_v12 = vadd.f32 %v3089_v47, %v8895_v2  ;;  %v3165_v37 = vadd.f32 %v3129_v44, %v3128_v35  ;;  %v8917_v45 = vadd.f32 %v3024_v25, %v8650_v51  ;;  %v3027_v62 = vadd.f32 %v6268_v22, %v8758_v38 }
 0x5c7   : > { %v2880_v34 = vpop.f32.mrf.mxu1  ;;  %v3086_v49 = vadd.f32 %v3085_v11, %v3084_v16  ;;  %v3161_v42 = vrot.slane %v3160_v10, 2 }
 0x5c8   : > { %v3166_v36 = vadd.f32 %v3165_v37, %v3130_v57  ;;  %v3091_v8 = vadd.f32 %v3090_v12, %v8903_v58  ;;  %v3132_v32 = vmul.f32 %v8917_v45, %v8917_v45  ;;  %v3025_v35 = vadd.f32 %v8753_v50, %v2880_v34 }
 0x5c9   : > { %v6271_v39 = vpop.f32.mrf.mxu1  ;;  %v3087_v47 = vrot.slane %v3086_v49, 1  ;;  %v3162_v44 = vadd.f32 %v3161_v42, %v3160_v10  ;;  %v8929_v38 = vadd.f32 %v3027_v62, %v8620_v3 }
 0x5ca   : > { %v3092_v41 = vadd.f32 %v3091_v8, %v8917_v45  ;;  %v3167_v51 = vadd.f32 %v3166_v36, %v3131_v7  ;;  %v8932_v16 = vadd.f32 %v3025_v35, %v8642_v13  ;;  %v3030_v3 = vadd.f32 %v6271_v39, %v8795_v61 }
 0x5cb   : > { %v2893_v57 = vpop.f32.mrf.mxu1  ;;  %v3088_v25 = vadd.f32 %v3087_v47, %v3086_v49  ;;  %v3163_v22 = vrot.slane %v3162_v44, 1  ;;  %v3134_v13 = vmul.f32 %v8926_v43, %v8926_v43  ;;  %v3135_v36 = vmul.f32 %v8929_v38, %v8929_v38 }
 0x5cc   : > { %v3168_v11 = vadd.f32 %v3167_v51, %v3132_v32  ;;  %v3028_v50 = vadd.f32 %v8766_v20, %v2893_v57  ;;  %v3093_v42 = vadd.f32 %v3092_v41, %v8932_v16  ;;  %v3133_v10 = vmul.f32 %v8932_v16, %v8932_v16 }
 0x5cd   : > { %v6272_v12 = vpop.f32.mrf.mxu1  ;;  %v8938_v60 = vmul.f32 0.0078125, %v3088_v25  ;;  %v3164_v37 = vadd.f32 %v3163_v22, %v3162_v44 }
 0x5ce   : > { %v3094_v7 = vadd.f32 %v3093_v42, %v8926_v43  ;;  %v3169_v24 = vadd.f32 %v3168_v11, %v3133_v10  ;;  %v8945_v62 = vadd.f32 %v3028_v50, %v8612_v56  ;;  %v3031_v32 = vadd.f32 %v6272_v12, %v8803_v5 }
 0x5cf   : > { %v2896_v20 = vpop.f32.mrf.mxu1  ;;  %v3186_v34 = vmul.f32 0.0078125, %v3164_v37  ;;  %v3188_v49 = vmul.f32 %v8938_v60, %v8938_v60  ;;  %v8955_v56 = vadd.f32 %v3030_v3, %v8591_v14 }
 0x5d0   : > { %v3170_v8 = vadd.f32 %v3169_v24, %v3134_v13  ;;  %v3095_v61 = vadd.f32 %v3094_v7, %v8929_v38  ;;  %v3029_v35 = vadd.f32 %v8777_v4, %v2896_v20  ;;  %v3136_v41 = vmul.f32 %v8945_v62, %v8945_v62 }
 0x5d1   : > { %v6275_v39 = vpop.f32.mrf.mxu1  ;;  %v3190_v47 = vsub.f32 %v3186_v34, %v3188_v49  ;;  %v8965_v4 = vadd.f32 %v3031_v32, %v8583_v21  ;;  %v3138_v12 = vmul.f32 %v8955_v56, %v8955_v56 }
 0x5d2   : > { %v3096_v44 = vadd.f32 %v3095_v61, %v8945_v62  ;;  %v3171_v51 = vadd.f32 %v3170_v8, %v3135_v36  ;;  %v8961_v57 = vadd.f32 %v3029_v35, %v8601_v40  ;;  %v3034_v3 = vadd.f32 %v6275_v39, %v8846_v9 }
 0x5d3   : > { %v2909_v25 = vpop.f32.mrf.mxu1  ;;  %v3192_v22 = vmax.f32 %v3190_v47, 0.0  ;;  %v3139_v7 = vmul.f32 %v8965_v4, %v8965_v4 }
 0x5d4   : > { %v3032_v5 = vadd.f32 %v8819_v55, %v2909_v25  ;;  %v3172_v11 = vadd.f32 %v3171_v51, %v3136_v41  ;;  %v3097_v14 = vadd.f32 %v3096_v44, %v8961_v57  ;;  %v3137_v50 = vmul.f32 %v8961_v57, %v8961_v57  ;;  %v10433_v41 = vld [vmem:[#allocation35_spill] sm:$0xff]  ;;  %v10434_v25 = vld [vmem:[#allocation36_spill] sm:$0xff] }
 0x5d5   : > { %v6276_v42 = vpop.f32.mrf.mxu1  ;;  %v3226_v10 = vadd.f32 0.001, %v3192_v22  ;;  %v8989_v9 = vadd.f32 %v3034_v3, %v8580_v54 }
 0x5d6   : > { %v3098_v40 = vadd.f32 %v3097_v14, %v8955_v56  ;;  %v3173_v37 = vadd.f32 %v3172_v11, %v3137_v50  ;;  %v8975_v55 = vadd.f32 %v3032_v5, %v8588_v53  ;;  %v3035_v34 = vadd.f32 %v6276_v42, %v8852_v33  ;;  %v970_v53 = vld [vmem:[%s10432_s9] sm:$0x3] }
 0x5d7   : > { %v2912_v21 = vpop.f32.mrf.mxu1  ;;  %6822 = vrsqrt.f32 %v3226_v10  ;;  %v8997_v33 = vld [vmem:[%s10181_s14] ss:$0 sm:$0xff]  ;;  %v9009_v51 = vrot.slane %v970_v53, %v10433_v41  ;;  %v9012_v22 = vrot.slane %v970_v53, %v10434_v25  ;;  %v3142_v11 = vmul.f32 %v8989_v9, %v8989_v9 }
 0x5d8   : > { %v3033_v13 = vadd.f32 %v8828_v15, %v2912_v21  ;;  %v3174_v24 = vadd.f32 %v3173_v37, %v3138_v12  ;;  %v3099_v20 = vadd.f32 %v3098_v40, %v8965_v4  ;;  %v3140_v8 = vmul.f32 %v8975_v55, %v8975_v55 }
 0x5d9   : > { %v6343_v49 = vpop.f32.mrf.mxu1  ;;  %v9005_v39 = vadd.f32 %v3035_v34, %v8596_v18  ;;  %v3194_v42 = vsub.f32 %v8763_v0, %v8938_v60  ;;  %v3195_v40 = vsub.f32 %v8772_v23, %v8938_v60  ;;  %v3196_v37 = vsub.f32 %v8769_v28, %v8938_v60 }
 0x5da   : > { %v8983_v36 = vadd.f32 %v3033_v13, %v8607_v19  ;;  %v3100_v15 = vadd.f32 %v3099_v20, %v8975_v55  ;;  %v3175_v61 = vadd.f32 %v3174_v24, %v3139_v7  ;;  %v3197_v0 = vsub.f32 %v8775_v52, %v8938_v60 }
 0x5db   : > { %v3823_v19 = vpop.f32.mrf.mxu1  ;;  %v3143_v3 = vmul.f32 %v9005_v39, %v9005_v39  ;;  %v3198_v23 = vsub.f32 %v8791_v63, %v8938_v60  ;;  %v3199_v28 = vsub.f32 %v8809_v26, %v8938_v60  ;;  %v9046_v53 = vadd.f32 %v6343_v49, %v8997_v33 }
 0x5dc   : > { %v3141_v32 = vmul.f32 %v8983_v36, %v8983_v36  ;;  %v9002_v35 = vadd.f32 %v8997_v33, %v3823_v19  ;;  %v3176_v54 = vadd.f32 %v3175_v61, %v3140_v8  ;;  %v3101_v47 = vadd.f32 %v3100_v15, %v8983_v36  ;;  %v10435_v61 = vld [vmem:[#allocation37_spill] sm:$0xff] }
 0x5dd   : > { %v6344_v44 = vpop.f32.mrf.mxu1 }
 0x5de   : > { %3908 = vmax.xlane.f32.xlu1 %v9002_v35  ;;  %v3102_v18 = vadd.f32 %v3101_v47, %v8989_v9  ;;  %v3177_v14 = vadd.f32 %v3176_v54, %v3141_v32  ;;  %v9023_v10 = vadd.f32 %v6344_v44, %v8997_v33 }
 0x5df   : > { %v3826_v50 = vpop.f32.mrf.mxu1 }
 0x5e0   : > { %v9026_v12 = vadd.f32 %v8997_v33, %v3826_v50  ;;  %v3103_v21 = vadd.f32 %v3102_v18, %v9005_v39  ;;  %v3178_v13 = vadd.f32 %v3177_v14, %v3142_v11 }
 0x5e1   : > { %v6347_v7 = vpop.f32.mrf.mxu1 }
 0x5e2   : > { %3914 = vmax.xlane.f32.xlu1 %v9023_v10  ;;  %3910 = vmax.xlane.f32.xlu0 %v9026_v12  ;;  %v3104_v20 = vrot.slane %v3103_v21, 4  ;;  %v3179_v34 = vadd.f32 %v3178_v13, %v3143_v3  ;;  %v9065_v18 = vadd.f32 %v6347_v7, %v8997_v33 }
 0x5e3   : > { %v3839_v15 = vpop.f32.mrf.mxu1 }
 0x5e4   : > { %v9058_v32 = vpop.eup %6822  ;;  %v3105_v49 = vadd.f32 %v3104_v20, %v3103_v21  ;;  %v3180_v54 = vrot.slane %v3179_v34, 4  ;;  %v9075_v11 = vadd.f32 %v8997_v33, %v3839_v15 }
 0x5e5   : > { %v6348_v47 = vpop.f32.mrf.mxu1  ;;  %v3230_v14 = vmul.f32 %v9058_v32, %v3194_v42  ;;  %v3231_v50 = vmul.f32 %v9058_v32, %v3195_v40  ;;  %v3232_v44 = vmul.f32 %v9058_v32, %v3196_v37  ;;  %v3233_v19 = vmul.f32 %v9058_v32, %v3197_v0 }
 0x5e6   : > { %3912 = vmax.xlane.f32.xlu0 %v9046_v53  ;;  %v3106_v21 = vrot.slane %v3105_v49, 2  ;;  %v3181_v13 = vadd.f32 %v3180_v54, %v3179_v34  ;;  %v3234_v15 = vmul.f32 %v9058_v32, %v3198_v23  ;;  %v3235_v5 = vmul.f32 %v9058_v32, %v3199_v28 }
 0x5e7   : > { %v3842_v20 = vpop.f32.mrf.mxu1  ;;  %v3266_v42 = vmul.f32 %v9009_v51, %v3230_v14  ;;  %v3267_v40 = vmul.f32 %v9009_v51, %v3231_v50  ;;  %v3268_v34 = vmul.f32 %v9009_v51, %v3232_v44  ;;  %v3269_v54 = vmul.f32 %v9009_v51, %v3233_v19 }
 0x5e8   : > { %v9078_v7 = vadd.f32 %v8997_v33, %v3842_v20  ;;  %v3107_v26 = vadd.f32 %v3106_v21, %v3105_v49  ;;  %v3182_v63 = vrot.slane %v3181_v13, 2  ;;  %v9092_v44 = vadd.f32 %v6348_v47, %v8997_v33 }
 0x5e9   : > { %v6351_v3 = vpop.f32.mrf.mxu1  ;;  %v3302_v37 = vadd.f32 %v9012_v22, %v3266_v42  ;;  %v3303_v0 = vadd.f32 %v9012_v22, %v3267_v40  ;;  %v3304_v49 = vadd.f32 %v9012_v22, %v3268_v34  ;;  %v3305_v21 = vadd.f32 %v9012_v22, %v3269_v54 }
 0x5ea   : > { %3916 = vmax.xlane.f32.xlu0 %v9075_v11  ;;  %3918 = vmax.xlane.f32.xlu1 %v9078_v7  ;;  %v3108_v14 = vrot.slane %v3107_v26, 1  ;;  %v3183_v20 = vadd.f32 %v3182_v63, %v3181_v13  ;;  %v3270_v47 = vmul.f32 %v9009_v51, %v3234_v15 }
 0x5eb   : > { %v3855_v50 = vpop.f32.mrf.mxu1  ;;  %v3334_v19 = vmax.f32 %v3302_v37, 0.0  ;;  %v3335_v8 = vmax.f32 %v3303_v0, 0.0  ;;  %v3336_v40 = vmax.f32 %v3304_v49, 0.0  ;;  %v3337_v25 = vmax.f32 %v3305_v21, 0.0 }
 0x5ec   : > { %v3109_v52 = vadd.f32 %v3108_v14, %v3107_v26  ;;  %v3184_v42 = vrot.slane %v3183_v20, 1  ;;  %v9096_v23 = vadd.f32 %v8997_v33, %v3855_v50  ;;  %v3271_v26 = vmul.f32 %v9009_v51, %v3235_v5 }
 0x5ed   : > { %v6352_v24 = vpop.f32.mrf.mxu1  ;;  %v3366_v63 = vpack.c.bf16 %v3335_v8, %v3334_v19  ;;  %v3367_v28 = vpack.c.bf16 %v3337_v25, %v3336_v40  ;;  %v3306_v0 = vadd.f32 %v9012_v22, %v3270_v47  ;;  %v10436_v14 = vsub.f32 %v8801_v17, %v8938_v60 }
 0x5ee   : > { %3920 = vmax.xlane.f32.xlu0 %v9065_v18  ;;  %3922 = vmax.xlane.f32.xlu1 %v9092_v44  ;;  %v9101_v13 = vmul.f32 0.0078125, %v3109_v52  ;;  %v3185_v34 = vadd.f32 %v3184_v42, %v3183_v20  ;;  %v10437_v52 = vsub.f32 %v8812_v48, %v8938_v60  ;;  %v10438_v25 = vsub.f32 %v8873_v46, %v8938_v60 }
 0x5ef   : > { %v3858_v54 = vpop.f32.mrf.mxu1  ;;  %6293 = vmatprep.mubr.bf16.mxu0 %v3366_v63  ;;  %v3236_v8 = vmul.f32 %v9058_v32, %v10436_v14  ;;  %v3307_v17 = vadd.f32 %v9012_v22, %v3271_v26  ;;  %v9124_v21 = vadd.f32 %v6351_v3, %v8997_v33  ;;  %v3338_v48 = vmax.f32 %v3306_v0, 0.0 }
 0x5f0   : > { %v9105_v37 = vadd.f32 %v8997_v33, %v3858_v54  ;;  %v3237_v15 = vmul.f32 %v9058_v32, %v10437_v52  ;;  %v3243_v5 = vmul.f32 %v9058_v32, %v10438_v25  ;;  %v3187_v20 = vmul.f32 0.0078125, %v3185_v34  ;;  %6294 = vmatmul.mubr.bf16.vlgmr.msra.gmra.mxu0 %v3367_v28 }
 0x5f1   : > { %v3189_v50 = vmul.f32 %v9101_v13, %v9101_v13  ;;  %v6355_v49 = vpop.f32.mrf.mxu1  ;;  %v3272_v46 = vmul.f32 %v9009_v51, %v3236_v8  ;;  %v3339_v40 = vmax.f32 %v3307_v17, 0.0  ;;  %v10439_v47 = vsub.f32 %v8825_v1, %v8938_v60 }
 0x5f2   : > { %3924 = vmax.xlane.f32.xlu0 %v9096_v23  ;;  %3926 = vmax.xlane.f32.xlu1 %v9105_v37  ;;  %v3273_v19 = vmul.f32 %v9009_v51, %v3237_v15  ;;  %v10440_v3 = vsub.f32 %v8841_v59, %v8938_v60  ;;  %v9139_v28 = vadd.f32 %v6352_v24, %v8997_v33 }
 0x5f3   : > { %v3191_v42 = vsub.f32 %v3187_v20, %v3189_v50  ;;  %v3871_v63 = vpop.f32.mrf.mxu1  ;;  %v3238_v34 = vmul.f32 %v9058_v32, %v10439_v47  ;;  %v3308_v26 = vadd.f32 %v9012_v22, %v3272_v46  ;;  %v10441_v14 = vsub.f32 %v8835_v30, %v8938_v60 }
 0x5f4   : > { %v3239_v54 = vmul.f32 %v9058_v32, %v10440_v3  ;;  %v3309_v0 = vadd.f32 %v9012_v22, %v3273_v19  ;;  %v3368_v52 = vpack.c.bf16 %v3339_v40, %v3338_v48  ;;  %v9150_v20 = vadd.f32 %v8997_v33, %v3871_v63 }
 0x5f5   : > { %v3240_v8 = vmul.f32 %v9058_v32, %v10441_v14  ;;  %v3193_v1 = vmax.f32 %v3191_v42, 0.0  ;;  %v6356_v15 = vpop.f32.mrf.mxu1  ;;  %v3274_v25 = vmul.f32 %v9009_v51, %v3238_v34  ;;  %v3340_v24 = vmax.f32 %v3308_v26, 0.0 }
 0x5f6   : > { %v3275_v59 = vmul.f32 %v9009_v51, %v3239_v54  ;;  %3928 = vmax.xlane.f32.xlu0 %v9124_v21  ;;  %3930 = vmax.xlane.f32.xlu1 %v9139_v28  ;;  %v3341_v50 = vmax.f32 %v3309_v0, 0.0  ;;  %v10442_v30 = vsub.f32 %v10435_v61, %v8938_v60  ;;  %v10443_v61 = vsub.f32 %v8858_v31, %v8938_v60 }
 0x5f7   : > { %v3227_v48 = vadd.f32 0.001, %v3193_v1  ;;  %6297 = vmatprep.mubr.bf16.mxu0 %v3368_v52  ;;  %v3874_v46 = vpop.f32.mrf.mxu1  ;;  %v3310_v19 = vadd.f32 %v9012_v22, %v3274_v25  ;;  %v3276_v40 = vmul.f32 %v9009_v51, %v3240_v8  ;;  %v3279_v1 = vmul.f32 %v9009_v51, %v3243_v5 }
 0x5f8   : > { %v3241_v17 = vmul.f32 %v9058_v32, %v10442_v30  ;;  %v3311_v42 = vadd.f32 %v9012_v22, %v3275_v59  ;;  %v9162_v63 = vadd.f32 %v8997_v33, %v3874_v46  ;;  %v3369_v47 = vpack.c.bf16 %v3341_v50, %v3340_v24 }
 0x5f9   : > { %v3242_v3 = vmul.f32 %v9058_v32, %v10443_v61  ;;  %6824 = vrsqrt.f32 %v3227_v48  ;;  %v3342_v54 = vmax.f32 %v3310_v19, 0.0  ;;  %v3312_v0 = vadd.f32 %v9012_v22, %v3276_v40  ;;  %v10446_v61 = vld [vmem:[#allocation83_spill] sm:$0xff] }
 0x5fa   : > { %v3277_v34 = vmul.f32 %v9009_v51, %v3241_v17  ;;  %v3343_v26 = vmax.f32 %v3311_v42, 0.0  ;;  %6298 = vmatmul.mubr.bf16.gmra.mxu0 %v3369_v47  ;;  %3932 = vmax.xlane.f32.xlu0 %v9150_v20  ;;  %v9175_v52 = vadd.f32 %v6355_v49, %v8997_v33  ;;  %v10444_v25 = vsub.f32 %v8870_v27, %v8938_v60 }
 0x5fb   : > { %v3278_v8 = vmul.f32 %v9009_v51, %v3242_v3  ;;  %3934 = vmax.xlane.f32.xlu1 %v9162_v63  ;;  %v10445_v24 = vsub.f32 %v8876_v6, %v8938_v60  ;;  %v3344_v30 = vmax.f32 %v3312_v0, 0.0  ;;  %v3315_v49 = vadd.f32 %v9012_v22, %v3279_v1 }
 0x5fc   : > { %v3313_v14 = vadd.f32 %v9012_v22, %v3277_v34  ;;  %v3370_v31 = vpack.c.bf16 %v3343_v26, %v3342_v54  ;;  %v3244_v59 = vmul.f32 %v9058_v32, %v10444_v25  ;;  %v9189_v48 = vadd.f32 %v6356_v15, %v8997_v33 }
 0x5fd   : > { %v3245_v50 = vmul.f32 %v9058_v32, %v10445_v24  ;;  %v3314_v5 = vadd.f32 %v9012_v22, %v3278_v8  ;;  %v3347_v6 = vmax.f32 %v3315_v49, 0.0  ;;  %v3223_v47 = vsub.f32 %v8983_v36, %v9101_v13 }
 0x5fe   : > { %v3345_v17 = vmax.f32 %v3313_v14, 0.0  ;;  %6301 = vmatprep.mubr.bf16.mxu0 %v3370_v31  ;;  %v3280_v46 = vmul.f32 %v9009_v51, %v3244_v59  ;;  %3936 = vmax.xlane.f32.xlu0 %v9175_v52  ;;  %v3210_v34 = vsub.f32 %v8887_v29, %v9101_v13  ;;  %v3211_v3 = vsub.f32 %v10446_v61, %v9101_v13 }
 0x5ff   : > { %v3281_v27 = vmul.f32 %v9009_v51, %v3245_v50  ;;  %v3346_v19 = vmax.f32 %v3314_v5, 0.0  ;;  %3938 = vmax.xlane.f32.xlu1 %v9189_v48  ;;  %v3212_v54 = vsub.f32 %v8895_v2, %v9101_v13  ;;  %v3213_v26 = vsub.f32 %v8903_v58, %v9101_v13 }
 0x600   : > { %v3316_v60 = vadd.f32 %v9012_v22, %v3280_v46  ;;  %v3371_v42 = vpack.c.bf16 %v3345_v17, %v3344_v30  ;;  %v3214_v0 = vsub.f32 %v8917_v45, %v9101_v13  ;;  %v3215_v14 = vsub.f32 %v8932_v16, %v9101_v13 }
 0x601   : > { %v3317_v32 = vadd.f32 %v9012_v22, %v3281_v27  ;;  %v3372_v40 = vpack.c.bf16 %v3347_v6, %v3346_v19  ;;  %v3216_v36 = vsub.f32 %v8926_v43, %v9101_v13  ;;  %v3217_v29 = vsub.f32 %v8929_v38, %v9101_v13 }
 0x602   : > { %6302 = vmatmul.mubr.bf16.gmra.mxu0 %v3371_v42  ;;  %v3348_v33 = vmax.f32 %v3316_v60, 0.0  ;;  %v3218_v2 = vsub.f32 %v8945_v62, %v9101_v13  ;;  %v3219_v58 = vsub.f32 %v8961_v57, %v9101_v13  ;;  %v3220_v45 = vsub.f32 %v8955_v56, %v9101_v13 }
 0x603   : > { %6305 = vmatprep.mubr.bf16.mxu0 %v3372_v40  ;;  %v3349_v15 = vmax.f32 %v3317_v32, 0.0  ;;  %v3221_v40 = vsub.f32 %v8965_v4, %v9101_v13  ;;  %v3222_v61 = vsub.f32 %v8975_v55, %v9101_v13 }
 0x605   : > { %v3373_v1 = vpack.c.bf16 %v3349_v15, %v3348_v33 }
 0x606   : > { %v9213_v8 = vpop.eup %6824 }
 0x607   : > { %v3246_v16 = vmul.f32 %v9213_v8, %v3210_v34  ;;  %v3247_v31 = vmul.f32 %v9213_v8, %v3211_v3  ;;  %v3248_v43 = vmul.f32 %v9213_v8, %v3212_v54  ;;  %v3249_v25 = vmul.f32 %v9213_v8, %v3213_v26 }
 0x608   : > { %v3250_v38 = vmul.f32 %v9213_v8, %v3214_v0  ;;  %v3251_v59 = vmul.f32 %v9213_v8, %v3215_v14  ;;  %v3252_v62 = vmul.f32 %v9213_v8, %v3216_v36  ;;  %v3253_v50 = vmul.f32 %v9213_v8, %v3217_v29 }
 0x609   : > { %v3282_v57 = vmul.f32 %v9009_v51, %v3246_v16  ;;  %v3283_v24 = vmul.f32 %v9009_v51, %v3247_v31  ;;  %v3284_v56 = vmul.f32 %v9009_v51, %v3248_v43  ;;  %v3285_v30 = vmul.f32 %v9009_v51, %v3249_v25 }
 0x60a   : > { %6306 = vmatmul.mubr.bf16.gmra.mxu0 %v3373_v1  ;;  %v3286_v17 = vmul.f32 %v9009_v51, %v3250_v38  ;;  %v3287_v5 = vmul.f32 %v9009_v51, %v3251_v59  ;;  %v3288_v49 = vmul.f32 %v9009_v51, %v3252_v62  ;;  %v3289_v6 = vmul.f32 %v9009_v51, %v3253_v50 }
 0x60b   : > { %v3318_v46 = vadd.f32 %v9012_v22, %v3282_v57  ;;  %v3319_v27 = vadd.f32 %v9012_v22, %v3283_v24  ;;  %v3320_v19 = vadd.f32 %v9012_v22, %v3284_v56  ;;  %v3321_v60 = vadd.f32 %v9012_v22, %v3285_v30 }
 0x60c   : > { %v3322_v32 = vadd.f32 %v9012_v22, %v3286_v17  ;;  %v3323_v42 = vadd.f32 %v9012_v22, %v3287_v5  ;;  %v3324_v0 = vadd.f32 %v9012_v22, %v3288_v49  ;;  %v3325_v36 = vadd.f32 %v9012_v22, %v3289_v6 }
 0x60d   : > { %v3350_v33 = vmax.f32 %v3318_v46, 0.0  ;;  %v3351_v15 = vmax.f32 %v3319_v27, 0.0  ;;  %v3352_v34 = vmax.f32 %v3320_v19, 0.0  ;;  %v3353_v3 = vmax.f32 %v3321_v60, 0.0 }
 0x60e   : > { %v3354_v54 = vmax.f32 %v3322_v32, 0.0  ;;  %v3355_v26 = vmax.f32 %v3323_v42, 0.0  ;;  %v3254_v29 = vmul.f32 %v9213_v8, %v3218_v2  ;;  %v3255_v1 = vmul.f32 %v9213_v8, %v3219_v58 }
 0x60f   : > { %v3374_v14 = vpack.c.bf16 %v3351_v15, %v3350_v33  ;;  %v3259_v4 = vmul.f32 %v9213_v8, %v3223_v47  ;;  %v3375_v16 = vpack.c.bf16 %v3353_v3, %v3352_v34  ;;  %v3256_v31 = vmul.f32 %v9213_v8, %v3220_v45 }
 0x610   : > { %v3257_v43 = vmul.f32 %v9213_v8, %v3221_v40  ;;  %v3376_v55 = vpack.c.bf16 %v3355_v26, %v3354_v54  ;;  %v3290_v25 = vmul.f32 %v9009_v51, %v3254_v29  ;;  %v3291_v38 = vmul.f32 %v9009_v51, %v3255_v1 }
 0x611   : > { %6309 = vmatprep.mubr.bf16.mxu0 %v3374_v14  ;;  %v3258_v59 = vmul.f32 %v9213_v8, %v3222_v61  ;;  %v3356_v2 = vmax.f32 %v3324_v0, 0.0  ;;  %v3357_v62 = vmax.f32 %v3325_v36, 0.0  ;;  %v3292_v45 = vmul.f32 %v9009_v51, %v3256_v31 }
 0x612   : > { %6310 = vmatmul.mubr.bf16.gmra.mxu0 %v3375_v16  ;;  %v3326_v58 = vadd.f32 %v9012_v22, %v3290_v25  ;;  %v3327_v47 = vadd.f32 %v9012_v22, %v3291_v38  ;;  %v3293_v57 = vmul.f32 %v9009_v51, %v3257_v43  ;;  %v3295_v30 = vmul.f32 %v9009_v51, %v3259_v4 }
 0x613   : > { %6313 = vmatprep.mubr.bf16.mxu0 %v3376_v55  ;;  %v3294_v50 = vmul.f32 %v9009_v51, %v3258_v59  ;;  %v3224_v17 = vsub.f32 %v8989_v9, %v9101_v13  ;;  %v3225_v5 = vsub.f32 %v9005_v39, %v9101_v13  ;;  %v3377_v49 = vpack.c.bf16 %v3357_v62, %v3356_v2 }
 0x614   : > { %v3358_v24 = vmax.f32 %v3326_v58, 0.0  ;;  %v3359_v56 = vmax.f32 %v3327_v47, 0.0  ;;  %v3328_v46 = vadd.f32 %v9012_v22, %v3292_v45  ;;  %v3329_v27 = vadd.f32 %v9012_v22, %v3293_v57 }
 0x615   : > { %v3260_v19 = vmul.f32 %v9213_v8, %v3224_v17  ;;  %v3261_v6 = vmul.f32 %v9213_v8, %v3225_v5  ;;  %v3330_v32 = vadd.f32 %v9012_v22, %v3294_v50  ;;  %v3331_v42 = vadd.f32 %v9012_v22, %v3295_v30 }
 0x616   : > { %v3378_v60 = vpack.c.bf16 %v3359_v56, %v3358_v24  ;;  %v3360_v9 = vmax.f32 %v3328_v46, 0.0  ;;  %v3361_v40 = vmax.f32 %v3329_v27, 0.0 }
 0x617   : > { %v3296_v39 = vmul.f32 %v9009_v51, %v3260_v19  ;;  %v3297_v13 = vmul.f32 %v9009_v51, %v3261_v6  ;;  %v3362_v33 = vmax.f32 %v3330_v32, 0.0  ;;  %v3363_v15 = vmax.f32 %v3331_v42, 0.0 }
 0x618   : > { %v3379_v34 = vpack.c.bf16 %v3361_v40, %v3360_v9 }
 0x619   : > { %v3332_v61 = vadd.f32 %v9012_v22, %v3296_v39  ;;  %v3333_v8 = vadd.f32 %v9012_v22, %v3297_v13  ;;  %v3380_v3 = vpack.c.bf16 %v3363_v15, %v3362_v33 }
 0x61a   : > { %6314 = vmatmul.mubr.bf16.gmra.mxu0 %v3377_v49 }
 0x61b   : > { %6317 = vmatprep.mubr.bf16.mxu0 %v3378_v60  ;;  %v3364_v54 = vmax.f32 %v3332_v61, 0.0  ;;  %v3365_v26 = vmax.f32 %v3333_v8, 0.0 }
 0x61d   : > { %v3381_v0 = vpack.c.bf16 %v3365_v26, %v3364_v54 }
 0x622   : > { %6318 = vmatmul.mubr.bf16.gmra.mxu0 %v3379_v34 }
 0x623   : > { %6321 = vmatprep.mubr.bf16.mxu0 %v3380_v3 }
 0x62a   : > { %6322 = vmatmul.mubr.bf16.gmra.mxu0 %v3381_v0 }
 0x667   : > { %v3909_v14 = vpop.xlane.xlu1 %3908 }
 0x668   : > { %v3940_v36 = vsub.f32 %v9002_v35, %v3909_v14 }
 0x66a   : > { %v3956_v29 = vmul.f32 1.442695, %v3940_v36  ;;  %v9346_v36 = vld [vmem:[%s10178_s11] ss:$0 sm:$0xff] }
 0x66b   : > { %v3911_v1 = vpop.xlane.xlu0 %3910  ;;  %v3915_v51 = vpop.xlane.xlu1 %3914 }
 0x66c   : > { %6826 = vpow2.f32 %v3956_v29  ;;  %v3941_v4 = vsub.f32 %v9026_v12, %v3911_v1  ;;  %v3943_v16 = vsub.f32 %v9023_v10, %v3915_v51 }
 0x66e   : > { %v3958_v31 = vmul.f32 1.442695, %v3941_v4  ;;  %v3962_v22 = vmul.f32 1.442695, %v3943_v16  ;;  %v9352_v4 = vld [vmem:[%s10182_s15] ss:$0 sm:$0xff] }
 0x66f   : > { %v3913_v43 = vpop.xlane.xlu0 %3912  ;;  %v10447_v16 = vld [vmem:[#allocation51_spill] sm:$0xff] }
 0x670   : > { %6828 = vpow2.f32 %v3958_v31  ;;  %v3942_v55 = vsub.f32 %v9046_v53, %v3913_v43 }
 0x671   : > { %6830 = vpow2.f32 %v3962_v22 }
 0x672   : > { %v3960_v25 = vmul.f32 1.442695, %v3942_v55  ;;  %v10448_v55 = vld [vmem:[#allocation52_spill] sm:$0xff] }
 0x673   : > { %v3917_v38 = vpop.xlane.xlu0 %3916  ;;  %v3919_v59 = vpop.xlane.xlu1 %3918 }
 0x674   : > { %6832 = vpow2.f32 %v3960_v25  ;;  %v3944_v35 = vsub.f32 %v9075_v11, %v3917_v38  ;;  %v3945_v2 = vsub.f32 %v9078_v7, %v3919_v59 }
 0x676   : > { %v3964_v62 = vmul.f32 1.442695, %v3944_v35  ;;  %v3966_v58 = vmul.f32 1.442695, %v3945_v2  ;;  %v10449_v2 = vld [vmem:[#allocation53_spill] sm:$0xff] }
 0x677   : > { %v3921_v12 = vpop.xlane.xlu0 %3920  ;;  %v3923_v47 = vpop.xlane.xlu1 %3922 }
 0x678   : > { %6834 = vpow2.f32 %v3964_v62  ;;  %v3946_v10 = vsub.f32 %v9065_v18, %v3921_v12  ;;  %v3947_v45 = vsub.f32 %v9092_v44, %v3923_v47  ;;  %v10450_v12 = vld [vmem:[#allocation54_spill] sm:$0xff] }
 0x679   : > { %v9287_v57 = vpop.eup %6826  ;;  %6836 = vpow2.f32 %v3966_v58 }
 0x67a   : > { %v3968_v53 = vmul.f32 1.442695, %v3946_v10  ;;  %v3970_v24 = vmul.f32 1.442695, %v3947_v45  ;;  %3988 = vadd.xlane.f32.xlu0 %v9287_v57 }
 0x67b   : > { %v3925_v56 = vpop.xlane.xlu0 %3924  ;;  %v3927_v11 = vpop.xlane.xlu1 %3926 }
 0x67c   : > { %6838 = vpow2.f32 %v3968_v53  ;;  %v3948_v7 = vsub.f32 %v9096_v23, %v3925_v56  ;;  %v3949_v50 = vsub.f32 %v9105_v37, %v3927_v11  ;;  %v10451_v11 = vld [vmem:[#allocation55_spill] sm:$0xff] }
 0x67d   : > { %v9292_v30 = vpop.eup %6828  ;;  %6840 = vpow2.f32 %v3970_v24 }
 0x67e   : > { %v3972_v18 = vmul.f32 1.442695, %v3948_v7  ;;  %v3974_v17 = vmul.f32 1.442695, %v3949_v50  ;;  %3990 = vadd.xlane.f32.xlu1 %v9292_v30  ;;  %v9295_v49 = vpop.eup %6830 }
 0x67f   : > { %v3929_v44 = vpop.xlane.xlu0 %3928  ;;  %v3931_v5 = vpop.xlane.xlu1 %3930 }
 0x680   : > { %6842 = vpow2.f32 %v3972_v18  ;;  %v3950_v46 = vsub.f32 %v9124_v21, %v3929_v44  ;;  %v3951_v27 = vsub.f32 %v9139_v28, %v3931_v5  ;;  %v10452_v44 = vld [vmem:[#allocation56_spill] sm:$0xff] }
 0x681   : > { %v9299_v19 = vpop.eup %6832  ;;  %6844 = vpow2.f32 %v3974_v17 }
 0x682   : > { %v3976_v23 = vmul.f32 1.442695, %v3950_v46  ;;  %v3978_v37 = vmul.f32 1.442695, %v3951_v27  ;;  %3992 = vadd.xlane.f32.xlu0 %v9299_v19  ;;  %3994 = vadd.xlane.f32.xlu1 %v9295_v49 }
 0x683   : > { %v3933_v6 = vpop.xlane.xlu0 %3932 }
 0x684   : > { %6846 = vpow2.f32 %v3976_v23  ;;  %v3952_v60 = vsub.f32 %v9150_v20, %v3933_v6  ;;  %v3935_v32 = vpop.xlane.xlu1 %3934 }
 0x685   : > { %v9304_v42 = vpop.eup %6834  ;;  %6848 = vpow2.f32 %v3978_v37  ;;  %v3953_v21 = vsub.f32 %v9162_v63, %v3935_v32  ;;  %v10453_v37 = vld [vmem:[#allocation57_spill] sm:$0xff] }
 0x686   : > { %v9307_v28 = vpop.eup %6836  ;;  %v3980_v9 = vmul.f32 1.442695, %v3952_v60  ;;  %3996 = vadd.xlane.f32.xlu0 %v9304_v42 }
 0x687   : > { %v3982_v40 = vmul.f32 1.442695, %v3953_v21  ;;  %3998 = vadd.xlane.f32.xlu1 %v9307_v28  ;;  %v3937_v39 = vpop.xlane.xlu0 %3936  ;;  %v10454_v21 = vld [vmem:[#allocation58_spill] sm:$0xff] }
 0x688   : > { %6850 = vpow2.f32 %v3980_v9  ;;  %v3954_v13 = vsub.f32 %v9175_v52, %v3937_v39  ;;  %v3939_v33 = vpop.xlane.xlu1 %3938 }
 0x689   : > { %v9312_v20 = vpop.eup %6838  ;;  %6852 = vpow2.f32 %v3982_v40  ;;  %v3955_v15 = vsub.f32 %v9189_v48, %v3939_v33 }
 0x68a   : > { %v9315_v34 = vpop.eup %6840  ;;  %v3984_v63 = vmul.f32 1.442695, %v3954_v13  ;;  %4000 = vadd.xlane.f32.xlu0 %v9312_v20 }
 0x68b   : > { %v3986_v61 = vmul.f32 1.442695, %v3955_v15  ;;  %4002 = vadd.xlane.f32.xlu1 %v9315_v34  ;;  %v10455_v15 = vld [vmem:[#allocation59_spill] sm:$0xff] }
 0x68c   : > { %6854 = vpow2.f32 %v3984_v63 }
 0x68d   : > { %v9319_v8 = vpop.eup %6842  ;;  %6856 = vpow2.f32 %v3986_v61 }
 0x68e   : > { %v9321_v3 = vpop.eup %6844  ;;  %4004 = vadd.xlane.f32.xlu0 %v9319_v8 }
 0x68f   : > { %4006 = vadd.xlane.f32.xlu1 %v9321_v3 }
 0x691   : > { %v9325_v52 = vpop.eup %6846 }
 0x692   : > { %v9327_v48 = vpop.eup %6848  ;;  %4008 = vadd.xlane.f32.xlu0 %v9325_v52 }
 0x693   : > { %4010 = vadd.xlane.f32.xlu1 %v9327_v48 }
 0x695   : > { %v9331_v54 = vpop.eup %6850 }
 0x696   : > { %v9333_v26 = vpop.eup %6852  ;;  %4012 = vadd.xlane.f32.xlu0 %v9331_v54 }
 0x697   : > { %4014 = vadd.xlane.f32.xlu1 %v9333_v26 }
 0x699   : > { %v9337_v0 = vpop.eup %6854 }
 0x69a   : > { %v9339_v14 = vpop.eup %6856  ;;  %4016 = vadd.xlane.f32.xlu0 %v9337_v0 }
 0x69b   : > { %4018 = vadd.xlane.f32.xlu1 %v9339_v14 }
 0x6b0   : > { %v6295_v29 = vpop.f32.mrf.mxu0 }
 0x6b1   : > { %v3599_v1 = vadd.f32 %v6295_v29, %v9346_v36 }
 0x6b2   : > { %v3464_v51 = vpop.f32.mrf.mxu0 }
 0x6b3   : > { %v9355_v31 = vadd.f32 %v10447_v16, %v3599_v1  ;;  %v3597_v22 = vadd.f32 %v9346_v36, %v3464_v51  ;;  %v10456_v1 = vld [vmem:[#allocation60_spill] sm:$0xff] }
 0x6b4   : > { %v6296_v43 = vpop.f32.mrf.mxu0 }
 0x6b5   : > { %v9359_v25 = vadd.f32 %v3597_v22, %v10448_v55  ;;  %v3600_v38 = vadd.f32 %v6296_v43, %v9346_v36  ;;  %v4198_v59 = vmul.f32 %v9352_v4, %v9355_v31 }
 0x6b6   : > { %v3467_v35 = vpop.f32.mrf.mxu0 }
 0x6b7   : > { %v9365_v62 = vadd.f32 %v10449_v2, %v3600_v38  ;;  %v3598_v58 = vadd.f32 %v9346_v36, %v3467_v35  ;;  %4232 = vadd.xlane.f32.xlu0 %v4198_v59  ;;  %v4196_v45 = vmul.f32 %v9352_v4, %v9359_v25  ;;  %v10457_v38 = vld [vmem:[#allocation61_spill] sm:$0xff] }
 0x6b9   : > { %v9369_v47 = vadd.f32 %v3598_v58, %v10450_v12  ;;  %v4199_v53 = vmul.f32 %v9352_v4, %v9365_v62  ;;  %v10458_v58 = vld [vmem:[#allocation62_spill] sm:$0xff] }
 0x6ba   : > { %v6299_v10 = vpop.f32.mrf.mxu0 }
 0x6bb   : > { %v3603_v24 = vadd.f32 %v6299_v10, %v9346_v36  ;;  %4228 = vadd.xlane.f32.xlu0 %v4196_v45  ;;  %4234 = vadd.xlane.f32.xlu1 %v4199_v53  ;;  %v4197_v17 = vmul.f32 %v9352_v4, %v9369_v47 }
 0x6bc   : > { %v3480_v56 = vpop.f32.mrf.mxu0 }
 0x6bd   : > { %v9377_v7 = vadd.f32 %v10451_v11, %v3603_v24  ;;  %v3601_v50 = vadd.f32 %v9346_v36, %v3480_v56  ;;  %v10459_v56 = vld [vmem:[#allocation63_spill] sm:$0xff] }
 0x6be   : > { %v6300_v18 = vpop.f32.mrf.mxu0 }
 0x6bf   : > { %v9383_v5 = vadd.f32 %v3601_v50, %v10452_v44  ;;  %v3604_v46 = vadd.f32 %v6300_v18, %v9346_v36  ;;  %v4202_v27 = vmul.f32 %v9352_v4, %v9377_v7  ;;  %4230 = vadd.xlane.f32.xlu1 %v4197_v17  ;;  %v10460_v17 = vld [vmem:[#allocation64_spill] sm:$0xff] }
 0x6c0   : > { %v3483_v23 = vpop.f32.mrf.mxu0 }
 0x6c1   : > { %v9389_v6 = vadd.f32 %v10453_v37, %v3604_v46  ;;  %v3602_v60 = vadd.f32 %v9346_v36, %v3483_v23  ;;  %4240 = vadd.xlane.f32.xlu0 %v4202_v27  ;;  %v4200_v39 = vmul.f32 %v9352_v4, %v9383_v5 }
 0x6c2   : > { %v6303_v32 = vpop.f32.mrf.mxu0 }
 0x6c3   : > { %v9393_v9 = vadd.f32 %v3602_v60, %v10454_v21  ;;  %v3607_v40 = vadd.f32 %v6303_v32, %v9346_v36  ;;  %v4203_v13 = vmul.f32 %v9352_v4, %v9389_v6  ;;  %v10461_v60 = vld [vmem:[#allocation65_spill] sm:$0xff] }
 0x6c4   : > { %v3496_v33 = vpop.f32.mrf.mxu0 }
 0x6c5   : > { %v3639_v63 = vadd.f32 %v10455_v15, %v3607_v40  ;;  %v3605_v61 = vadd.f32 %v9346_v36, %v3496_v33  ;;  %4236 = vadd.xlane.f32.xlu0 %v4200_v39  ;;  %4242 = vadd.xlane.f32.xlu1 %v4203_v13  ;;  %v4201_v43 = vmul.f32 %v9352_v4, %v9393_v9  ;;  %v10462_v13 = vld [vmem:[#allocation66_spill] sm:$0xff] }
 0x6c6   : > { %v6304_v29 = vpop.f32.mrf.mxu0 }
 0x6c7   : > { %v9403_v51 = vadd.f32 %v3605_v61, %v10456_v1  ;;  %v3608_v16 = vadd.f32 %v6304_v29, %v9346_v36  ;;  %v4206_v22 = vmul.f32 %v9352_v4, %v3639_v63 }
 0x6c8   : > { %v3499_v55 = vpop.f32.mrf.mxu0 }
 0x6c9   : > { %v3640_v59 = vadd.f32 %v10457_v38, %v3608_v16  ;;  %v3606_v35 = vadd.f32 %v9346_v36, %v3499_v55  ;;  %4248 = vadd.xlane.f32.xlu0 %v4206_v22  ;;  %4238 = vadd.xlane.f32.xlu1 %v4201_v43  ;;  %v4204_v45 = vmul.f32 %v9352_v4, %v9403_v51  ;;  %v10463_v16 = vld [vmem:[#allocation67_spill] sm:$0xff] }
 0x6ca   : > { %v6307_v2 = vpop.f32.mrf.mxu0 }
 0x6cb   : > { %v3638_v12 = vadd.f32 %v3606_v35, %v10458_v58  ;;  %v3611_v10 = vadd.f32 %v6307_v2, %v9346_v36  ;;  %v4207_v53 = vmul.f32 %v9352_v4, %v3640_v59  ;;  %v10464_v35 = vld [vmem:[#allocation68_spill] sm:$0xff] }
 0x6cc   : > { %v3512_v24 = vpop.f32.mrf.mxu0 }
 0x6cd   : > { %v3643_v11 = vadd.f32 %v10459_v56, %v3611_v10  ;;  %v3609_v50 = vadd.f32 %v9346_v36, %v3512_v24  ;;  %4244 = vadd.xlane.f32.xlu0 %v4204_v45  ;;  %4250 = vadd.xlane.f32.xlu1 %v4207_v53  ;;  %v4205_v23 = vmul.f32 %v9352_v4, %v3638_v12  ;;  %v10465_v24 = vld [vmem:[#allocation69_spill] sm:$0xff] }
 0x6ce   : > { %v6308_v18 = vpop.f32.mrf.mxu0 }
 0x6cf   : > { %v3641_v44 = vadd.f32 %v3609_v50, %v10460_v17  ;;  %v3612_v46 = vadd.f32 %v6308_v18, %v9346_v36  ;;  %v4210_v27 = vmul.f32 %v9352_v4, %v3643_v11  ;;  %v3666_v50 = vpack.c.bf16 %v3640_v59, %v3639_v63 }
 0x6d0   : > { %v3515_v37 = vpop.f32.mrf.mxu0  ;;  %v3665_v59 = vpack.c.bf16 %v3638_v12, %v9403_v51  ;;  %v3664_v12 = vpack.c.bf16 %v9389_v6, %v9377_v7  ;;  %v3663_v6 = vpack.c.bf16 %v9393_v9, %v9383_v5  ;;  %v3662_v5 = vpack.c.bf16 %v9365_v62, %v9355_v31  ;;  %v10475_v62 = vld [vmem:[#allocation80_spill] sm:$0xff] }
 0x6d1   : > { %v3644_v32 = vadd.f32 %v10461_v60, %v3612_v46  ;;  %v3610_v21 = vadd.f32 %v9346_v36, %v3515_v37  ;;  %4256 = vadd.xlane.f32.xlu0 %v4210_v27  ;;  %4246 = vadd.xlane.f32.xlu1 %v4205_v23  ;;  %v4208_v39 = vmul.f32 %v9352_v4, %v3641_v44  ;;  %v10466_v27 = vld [vmem:[#allocation70_spill] sm:$0xff]  ;;  %v10467_v60 = vld [vmem:[#allocation71_spill] sm:$0xff] }
 0x6d2   : > { %v6311_v40 = vpop.f32.mrf.mxu0 }
 0x6d3   : > { %v3642_v33 = vadd.f32 %v3610_v21, %v10462_v13  ;;  %v3615_v15 = vadd.f32 %v6311_v40, %v9346_v36  ;;  %v3668_v61 = vpack.c.bf16 %v3644_v32, %v3643_v11  ;;  %v4211_v29 = vmul.f32 %v9352_v4, %v3644_v32  ;;  %v10468_v40 = vld [vmem:[#allocation72_spill] sm:$0xff] }
 0x6d4   : > { %v3528_v1 = vpop.f32.mrf.mxu0 }
 0x6d5   : > { %v9429_v22 = vadd.f32 %v10463_v16, %v3615_v15  ;;  %v3613_v43 = vadd.f32 %v9346_v36, %v3528_v1  ;;  %6357 = vmatprep.subr.bf16.mxu1 %v3668_v61  ;;  %4252 = vadd.xlane.f32.xlu0 %v4208_v39  ;;  %v3667_v55 = vpack.c.bf16 %v3642_v33, %v3641_v44 }
 0x6d6   : > { %4258 = vadd.xlane.f32.xlu1 %v4211_v29  ;;  %v6312_v38 = vpop.f32.mrf.mxu0  ;;  %6358 = vmatpush3.bf16.msra.mxu1 %v3668_v61  ;;  %v4209_v53 = vmul.f32 %v9352_v4, %v3642_v33  ;;  %v10469_v29 = vld [vmem:[#allocation73_spill] sm:$0xff] }
 0x6d7   : > { %v9433_v2 = vadd.f32 %v3613_v43, %v10464_v35  ;;  %v3616_v58 = vadd.f32 %v6312_v38, %v9346_v36  ;;  %6359 = vmatprep.subr.bf16.mxu1 %v3667_v55  ;;  %v4214_v10 = vmul.f32 %v9352_v4, %v9429_v22  ;;  %v10470_v35 = vld [vmem:[#allocation74_spill] sm:$0xff] }
 0x6d8   : > { %v3531_v45 = vpop.f32.mrf.mxu0 }
 0x6d9   : > { %v9440_v56 = vadd.f32 %v10465_v24, %v3616_v58  ;;  %v3614_v11 = vadd.f32 %v9346_v36, %v3531_v45  ;;  %4264 = vadd.xlane.f32.xlu0 %v4214_v10  ;;  %v4212_v44 = vmul.f32 %v9352_v4, %v9433_v2  ;;  %v10471_v45 = vld [vmem:[#allocation75_spill] sm:$0xff] }
 0x6da   : > { %4254 = vadd.xlane.f32.xlu1 %v4209_v53  ;;  %v6315_v18 = vpop.f32.mrf.mxu0  ;;  %6360 = vmatpush3.bf16.msra.mxu1 %v3667_v55 }
 0x6db   : > { %v3619_v17 = vadd.f32 %v6315_v18, %v9346_v36  ;;  %6361 = vmatprep.subr.bf16.mxu1 %v3666_v50  ;;  %v4215_v46 = vmul.f32 %v9352_v4, %v9440_v56  ;;  %v9449_v23 = vadd.f32 %v3614_v11, %v10466_v27  ;;  %v10472_v11 = vld [vmem:[#allocation76_spill] sm:$0xff]  ;;  %v10473_v27 = vld [vmem:[#allocation77_spill] sm:$0xff] }
 0x6dc   : > { %v3544_v37 = vpop.f32.mrf.mxu0 }
 0x6dd   : > { %v9452_v32 = vadd.f32 %v10467_v60, %v3619_v17  ;;  %v3617_v63 = vadd.f32 %v9346_v36, %v3544_v37  ;;  %4260 = vadd.xlane.f32.xlu0 %v4212_v44  ;;  %v4213_v61 = vmul.f32 %v9352_v4, %v9449_v23 }
 0x6de   : > { %4266 = vadd.xlane.f32.xlu1 %v4215_v46  ;;  %v6316_v21 = vpop.f32.mrf.mxu0  ;;  %6362 = vmatpush3.bf16.msra.mxu1 %v3666_v50 }
 0x6df   : > { %v9457_v39 = vadd.f32 %v3617_v63, %v10468_v40  ;;  %v3620_v13 = vadd.f32 %v6316_v21, %v9346_v36  ;;  %6363 = vmatprep.subr.bf16.mxu1 %v3665_v59  ;;  %v4218_v33 = vmul.f32 %v9352_v4, %v9452_v32  ;;  %v10474_v21 = vld [vmem:[#allocation78_spill] sm:$0xff] }
 0x6e0   : > { %v3547_v15 = vpop.f32.mrf.mxu0 }
 0x6e1   : > { %v9465_v1 = vadd.f32 %v10469_v29, %v3620_v13  ;;  %v3618_v51 = vadd.f32 %v9346_v36, %v3547_v15  ;;  %4272 = vadd.xlane.f32.xlu0 %v4218_v33  ;;  %v4216_v55 = vmul.f32 %v9352_v4, %v9457_v39 }
 0x6e2   : > { %4262 = vadd.xlane.f32.xlu1 %v4213_v61  ;;  %v6319_v16 = vpop.f32.mrf.mxu0  ;;  %6364 = vmatpush3.bf16.msra.mxu1 %v3665_v59  ;;  %v3661_v61 = vpack.c.bf16 %v9369_v47, %v9359_v25  ;;  %v10478_v25 = vld [vmem:[#allocation82_spill] sm:$0xff] }
 0x6e3   : > { %v3623_v43 = vadd.f32 %v6319_v16, %v9346_v36  ;;  %6365 = vmatprep.subr.bf16.mxu1 %v3664_v12  ;;  %v4219_v38 = vmul.f32 %v9352_v4, %v9465_v1  ;;  %v9476_v58 = vadd.f32 %v3618_v51, %v10470_v35 }
 0x6e4   : > { %v3560_v10 = vpop.f32.mrf.mxu0 }
 0x6e5   : > { %v3655_v53 = vadd.f32 %v10471_v45, %v3623_v43  ;;  %v3621_v7 = vadd.f32 %v9346_v36, %v3560_v10  ;;  %4268 = vadd.xlane.f32.xlu0 %v4216_v55  ;;  %v4217_v46 = vmul.f32 %v9352_v4, %v9476_v58  ;;  %v10476_v43 = vld [vmem:[#allocation79_spill] sm:$0xff] }
 0x6e6   : > { %4274 = vadd.xlane.f32.xlu1 %v4219_v38  ;;  %v6320_v24 = vpop.f32.mrf.mxu0  ;;  %6366 = vmatpush3.bf16.msra.mxu1 %v3664_v12  ;;  %v10477_v38 = vld [vmem:[#allocation81_spill] sm:$0xff] }
 0x6e7   : > { %v3653_v50 = vadd.f32 %v3621_v7, %v10472_v11  ;;  %v3624_v18 = vadd.f32 %v6320_v24, %v9346_v36  ;;  %6367 = vmatprep.subr.bf16.mxu1 %v3663_v6  ;;  %v4222_v17 = vmul.f32 %v9352_v4, %v3655_v53 }
 0x6e8   : > { %v3563_v44 = vpop.f32.mrf.mxu0 }
 0x6e9   : > { %v3656_v37 = vadd.f32 %v10473_v27, %v3624_v18  ;;  %v3622_v60 = vadd.f32 %v9346_v36, %v3563_v44  ;;  %4280 = vadd.xlane.f32.xlu0 %v4222_v17  ;;  %v4220_v63 = vmul.f32 %v9352_v4, %v3653_v50  ;;  %v7262_v18 = vmov 0.0  }
 0x6ea   : > { %4270 = vadd.xlane.f32.xlu1 %v4217_v46  ;;  %v6323_v9 = vpop.f32.mrf.mxu0  ;;  %6368 = vmatpush3.bf16.msra.mxu1 %v3663_v6  ;;  %v3672_v46 = vpack.c.bf16 %v9465_v1, %v9452_v32  ;;  %v3669_v32 = vpack.c.bf16 %v9449_v23, %v9433_v2 }
 0x6eb   : > { %6369 = vmatprep.subr.bf16.mxu1 %v3662_v5  ;;  %v4223_v59 = vmul.f32 %v9352_v4, %v3656_v37  ;;  %v3654_v40 = vadd.f32 %v3622_v60, %v10474_v21  ;;  %v3627_v33 = vadd.f32 %v6323_v9, %v9346_v36  ;;  %v3671_v60 = vpack.c.bf16 %v9476_v58, %v9457_v39 }
 0x6ec   : > { %v3576_v13 = vpop.f32.mrf.mxu0 }
 0x6ed   : > { %v3625_v15 = vadd.f32 %v9346_v36, %v3576_v13  ;;  %4276 = vadd.xlane.f32.xlu0 %v4220_v63  ;;  %v4221_v16 = vmul.f32 %v9352_v4, %v3654_v40  ;;  %v3659_v55 = vadd.f32 %v10476_v43, %v3627_v33  ;;  %v3673_v44 = vpack.c.bf16 %v3654_v40, %v3653_v50 }
 0x6ee   : > { %4282 = vadd.xlane.f32.xlu1 %v4223_v59  ;;  %v6324_v31 = vpop.f32.mrf.mxu0  ;;  %6370 = vmatpush3.bf16.msra.mxu1 %v3662_v5 }
 0x6ef   : > { %v3657_v29 = vadd.f32 %v3625_v15, %v10475_v62  ;;  %v3628_v51 = vadd.f32 %v6324_v31, %v9346_v36  ;;  %6371 = vmatprep.subr.bf16.mxu1 %v3661_v61  ;;  %v4226_v24 = vmul.f32 %v9352_v4, %v3659_v55  ;;  %v6746_v31 = vld [vmem:[#allocation17 + $0x38] sm:$0xff]  }
 0x6f0   : > { %v3579_v12 = vpop.f32.mrf.mxu0 }
 0x6f1   : > { %v3660_v35 = vadd.f32 %v10477_v38, %v3628_v51  ;;  %v3626_v10 = vadd.f32 %v9346_v36, %v3579_v12  ;;  %v4224_v45 = vmul.f32 %v9352_v4, %v3657_v29  ;;  %v3674_v36 = vpack.c.bf16 %v3656_v37, %v3655_v53 }
 0x6f2   : > { %4278 = vadd.xlane.f32.xlu1 %v4221_v16  ;;  %6372 = vmatpush3.bf16.msra.mxu1 %v3661_v61 }
 0x6f3   : > { %v3658_v47 = vadd.f32 %v3626_v10, %v10478_v25  ;;  %4284 = vadd.xlane.f32.xlu0 %v4224_v45  ;;  %v3676_v7 = vpack.c.bf16 %v3660_v35, %v3659_v55  ;;  %6405 = vmatprep.subr.bf16.mxu1 %v7262_v18  ;;  %v4227_v17 = vmul.f32 %v9352_v4, %v3660_v35 }
 0x6f5   : > { %6381 = vmatprep.subr.bf16.mxu0 %v3676_v7  ;;  %v3675_v6 = vpack.c.bf16 %v3658_v47, %v3657_v29  ;;  %v4225_v11 = vmul.f32 %v9352_v4, %v3658_v47  ;;  %v3670_v4 = vpack.c.bf16 %v9440_v56, %v9429_v22 }
 0x6f6   : > { %6382 = vmatpush3.bf16.msra.mxu0 %v3676_v7 }
 0x6f7   : > { %6383 = vmatprep.subr.bf16.mxu0 %v3675_v6  ;;  %4288 = vadd.xlane.f32.xlu0 %v4226_v24 }
 0x6f8   : > { %4286 = vadd.xlane.f32.xlu1 %v4225_v11 }
 0x6fa   : > { %6384 = vmatpush3.bf16.msra.mxu0 %v3675_v6 }
 0x6fb   : > { %6385 = vmatprep.subr.bf16.mxu0 %v3674_v36 }
 0x6fc   : > { %4290 = vadd.xlane.f32.xlu1 %v4227_v17 }
 0x6fe   : > { %6386 = vmatpush3.bf16.msra.mxu0 %v3674_v36 }
 0x6ff   : > { %6387 = vmatprep.subr.bf16.mxu0 %v3673_v44 }
 0x702   : > { %6388 = vmatpush3.bf16.msra.mxu0 %v3673_v44 }
 0x703   : > { %6389 = vmatprep.subr.bf16.mxu0 %v3672_v46  ;;  %v3989_v27 = vpop.xlane.xlu0 %3988 }
 0x704   : > { %6858 = vrcp.f32 %v3989_v27 }
 0x706   : > { %6390 = vmatpush3.bf16.msra.mxu0 %v3672_v46 }
 0x707   : > { %6391 = vmatprep.subr.bf16.mxu0 %v3671_v60  ;;  %v3991_v53 = vpop.xlane.xlu1 %3990 }
 0x708   : > { %6860 = vrcp.f32 %v3991_v53  ;;  %v6751_v53 = vld [vmem:[#allocation17 + $0x10] sm:$0xff]  }
 0x70a   : > { %6392 = vmatpush3.bf16.msra.mxu0 %v3671_v60 }
 0x70b   : > { %6393 = vmatprep.subr.bf16.mxu0 %v3670_v4  ;;  %v3993_v50 = vpop.xlane.xlu0 %3992  ;;  %v3995_v37 = vpop.xlane.xlu1 %3994 }
 0x70c   : > { %6862 = vrcp.f32 %v3993_v50 }
 0x70d   : > { %6864 = vrcp.f32 %v3995_v37 }
 0x70e   : > { %6394 = vmatpush3.bf16.msra.mxu0 %v3670_v4 }
 0x70f   : > { %6395 = vmatprep.subr.bf16.mxu0 %v3669_v32  ;;  %v3997_v39 = vpop.xlane.xlu0 %3996 }
 0x710   : > { %6866 = vrcp.f32 %v3997_v39  ;;  %v3999_v1 = vpop.xlane.xlu1 %3998 }
 0x711   : > { %6868 = vrcp.f32 %v3999_v1  ;;  %v6859_v58 = vpop.eup %6858 }
 0x712   : > { %6396 = vmatpush3.bf16.msra.mxu0 %v3669_v32  ;;  %v4021_v9 = vmul.f32 %v6859_v58, %v9287_v57  ;;  %v6752_v32 = vld [vmem:[#allocation17 + $0x8] sm:$0xff]  }
 0x713   : > { %v4001_v5 = vpop.xlane.xlu0 %4000 }
 0x714   : > { %6870 = vrcp.f32 %v4001_v5  ;;  %v4003_v22 = vpop.xlane.xlu1 %4002 }
 0x715   : > { %v6861_v56 = vpop.eup %6860  ;;  %6872 = vrcp.f32 %v4003_v22 }
 0x716   : > { %v4023_v63 = vmul.f32 %v6861_v56, %v9292_v30 }
 0x717   : > { %v4005_v59 = vpop.xlane.xlu0 %4004 }
 0x718   : > { %6874 = vrcp.f32 %v4005_v59  ;;  %v4007_v2 = vpop.xlane.xlu1 %4006  ;;  %v4052_v23 = vpack.c.bf16 %v4023_v63, %v4021_v9 }
 0x719   : > { %v6863_v21 = vpop.eup %6862  ;;  %6876 = vrcp.f32 %v4007_v2  ;;  %v10479_v2 = vlaneseq }
 0x71a   : > { %v6865_v40 = vpop.eup %6864  ;;  %6373 = vmatprep.mubr.bf16.mxu1 %v4052_v23  ;;  %v4025_v13 = vmul.f32 %v6863_v21, %v9299_v19  ;;  %v6747_v19 = vld [vmem:[#allocation17 + $0x30] sm:$0xff]  }
 0x71b   : > { %v4009_v33 = vpop.xlane.xlu0 %4008  ;;  %v4027_v15 = vmul.f32 %v6865_v40, %v9295_v49  ;;  %v9547_v23 = vand.u32 127, %v10479_v2 }
 0x71c   : > { %6878 = vrcp.f32 %v4009_v33  ;;  %v4011_v61 = vpop.xlane.xlu1 %4010 }
 0x71d   : > { %v6867_v62 = vpop.eup %6866  ;;  %6880 = vrcp.f32 %v4011_v61  ;;  %v4053_v57 = vpack.c.bf16 %v4027_v15, %v4025_v13  ;;  %v4362_v40 = vadd.s32 4294967288, %v9547_v23  ;;  %v10480_v15 = vld [vmem:[#allocation34_spill] sm:$0xff] }
 0x71e   : > { %v6869_v30 = vpop.eup %6868  ;;  %v4029_v29 = vmul.f32 %v6867_v62, %v9304_v42  ;;  %v4360_v61 = vsub.s32 %v9547_v23, %v10480_v15 }
 0x71f   : > { %6374 = vmatmul.mubr.bf16.vlgmr.msra.gmra.mxu1 %v4053_v57  ;;  %v4013_v51 = vpop.xlane.xlu0 %4012  ;;  %v4031_v12 = vmul.f32 %v6869_v30, %v9307_v28  ;;  %v6748_v28 = vld [vmem:[#allocation17 + $0x28] sm:$0xff]  }
 0x720   : > { %6882 = vrcp.f32 %v4013_v51  ;;  %v4015_v16 = vpop.xlane.xlu1 %4014  ;;  %6406 = vmatpush3.bf16.msra.mxu1 %v6746_v31  ;;  %v4365_v31 = vsub.s32 %v4362_v40, %v10480_v15 }
 0x721   : > { %v6871_v43 = vpop.eup %6870  ;;  %6884 = vrcp.f32 %v4015_v16  ;;  %v4054_v49 = vpack.c.bf16 %v4031_v12, %v4029_v29  ;;  %6407 = vmatprep.subr.bf16.mxu1 %v7262_v18  ;;  %v4369_v29 = vadd.s32 4294967280, %v9547_v23  ;;  %v4376_v12 = vadd.s32 4294967272, %v9547_v23 }
 0x722   : > { %v6873_v55 = vpop.eup %6872  ;;  %v4033_v38 = vmul.f32 %v6871_v43, %v9312_v20  ;;  %v6749_v20 = vld [vmem:[#allocation17 + $0x20] sm:$0xff]  }
 0x723   : > { %6377 = vmatprep.mubr.bf16.mxu1 %v4054_v49  ;;  %v4017_v35 = vpop.xlane.xlu0 %4016  ;;  %v4035_v42 = vmul.f32 %v6873_v55, %v9315_v34  ;;  %v4383_v49 = vadd.s32 4294967264, %v9547_v23 }
 0x724   : > { %6886 = vrcp.f32 %v4017_v35  ;;  %v4019_v10 = vpop.xlane.xlu1 %4018  ;;  %6408 = vmatpush3.bf16.msra.mxu1 %v6747_v19  ;;  %v4372_v35 = vsub.s32 %v4369_v29, %v10480_v15 }
 0x725   : > { %v6875_v45 = vpop.eup %6874  ;;  %6888 = vrcp.f32 %v4019_v10  ;;  %v4055_v25 = vpack.c.bf16 %v4035_v42, %v4033_v38  ;;  %6409 = vmatprep.subr.bf16.mxu1 %v7262_v18  ;;  %v9566_v10 = vsub.s32 %v4376_v12, %v10480_v15 }
 0x726   : > { %v6877_v47 = vpop.eup %6876  ;;  %v4037_v7 = vmul.f32 %v6875_v45, %v9319_v8  ;;  %v6750_v8 = vld [vmem:[#allocation17 + $0x18] sm:$0xff]  }
 0x727   : > { %6378 = vmatmul.mubr.bf16.gmra.mxu1 %v4055_v25  ;;  %v4039_v6 = vmul.f32 %v6877_v47, %v9321_v3 }
 0x728   : > { %6410 = vmatpush3.bf16.msra.mxu1 %v6748_v28  ;;  %6421 = vmatprep.mubr.msk.bf16.mxu1 %vm7263_vm1, %v7262_v18  ;;  %v4390_v28 = vadd.s32 4294967256, %v9547_v23  ;;  %vm4546_vm1 = vcmask 1041409  }
 0x729   : > { %v6879_v34 = vpop.eup %6878  ;;  %v4056_v24 = vpack.c.bf16 %v4039_v6, %v4037_v7  ;;  %6411 = vmatprep.subr.bf16.mxu1 %v7262_v18  ;;  %v9571_v7 = vsub.s32 %v4383_v49, %v10480_v15 }
 0x72a   : > { %v6881_v11 = vpop.eup %6880  ;;  %v4041_v36 = vmul.f32 %v6879_v34, %v9325_v52 }
 0x72b   : > { %6397 = vmatprep.mubr.bf16.mxu0 %v4056_v24  ;;  %v4043_v17 = vmul.f32 %v6881_v11, %v9327_v48  ;;  %v4397_v24 = vadd.s32 4294967248, %v9547_v23 }
 0x72c   : > { %6412 = vmatpush3.bf16.msra.mxu1 %v6749_v20 }
 0x72d   : > { %v6883_v44 = vpop.eup %6882  ;;  %v4057_v46 = vpack.c.bf16 %v4043_v17, %v4041_v36  ;;  %6413 = vmatprep.subr.bf16.mxu1 %v7262_v18  ;;  %v9576_v36 = vsub.s32 %v4390_v28, %v10480_v15 }
 0x72e   : > { %v6885_v3 = vpop.eup %6884  ;;  %v4045_v27 = vmul.f32 %v6883_v44, %v9331_v54  ;;  %v6753_v54 = vld [vmem:[#allocation17] sm:$0xff]  }
 0x72f   : > { %6398 = vmatmul.mubr.bf16.vlgmr.msra.gmra.mxu0 %v4057_v46  ;;  %v4047_v60 = vmul.f32 %v6885_v3, %v9333_v26  ;;  %v4404_v46 = vadd.s32 4294967240, %v9547_v23 }
 0x730   : > { %6414 = vmatpush3.bf16.msra.mxu1 %v6750_v8 }
 0x731   : > { %v6887_v4 = vpop.eup %6886  ;;  %v4058_v50 = vpack.c.bf16 %v4047_v60, %v4045_v27  ;;  %6415 = vmatprep.subr.bf16.mxu1 %v7262_v18 }
 0x732   : > { %v6889_v52 = vpop.eup %6888  ;;  %v4049_v48 = vmul.f32 %v6887_v4, %v9337_v0 }
 0x733   : > { %6401 = vmatprep.mubr.bf16.mxu0 %v4058_v50  ;;  %v4051_v37 = vmul.f32 %v6889_v52, %v9339_v14 }
 0x734   : > { %6416 = vmatpush3.bf16.msra.mxu1 %v6751_v53  ;;  %v9582_v53 = vsub.s32 %v4397_v24, %v10480_v15  ;;  %v4453_v24 = vadd.s32 4294967184, %v9547_v23 }
 0x735   : > { %v4059_v39 = vpack.c.bf16 %v4051_v37, %v4049_v48  ;;  %6417 = vmatprep.subr.bf16.mxu1 %v7262_v18  ;;  %v4425_v48 = vadd.s32 4294967216, %v9547_v23  ;;  %v4432_v37 = vadd.s32 4294967208, %v9547_v23 }
 0x737   : > { %6402 = vmatmul.mubr.bf16.gmra.mxu0 %v4059_v39 }
 0x738   : > { %6418 = vmatpush3.bf16.msra.mxu1 %v6752_v32  ;;  %v4411_v32 = vadd.s32 4294967232, %v9547_v23 }
 0x739   : > { %6419 = vmatprep.subr.bf16.mxu1 %v7262_v18 }
 0x73c   : > { %6420 = vmatpush3.bf16.msra.mxu1 %v6753_v54 }
 0x740   : > { %v4233_v26 = vpop.xlane.xlu0 %4232 }
 0x744   : > { %v4229_v1 = vpop.xlane.xlu0 %4228  ;;  %v4235_v58 = vpop.xlane.xlu1 %4234 }
 0x745   : > { %v4293_v51 = vpack.c.bf16 %v4235_v58, %v4233_v26  ;;  %v9590_v58 = vsub.s32 %v4404_v46, %v10480_v15 }
 0x747   : > { %v4326_v42 = vunpack.c.l.b16 %v4293_v51  ;;  %v4327_v25 = vunpack.c.h.b16 %v4293_v51 }
 0x748   : > { %v4231_v5 = vpop.xlane.xlu1 %4230 }
 0x749   : > { %v4292_v13 = vpack.c.bf16 %v4231_v5, %v4229_v1  ;;  %v4373_v34 = vrot.slane %v4326_v42, %v4372_v35  ;;  %v4380_v44 = vrot.slane %v4327_v25, %v9566_v10 }
 0x74a   : > { %v4241_v22 = vpop.xlane.xlu0 %4240 }
 0x74b   : > { %v4324_v62 = vunpack.c.l.b16 %v4292_v13  ;;  %v4325_v57 = vunpack.c.h.b16 %v4292_v13  ;;  %v9594_v13 = vsub.s32 %v4425_v48, %v10480_v15 }
 0x74d   : > { %v4361_v19 = vrot.slane %v4324_v62, %v4360_v61  ;;  %v4366_v43 = vrot.slane %v4325_v57, %v4365_v31  ;;  %v9602_v57 = vsub.s32 %v4411_v32, %v10480_v15 }
 0x74e   : > { %v4237_v0 = vpop.xlane.xlu0 %4236  ;;  %v4243_v56 = vpop.xlane.xlu1 %4242 }
 0x74f   : > { %v4368_v47 = vsel %vm4367_vm2, %v4366_v43, %v4361_v19  ;;  %v4295_v3 = vpack.c.bf16 %v4243_v56, %v4241_v22 }
 0x750   : > { %v4375_v11 = vsel %vm4374_vm3, %v4373_v34, %v4368_v47 }
 0x751   : > { %v4382_v52 = vsel %vm4381_vm4, %v4380_v44, %v4375_v11  ;;  %v4330_v5 = vunpack.c.l.b16 %v4295_v3  ;;  %v4331_v51 = vunpack.c.h.b16 %v4295_v3  ;;  %v4439_v11 = vadd.s32 4294967200, %v9547_v23 }
 0x752   : > { %v9542_v9 = vpop.xlane.xlu0 %4248  ;;  %v4239_v14 = vpop.xlane.xlu1 %4238 }
 0x753   : > { %v4294_v55 = vpack.c.bf16 %v4239_v14, %v4237_v0  ;;  %v4442_v32 = vsub.s32 %v4439_v11, %v10480_v15 }
 0x755   : > { %v4328_v6 = vunpack.c.l.b16 %v4294_v55  ;;  %v4329_v17 = vunpack.c.h.b16 %v4294_v55 }
 0x756   : > { %v4245_v63 = vpop.xlane.xlu0 %4244  ;;  %v9544_v59 = vpop.xlane.xlu1 %4250 }
 0x757   : > { %v4387_v27 = vrot.slane %v4328_v6, %v9571_v7  ;;  %v4394_v39 = vrot.slane %v4329_v17, %v9576_v36  ;;  %v4297_v42 = vpack.c.bf16 %v9544_v59, %v9542_v9 }
 0x759   : > { %v4389_v22 = vsel %vm4388_vm5, %v4387_v27, %v4382_v52  ;;  %v4334_v3 = vunpack.c.l.b16 %v4297_v42  ;;  %v4460_v52 = vadd.s32 4294967176, %v9547_v23 }
 0x75a   : > { %v9549_v21 = vpop.xlane.xlu0 %4256  ;;  %v4247_v18 = vpop.xlane.xlu1 %4246  ;;  %v4396_v62 = vsel %vm4395_vm6, %v4394_v39, %v4389_v22 }
 0x75b   : > { %v4296_v54 = vpack.c.bf16 %v4247_v18, %v4245_v63  ;;  %v9597_v63 = vsub.s32 %v4432_v37, %v10480_v15  ;;  %v4418_v18 = vadd.s32 4294967224, %v9547_v23 }
 0x75d   : > { %v4332_v29 = vunpack.c.l.b16 %v4296_v54  ;;  %v4421_v28 = vsub.s32 %v4418_v18, %v10480_v15 }
 0x75e   : > { %v9552_v33 = vpop.xlane.xlu0 %4252 }
 0x75f   : > { %v9557_v30 = vpop.xlane.xlu1 %4258  ;;  %v4415_v47 = vrot.slane %v4332_v29, %v9602_v57 }
 0x762   : > { %v4265_v16 = vpop.xlane.xlu0 %4264 }
 0x763   : > { %v9562_v38 = vpop.xlane.xlu1 %4254 }
 0x764   : > { %v4298_v59 = vpack.c.bf16 %v9562_v38, %v9552_v33  ;;  %v4446_v33 = vadd.s32 4294967192, %v9547_v23 }
 0x766   : > { %v4261_v45 = vpop.xlane.xlu0 %4260  ;;  %v4336_v39 = vunpack.c.l.b16 %v4298_v59  ;;  %v4449_v18 = vsub.s32 %v4446_v33, %v10480_v15 }
 0x767   : > { %v4267_v20 = vpop.xlane.xlu1 %4266 }
 0x768   : > { %v4301_v4 = vpack.c.bf16 %v4267_v20, %v4265_v16 }
 0x76a   : > { %v4273_v8 = vpop.xlane.xlu0 %4272  ;;  %v4342_v14 = vunpack.c.l.b16 %v4301_v4 }
 0x76b   : > { %v4263_v60 = vpop.xlane.xlu1 %4262 }
 0x76c   : > { %v4300_v50 = vpack.c.bf16 %v4263_v60, %v4261_v45  ;;  %v4479_v19 = vrot.slane %v4342_v14, %v4372_v35  ;;  %v4333_v45 = vunpack.c.h.b16 %v4296_v54  ;;  %v4408_v35 = vrot.slane %v4331_v51, %v9590_v58 }
 0x76e   : > { %v4340_v26 = vunpack.c.l.b16 %v4300_v50  ;;  %v4341_v1 = vunpack.c.h.b16 %v4300_v50  ;;  %v4269_v0 = vpop.xlane.xlu0 %4268  ;;  %v4422_v60 = vrot.slane %v4333_v45, %v4421_v28 }
 0x76f   : > { %v4275_v56 = vpop.xlane.xlu1 %4274 }
 0x770   : > { %v4470_v2 = vrot.slane %v4340_v26, %v4360_v61  ;;  %v4474_v40 = vrot.slane %v4341_v1, %v4365_v31  ;;  %v4401_v61 = vrot.slane %v4330_v5, %v9582_v53  ;;  %v4343_v31 = vunpack.c.h.b16 %v4301_v4 }
 0x771   : > { %v4303_v43 = vpack.c.bf16 %v4275_v56, %v4273_v8  ;;  %v4335_v1 = vunpack.c.h.b16 %v4297_v42  ;;  %v4429_v5 = vrot.slane %v4334_v3, %v9594_v13 }
 0x772   : > { %v4475_v12 = vsel %vm4367_vm2, %v4474_v40, %v4470_v2  ;;  %v4403_v55 = vsel %vm4402_vm7, %v4401_v61, %v4396_v62  ;;  %v4281_v25 = vpop.xlane.xlu0 %4280  ;;  %v4484_v17 = vrot.slane %v4343_v31, %v9566_v10  ;;  %v4299_v40 = vpack.c.bf16 %v9557_v30, %v9549_v21 }
 0x773   : > { %v4271_v16 = vpop.xlane.xlu1 %4270  ;;  %v4480_v6 = vsel %vm4374_vm3, %v4479_v19, %v4475_v12  ;;  %v4346_v8 = vunpack.c.l.b16 %v4303_v43  ;;  %v4410_v27 = vsel %vm4409_vm8, %v4408_v35, %v4403_v55  ;;  %v4347_v38 = vunpack.c.h.b16 %v4303_v43 }
 0x774   : > { %v4302_v49 = vpack.c.bf16 %v4271_v16, %v4269_v0  ;;  %v4485_v4 = vsel %vm4381_vm4, %v4484_v17, %v4480_v6  ;;  %v4417_v50 = vsel %vm4416_vm9, %v4415_v47, %v4410_v27  ;;  %v4456_v0 = vsub.s32 %v4453_v24, %v10480_v15 }
 0x775   : > { %v4499_v54 = vrot.slane %v4346_v8, %v9582_v53  ;;  %v4424_v22 = vsel %vm4423_vm10, %v4422_v60, %v4417_v50  ;;  %v4337_v62 = vunpack.c.h.b16 %v4298_v59  ;;  %v4504_v53 = vrot.slane %v4347_v38, %v9590_v58 }
 0x776   : > { %v4344_v20 = vunpack.c.l.b16 %v4302_v49  ;;  %v4345_v34 = vunpack.c.h.b16 %v4302_v49  ;;  %v4431_v51 = vsel %vm4430_vm11, %v4429_v5, %v4424_v22  ;;  %v4443_v61 = vrot.slane %v4336_v39, %v4442_v32  ;;  %v6757_v39 = vld [vmem:[#allocation13 + $0x20] sm:$0xff]   ;;  %v9655_v22 = vld [vmem:[#allocation16 + $0x38] sm:$0xff]  }
 0x777   : > { %v4283_v9 = vpop.xlane.xlu1 %4282  ;;  %v4436_v16 = vrot.slane %v4335_v1, %v9597_v63  ;;  %v4338_v55 = vunpack.c.l.b16 %v4299_v40  ;;  %v4450_v45 = vrot.slane %v4337_v62, %v4449_v18  ;;  %v4339_v17 = vunpack.c.h.b16 %v4299_v40  ;;  %v6760_v1 = vld [vmem:[#allocation13 + $0x8] sm:$0xff]   ;;  %v6761_v5 = vld [vmem:[#allocation13] sm:$0xff]  }
 0x778   : > { %v4489_v44 = vrot.slane %v4344_v20, %v9571_v7  ;;  %v4494_v46 = vrot.slane %v4345_v34, %v9576_v36  ;;  %v4305_v48 = vpack.c.bf16 %v4283_v9, %v4281_v25  ;;  %v4277_v36 = vpop.xlane.xlu0 %4276 }
 0x779   : > { %v4438_v42 = vsel %vm4437_vm12, %v4436_v16, %v4431_v51 }
 0x77a   : > { %v4490_v10 = vsel %vm4388_vm5, %v4489_v44, %v4485_v4  ;;  %v4350_v56 = vunpack.c.l.b16 %v4305_v48  ;;  %v4351_v19 = vunpack.c.h.b16 %v4305_v48  ;;  %v4457_v44 = vrot.slane %v4338_v55, %v4456_v0 }
 0x77b   : > { %v4495_v7 = vsel %vm4395_vm6, %v4494_v46, %v4490_v10  ;;  %v4279_v37 = vpop.xlane.xlu1 %4278 }
 0x77c   : > { %v4304_v26 = vpack.c.bf16 %v4279_v37, %v4277_v36  ;;  %v4500_v23 = vsel %vm4402_vm7, %v4499_v54, %v4495_v7  ;;  %v4285_v29 = vpop.xlane.xlu0 %4284  ;;  %v4519_v21 = vrot.slane %v4350_v56, %v9594_v13  ;;  %v4524_v20 = vrot.slane %v4351_v19, %v9597_v63  ;;  %v6754_v36 = vld [vmem:[#allocation13 + $0x38] sm:$0xff]   ;;  %v6755_v37 = vld [vmem:[#allocation13 + $0x30] sm:$0xff]  }
 0x77d   : > { %v4505_v43 = vsel %vm4409_vm8, %v4504_v53, %v4500_v23  ;;  %v4463_v13 = vsub.s32 %v4460_v52, %v10480_v15  ;;  %6425 = vmatprep.subr.bf16.mxu0 %v6754_v36  ;;  %v6758_v54 = vld [vmem:[#allocation13 + $0x18] sm:$0xff]  }
 0x77e   : > { %v4348_v14 = vunpack.c.l.b16 %v4304_v26  ;;  %v4349_v2 = vunpack.c.h.b16 %v4304_v26  ;;  %6426 = vmatpush3.bf16.msra.mxu0 %v6754_v36  ;;  %v6759_v26 = vld [vmem:[#allocation13 + $0x10] sm:$0xff]  }
 0x77f   : > { %v4464_v50 = vrot.slane %v4339_v17, %v4463_v13  ;;  %6427 = vmatprep.subr.bf16.mxu0 %v6755_v37 }
 0x780   : > { %v4509_v31 = vrot.slane %v4348_v14, %v9602_v57  ;;  %v4514_v12 = vrot.slane %v4349_v2, %v4421_v28  ;;  %v4445_v28 = vsel %vm4444_vm13, %v4443_v61, %v4438_v42  ;;  %v4289_v34 = vpop.xlane.xlu0 %4288 }
 0x781   : > { %v4287_v49 = vpop.xlane.xlu1 %4286  ;;  %v4452_v9 = vsel %vm4451_vm14, %v4450_v45, %v4445_v28 }
 0x782   : > { %v4510_v30 = vsel %vm4416_vm9, %v4509_v31, %v4505_v43  ;;  %v4306_v58 = vpack.c.bf16 %v4287_v49, %v4285_v29  ;;  %v4459_v63 = vsel %vm4458_vm15, %v4457_v44, %v4452_v9  ;;  %6428 = vmatpush3.bf16.msra.mxu0 %v6755_v37 }
 0x783   : > { %v4515_v57 = vsel %vm4423_vm10, %v4514_v12, %v4510_v30  ;;  %v4466_v48 = vsel %vm4465_vm0, %v4464_v50, %v4459_v63 }
 0x784   : > { %v4520_v25 = vsel %vm4430_vm11, %v4519_v21, %v4515_v57  ;;  %v4352_v47 = vunpack.c.l.b16 %v4306_v58  ;;  %v4353_v6 = vunpack.c.h.b16 %v4306_v58 }
 0x785   : > { %v4291_v35 = vpop.xlane.xlu1 %4290  ;;  %v4525_v59 = vsel %vm4437_vm12, %v4524_v20, %v4520_v25 }
 0x786   : > { %v4529_v24 = vrot.slane %v4352_v47, %v4442_v32  ;;  %v4307_v11 = vpack.c.bf16 %v4291_v35, %v4289_v34  ;;  %v4534_v8 = vrot.slane %v4353_v6, %v4449_v18  ;;  %v6756_v32 = vld [vmem:[#allocation13 + $0x28] sm:$0xff]  }
 0x787   : > { %6429 = vmatprep.subr.bf16.mxu0 %v6756_v32 }
 0x788   : > { %v4530_v46 = vsel %vm4444_vm13, %v4529_v24, %v4525_v59  ;;  %v4354_v3 = vunpack.c.l.b16 %v4307_v11  ;;  %v4355_v27 = vunpack.c.h.b16 %v4307_v11  ;;  %6430 = vmatpush3.bf16.msra.mxu0 %v6756_v32 }
 0x789   : > { %v4535_v52 = vsel %vm4451_vm14, %v4534_v8, %v4530_v46  ;;  %6431 = vmatprep.subr.bf16.mxu0 %v6757_v39 }
 0x78a   : > { %v4539_v60 = vrot.slane %v4354_v3, %v4456_v0  ;;  %v4544_v4 = vrot.slane %v4355_v27, %v4463_v13 }
 0x78c   : > { %v4540_v10 = vsel %vm4458_vm15, %v4539_v60, %v4535_v52  ;;  %6432 = vmatpush3.bf16.msra.mxu0 %v6757_v39 }
 0x78d   : > { %v4545_v33 = vsel %vm4465_vm0, %v4544_v4, %v4540_v10  ;;  %6433 = vmatprep.subr.bf16.mxu0 %v6758_v54 }
 0x78e   : > { %v4547_v38 = vsel %vm4546_vm1, %v4545_v33, %v4466_v48 }
 0x78f   : > { %v4548_v7 = vpack.c.b16 %v4547_v38, %v4547_v38 }
 0x790   : > { %6434 = vmatpush3.bf16.msra.mxu0 %v6758_v54 }
 0x791   : > { %6422 = vmatmul.mubr.bf16.vlgmr.msra.gmra.mxu1 %v4548_v7  ;;  %6435 = vmatprep.subr.bf16.mxu0 %v6759_v26 }
 0x794   : > { %6436 = vmatpush3.bf16.msra.mxu0 %v6759_v26 }
 0x795   : > { %6437 = vmatprep.subr.bf16.mxu0 %v6760_v1 }
 0x798   : > { %6438 = vmatpush3.bf16.msra.mxu0 %v6760_v1 }
 0x799   : > { %6439 = vmatprep.subr.bf16.mxu0 %v6761_v5 }
 0x79c   : > { %6440 = vmatpush3.bf16.msra.mxu0 %v6761_v5 }
 0x79d   : > { %6489 = vmatprep.subr.bf16.mxu0 %v9655_v22 }
 0x7df   : > { %v9658_v0 = vpop.f32.mrf.mxu1 }
 0x7e0   : > { %v4668_v51 = vmul.f32 %v9658_v0, %v9658_v0 }
 0x7e1   : > { %v9660_v23 = vpop.f32.mrf.mxu1 }
 0x7e2   : > { %v4666_v40 = vmul.f32 %v9660_v23, %v9660_v23 }
 0x7e3   : > { %v9662_v56 = vpop.f32.mrf.mxu1 }
 0x7e4   : > { %v5307_v14 = vpack.c.bf16 %v9662_v56, %v9658_v0  ;;  %v4669_v16 = vmul.f32 %v9662_v56, %v9662_v56 }
 0x7e5   : > { %v9666_v2 = vpop.f32.mrf.mxu1 }
 0x7e6   : > { %v4638_v18 = vadd.f32 %v9666_v2, %v9660_v23  ;;  %v4667_v62 = vmul.f32 %v9666_v2, %v9666_v2  ;;  %v5306_v53 = vpack.c.bf16 %v9666_v2, %v9660_v23 }
 0x7e7   : > { %v9676_v29 = vpop.f32.mrf.mxu1 }
 0x7e8   : > { %v4639_v61 = vadd.f32 %v9658_v0, %v4638_v18  ;;  %v4682_v31 = vadd.f32 %v4667_v62, %v4666_v40  ;;  %v4672_v47 = vmul.f32 %v9676_v29, %v9676_v29 }
 0x7e9   : > { %v9681_v12 = vpop.f32.mrf.mxu1 }
 0x7ea   : > { %v4683_v19 = vadd.f32 %v4682_v31, %v4668_v51  ;;  %v4640_v43 = vadd.f32 %v9662_v56, %v4639_v61  ;;  %v4670_v30 = vmul.f32 %v9681_v12, %v9681_v12 }
 0x7eb   : > { %v9686_v49 = vpop.f32.mrf.mxu1 }
 0x7ec   : > { %v4641_v21 = vadd.f32 %v4640_v43, %v9681_v12  ;;  %v4684_v58 = vadd.f32 %v4683_v19, %v4669_v16  ;;  %v5309_v55 = vpack.c.bf16 %v9686_v49, %v9676_v29  ;;  %v4673_v35 = vmul.f32 %v9686_v49, %v9686_v49 }
 0x7ed   : > { %v9693_v42 = vpop.f32.mrf.mxu1 }
 0x7ee   : > { %v4685_v45 = vadd.f32 %v4684_v58, %v4670_v30  ;;  %v4642_v57 = vadd.f32 %v4641_v21, %v9693_v42  ;;  %v4671_v28 = vmul.f32 %v9693_v42, %v9693_v42 }
 0x7ef   : > { %v9698_v25 = vpop.f32.mrf.mxu0 }
 0x7f0   : > { %v4643_v6 = vadd.f32 %v9676_v29, %v4642_v57  ;;  %v4686_v20 = vadd.f32 %v4685_v45, %v4671_v28  ;;  %v4676_v60 = vmul.f32 %v9698_v25, %v9698_v25 }
 0x7f1   : > { %v9703_v34 = vpop.f32.mrf.mxu0 }
 0x7f2   : > { %v4644_v13 = vadd.f32 %v9686_v49, %v4643_v6  ;;  %v4687_v24 = vadd.f32 %v4686_v20, %v4672_v47  ;;  %v4674_v8 = vmul.f32 %v9703_v34, %v9703_v34 }
 0x7f3   : > { %v9708_v11 = vpop.f32.mrf.mxu0 }
 0x7f4   : > { %v4645_v17 = vrot.slane %v4644_v13, 4  ;;  %v4688_v9 = vadd.f32 %v4687_v24, %v4673_v35  ;;  %v5311_v59 = vpack.c.bf16 %v9708_v11, %v9698_v25  ;;  %v4677_v38 = vmul.f32 %v9708_v11, %v9708_v11 }
 0x7f5   : > { %v9714_v44 = vpop.f32.mrf.mxu0 }
 0x7f6   : > { %v4646_v46 = vadd.f32 %v4645_v17, %v4644_v13  ;;  %v4689_v3 = vrot.slane %v4688_v9, 4  ;;  %v4651_v27 = vadd.f32 %v9714_v44, %v9703_v34  ;;  %v4675_v63 = vmul.f32 %v9714_v44, %v9714_v44 }
 0x7f7   : > { %v9722_v4 = vpop.f32.mrf.mxu0  ;;  %v5310_v50 = vpack.c.bf16 %v9714_v44, %v9703_v34 }
 0x7f8   : > { %v4647_v52 = vrot.slane %v4646_v46, 2  ;;  %v4690_v10 = vadd.f32 %v4689_v3, %v4688_v9  ;;  %v4652_v48 = vadd.f32 %v9698_v25, %v4651_v27  ;;  %v4695_v33 = vadd.f32 %v4675_v63, %v4674_v8 }
 0x7f9   : > { %v9729_v7 = vpop.f32.mrf.mxu0  ;;  %v4680_v45 = vmul.f32 %v9722_v4, %v9722_v4 }
 0x7fa   : > { %v4648_v36 = vadd.f32 %v4647_v52, %v4646_v46  ;;  %v4691_v37 = vrot.slane %v4690_v10, 2  ;;  %v4696_v32 = vadd.f32 %v4695_v33, %v4676_v60  ;;  %v4653_v39 = vadd.f32 %v9708_v11, %v4652_v48 }
 0x7fb   : > { %v4678_v54 = vmul.f32 %v9729_v7, %v9729_v7  ;;  %v9734_v26 = vpop.f32.mrf.mxu0 }
 0x7fc   : > { %v4649_v1 = vrot.slane %v4648_v36, 1  ;;  %v4692_v5 = vadd.f32 %v4691_v37, %v4690_v10  ;;  %v4654_v40 = vadd.f32 %v4653_v39, %v9729_v7  ;;  %v4697_v18 = vadd.f32 %v4696_v32, %v4677_v38  ;;  %v1007_v39 = vld [vmem:[%s10183_s16] sm:$0x3] }
 0x7fd   : > { %v5313_v62 = vpack.c.bf16 %v9734_v26, %v9722_v4  ;;  %v9739_v51 = vpop.f32.mrf.mxu0  ;;  %v4681_v20 = vmul.f32 %v9734_v26, %v9734_v26 }
 0x7fe   : > { %v4650_v61 = vadd.f32 %v4649_v1, %v4648_v36  ;;  %v4693_v31 = vrot.slane %v4692_v5, 1  ;;  %v4698_v16 = vadd.f32 %v4697_v18, %v4678_v54  ;;  %v4655_v19 = vadd.f32 %v4654_v40, %v9739_v51  ;;  %v10481_v18 = vld [vmem:[#allocation36_spill] sm:$0xff] }
 0x7ff   : > { %v4679_v43 = vmul.f32 %v9739_v51, %v9739_v51  ;;  %v9759_v40 = vrot.slane %v1007_v39, %v10433_v41 }
 0x800   : > { %v4664_v21 = vmul.f32 0.015625, %v4650_v61  ;;  %v4694_v30 = vadd.f32 %v4693_v31, %v4692_v5  ;;  %v4656_v58 = vadd.f32 %v9722_v4, %v4655_v19  ;;  %v9762_v61 = vrot.slane %v1007_v39, %v10481_v18 }
 0x801   : > { %v4699_v57 = vadd.f32 %v4698_v16, %v4679_v43 }
 0x802   : > { %v4708_v28 = vmul.f32 0.015625, %v4694_v30  ;;  %v4710_v47 = vmul.f32 %v4664_v21, %v4664_v21  ;;  %v4657_v6 = vadd.f32 %v9734_v26, %v4656_v58  ;;  %v4721_v1 = vsub.f32 %v9693_v42, %v4664_v21 }
 0x803   : > { %v4700_v35 = vadd.f32 %v4699_v57, %v4680_v45  ;;  %v4716_v31 = vsub.f32 %v9660_v23, %v4664_v21  ;;  %v4717_v16 = vsub.f32 %v9666_v2, %v4664_v21  ;;  %v4718_v19 = vsub.f32 %v9658_v0, %v4664_v21  ;;  %v6770_v0 = vld [vmem:[#allocation14 + $0x38] sm:$0xff]  }
 0x804   : > { %v4712_v13 = vsub.f32 %v4708_v28, %v4710_v47  ;;  %v4658_v24 = vrot.slane %v4657_v6, 4  ;;  %v4719_v43 = vsub.f32 %v9662_v56, %v4664_v21  ;;  %v4720_v45 = vsub.f32 %v9681_v12, %v4664_v21  ;;  %6457 = vmatprep.subr.bf16.mxu1 %v6770_v0  ;;  %v6771_v56 = vld [vmem:[#allocation14 + $0x30] sm:$0xff]  }
 0x805   : > { %v4701_v17 = vadd.f32 %v4700_v35, %v4681_v20  ;;  %v4722_v57 = vsub.f32 %v9676_v29, %v4664_v21  ;;  %v4723_v28 = vsub.f32 %v9686_v49, %v4664_v21  ;;  %6458 = vmatpush3.bf16.msra.mxu1 %v6770_v0  ;;  %v6773_v29 = vld [vmem:[#allocation14 + $0x20] sm:$0xff]   ;;  %v6774_v49 = vld [vmem:[#allocation14 + $0x18] sm:$0xff]  }
 0x806   : > { %v4714_v9 = vmax.f32 %v4712_v13, 0.0  ;;  %v4659_v8 = vadd.f32 %v4658_v24, %v4657_v6  ;;  %6459 = vmatprep.subr.bf16.mxu1 %v6771_v56 }
 0x807   : > { %v4702_v46 = vrot.slane %v4701_v17, 4 }
 0x808   : > { %v4732_v3 = vadd.f32 0.001, %v4714_v9  ;;  %v4660_v27 = vrot.slane %v4659_v8, 2 }
 0x809   : > { %v4703_v63 = vadd.f32 %v4702_v46, %v4701_v17  ;;  %6460 = vmatpush3.bf16.msra.mxu1 %v6771_v56 }
 0x80a   : > { %6890 = vrsqrt.f32 %v4732_v3  ;;  %v4661_v60 = vadd.f32 %v4660_v27, %v4659_v8 }
 0x80b   : > { %v4704_v52 = vrot.slane %v4703_v63, 2 }
 0x80c   : > { %v4662_v10 = vrot.slane %v4661_v60, 1 }
 0x80d   : > { %v4705_v48 = vadd.f32 %v4704_v52, %v4703_v63 }
 0x80e   : > { %v4663_v33 = vadd.f32 %v4662_v10, %v4661_v60 }
 0x80f   : > { %v4706_v38 = vrot.slane %v4705_v48, 1 }
 0x810   : > { %v9750_v36 = vmul.f32 0.015625, %v4663_v33 }
 0x811   : > { %v4707_v37 = vadd.f32 %v4706_v38, %v4705_v48 }
 0x812   : > { %v4711_v32 = vmul.f32 %v9750_v36, %v9750_v36 }
 0x813   : > { %v4709_v54 = vmul.f32 0.015625, %v4707_v37 }
 0x815   : > { %v4713_v5 = vsub.f32 %v4709_v54, %v4711_v32 }
 0x817   : > { %v6891_v30 = vpop.eup %6890  ;;  %v4715_v58 = vmax.f32 %v4713_v5, 0.0 }
 0x818   : > { %v4741_v47 = vmul.f32 %v6891_v30, %v4721_v1  ;;  %v4736_v6 = vmul.f32 %v6891_v30, %v4716_v31  ;;  %v4737_v20 = vmul.f32 %v6891_v30, %v4717_v16  ;;  %v4738_v35 = vmul.f32 %v6891_v30, %v4718_v19 }
 0x819   : > { %v4733_v13 = vadd.f32 0.001, %v4715_v58  ;;  %v4739_v24 = vmul.f32 %v6891_v30, %v4719_v43  ;;  %v4740_v17 = vmul.f32 %v6891_v30, %v4720_v45  ;;  %v4742_v9 = vmul.f32 %v6891_v30, %v4722_v57  ;;  %v9787_v57 = vld [vmem:[#allocation16 + $0x30] sm:$0xff]  }
 0x81a   : > { %v4756_v8 = vmul.f32 %v9759_v40, %v4736_v6  ;;  %v4757_v46 = vmul.f32 %v9759_v40, %v4737_v20  ;;  %v4758_v3 = vmul.f32 %v9759_v40, %v4738_v35  ;;  %v4761_v27 = vmul.f32 %v9759_v40, %v4741_v47  ;;  %v9791_v20 = vld [vmem:[#allocation16 + $0x28] sm:$0xff]  }
 0x81b   : > { %6892 = vrsqrt.f32 %v4733_v13  ;;  %v4759_v63 = vmul.f32 %v9759_v40, %v4739_v24  ;;  %v4760_v21 = vmul.f32 %v9759_v40, %v4740_v17  ;;  %v4743_v60 = vmul.f32 %v6891_v30, %v4723_v28 }
 0x81c   : > { %v4776_v52 = vadd.f32 %v9762_v61, %v4756_v8  ;;  %v4777_v10 = vadd.f32 %v9762_v61, %v4757_v46  ;;  %v4778_v48 = vadd.f32 %v9762_v61, %v4758_v3  ;;  %v4781_v33 = vadd.f32 %v9762_v61, %v4761_v27 }
 0x81d   : > { %v4779_v38 = vadd.f32 %v9762_v61, %v4759_v63  ;;  %v4780_v37 = vadd.f32 %v9762_v61, %v4760_v21  ;;  %v4762_v32 = vmul.f32 %v9759_v40, %v4742_v9  ;;  %v4763_v39 = vmul.f32 %v9759_v40, %v4743_v60  ;;  %v9811_v60 = vld [vmem:[#allocation16 + $0x20] sm:$0xff]  }
 0x81e   : > { %v4792_v54 = vmax.f32 %v4776_v52, 0.0  ;;  %v4793_v1 = vmax.f32 %v4777_v10, 0.0  ;;  %v4794_v5 = vmax.f32 %v4778_v48, 0.0  ;;  %v4797_v31 = vmax.f32 %v4781_v33, 0.0 }
 0x81f   : > { %v4795_v16 = vmax.f32 %v4779_v38, 0.0  ;;  %v4796_v19 = vmax.f32 %v4780_v37, 0.0  ;;  %v4782_v30 = vadd.f32 %v9762_v61, %v4762_v32  ;;  %v4783_v58 = vadd.f32 %v9762_v61, %v4763_v39 }
 0x820   : > { %v4808_v43 = vpack.c.bf16 %v4793_v1, %v4792_v54  ;;  %v4729_v35 = vsub.f32 %v9739_v51, %v9750_v36  ;;  %v4724_v13 = vsub.f32 %v9703_v34, %v9750_v36  ;;  %v4725_v24 = vsub.f32 %v9714_v44, %v9750_v36 }
 0x821   : > { %v4809_v45 = vpack.c.bf16 %v4795_v16, %v4794_v5  ;;  %v4810_v28 = vpack.c.bf16 %v4797_v31, %v4796_v19  ;;  %v4798_v47 = vmax.f32 %v4782_v30, 0.0  ;;  %v4799_v6 = vmax.f32 %v4783_v58, 0.0  ;;  %v9824_v30 = vld [vmem:[#allocation16 + $0x18] sm:$0xff]  }
 0x822   : > { %6441 = vmatprep.mubr.bf16.mxu0 %v4808_v43  ;;  %v4726_v17 = vsub.f32 %v9698_v25, %v9750_v36  ;;  %v4727_v9 = vsub.f32 %v9708_v11, %v9750_v36  ;;  %v4728_v3 = vsub.f32 %v9729_v7, %v9750_v36  ;;  %v4730_v27 = vsub.f32 %v9722_v4, %v9750_v36  ;;  %v6777_v25 = vld [vmem:[#allocation14] sm:$0xff]  }
 0x823   : > { %6442 = vmatmul.mubr.bf16.vlgmr.msra.gmra.mxu0 %v4809_v45  ;;  %v4811_v46 = vpack.c.bf16 %v4799_v6, %v4798_v47  ;;  %v4731_v63 = vsub.f32 %v9734_v26, %v9750_v36 }
 0x824   : > { %6445 = vmatprep.mubr.bf16.mxu0 %v4810_v28  ;;  %6490 = vmatpush3.bf16.msra.mxu0 %v9655_v22 }
 0x825   : > { %6491 = vmatprep.subr.bf16.mxu0 %v9787_v57 }
 0x828   : > { %v6893_v8 = vpop.eup %6892  ;;  %6492 = vmatpush3.bf16.msra.mxu0 %v9787_v57 }
 0x829   : > { %v4749_v21 = vmul.f32 %v6893_v8, %v4729_v35  ;;  %6493 = vmatprep.subr.bf16.mxu0 %v9791_v20  ;;  %v4744_v52 = vmul.f32 %v6893_v8, %v4724_v13  ;;  %v4745_v10 = vmul.f32 %v6893_v8, %v4725_v24  ;;  %v4746_v48 = vmul.f32 %v6893_v8, %v4726_v17 }
 0x82a   : > { %v4747_v33 = vmul.f32 %v6893_v8, %v4727_v9  ;;  %v4748_v38 = vmul.f32 %v6893_v8, %v4728_v3  ;;  %v4750_v37 = vmul.f32 %v6893_v8, %v4730_v27  ;;  %v4751_v32 = vmul.f32 %v6893_v8, %v4731_v63  ;;  %v9833_v27 = vld [vmem:[#allocation16 + $0x10] sm:$0xff]  }
 0x82b   : > { %6446 = vmatmul.mubr.bf16.gmra.mxu0 %v4811_v46  ;;  %v4764_v39 = vmul.f32 %v9759_v40, %v4744_v52  ;;  %v4765_v54 = vmul.f32 %v9759_v40, %v4745_v10  ;;  %v4766_v1 = vmul.f32 %v9759_v40, %v4746_v48  ;;  %v4769_v36 = vmul.f32 %v9759_v40, %v4749_v21  ;;  %v9839_v48 = vld [vmem:[#allocation16 + $0x8] sm:$0xff]  }
 0x82c   : > { %6494 = vmatpush3.bf16.msra.mxu0 %v9791_v20  ;;  %v4767_v5 = vmul.f32 %v9759_v40, %v4747_v33  ;;  %v4768_v31 = vmul.f32 %v9759_v40, %v4748_v38  ;;  %v4770_v47 = vmul.f32 %v9759_v40, %v4750_v37  ;;  %v4771_v6 = vmul.f32 %v9759_v40, %v4751_v32  ;;  %v9843_v38 = vld [vmem:[#allocation16] sm:$0xff]  }
 0x82d   : > { %6495 = vmatprep.subr.bf16.mxu0 %v9811_v60  ;;  %v4784_v16 = vadd.f32 %v9762_v61, %v4764_v39  ;;  %v4785_v19 = vadd.f32 %v9762_v61, %v4765_v54  ;;  %v4786_v43 = vadd.f32 %v9762_v61, %v4766_v1  ;;  %v4789_v58 = vadd.f32 %v9762_v61, %v4769_v36 }
 0x82e   : > { %v4787_v45 = vadd.f32 %v9762_v61, %v4767_v5  ;;  %v4788_v28 = vadd.f32 %v9762_v61, %v4768_v31  ;;  %v4790_v63 = vadd.f32 %v9762_v61, %v4770_v47  ;;  %v4791_v21 = vadd.f32 %v9762_v61, %v4771_v6 }
 0x82f   : > { %v4800_v35 = vmax.f32 %v4784_v16, 0.0  ;;  %v4801_v13 = vmax.f32 %v4785_v19, 0.0  ;;  %v4802_v24 = vmax.f32 %v4786_v43, 0.0  ;;  %v4805_v17 = vmax.f32 %v4789_v58, 0.0 }
 0x830   : > { %6496 = vmatpush3.bf16.msra.mxu0 %v9811_v60  ;;  %v4803_v9 = vmax.f32 %v4787_v45, 0.0  ;;  %v4804_v8 = vmax.f32 %v4788_v28, 0.0  ;;  %v4806_v52 = vmax.f32 %v4790_v63, 0.0  ;;  %v4807_v10 = vmax.f32 %v4791_v21, 0.0 }
 0x831   : > { %v4812_v46 = vpack.c.bf16 %v4801_v13, %v4800_v35  ;;  %6497 = vmatprep.subr.bf16.mxu0 %v9824_v30  ;;  %v5308_v61 = vpack.c.bf16 %v9693_v42, %v9681_v12  ;;  %v6776_v42 = vld [vmem:[#allocation14 + $0x8] sm:$0xff]  }
 0x832   : > { %v4813_v3 = vpack.c.bf16 %v4803_v9, %v4802_v24  ;;  %v4814_v40 = vpack.c.bf16 %v4805_v17, %v4804_v8  ;;  %v4815_v33 = vpack.c.bf16 %v4807_v10, %v4806_v52 }
 0x833   : > { %6449 = vmatprep.mubr.bf16.mxu0 %v4812_v46 }
 0x834   : > { %6450 = vmatmul.mubr.bf16.gmra.mxu0 %v4813_v3 }
 0x835   : > { %6453 = vmatprep.mubr.bf16.mxu0 %v4814_v40  ;;  %6498 = vmatpush3.bf16.msra.mxu0 %v9824_v30 }
 0x836   : > { %6499 = vmatprep.subr.bf16.mxu0 %v9833_v27 }
 0x839   : > { %6500 = vmatpush3.bf16.msra.mxu0 %v9833_v27 }
 0x83a   : > { %6501 = vmatprep.subr.bf16.mxu0 %v9839_v48 }
 0x83c   : > { %6454 = vmatmul.mubr.bf16.gmra.mxu0 %v4815_v33 }
 0x83d   : > { %6502 = vmatpush3.bf16.msra.mxu0 %v9839_v48  ;;  %6505 = vmatprep.mubr.bf16.mxu0 %v5306_v53 }
 0x83e   : > { %6503 = vmatprep.subr.bf16.mxu0 %v9843_v38 }
 0x841   : > { %6504 = vmatpush3.bf16.msra.mxu0 %v9843_v38 }
 0x844   : > { %6506 = vmatmul.mubr.bf16.vlgmr.msra.gmra.mxu0 %v5307_v14  ;;  %v6772_v14 = vld [vmem:[#allocation14 + $0x28] sm:$0xff]  }
 0x845   : > { %6509 = vmatprep.mubr.bf16.mxu0 %v5308_v61  ;;  %6461 = vmatprep.subr.bf16.mxu1 %v6772_v14 }
 0x846   : > { %6462 = vmatpush3.bf16.msra.mxu1 %v6772_v14 }
 0x847   : > { %6463 = vmatprep.subr.bf16.mxu1 %v6773_v29 }
 0x84a   : > { %6464 = vmatpush3.bf16.msra.mxu1 %v6773_v29 }
 0x84b   : > { %6465 = vmatprep.subr.bf16.mxu1 %v6774_v49 }
 0x84c   : > { %6510 = vmatmul.mubr.bf16.gmra.mxu0 %v5309_v55  ;;  %v6775_v55 = vld [vmem:[#allocation14 + $0x10] sm:$0xff]  }
 0x84d   : > { %6513 = vmatprep.mubr.bf16.mxu0 %v5310_v50 }
 0x84e   : > { %6466 = vmatpush3.bf16.msra.mxu1 %v6774_v49 }
 0x84f   : > { %6467 = vmatprep.subr.bf16.mxu1 %v6775_v55 }
 0x851   : > { %v9862_v23 = vpop.f32.mrf.mxu1 }
 0x852   : > { %6468 = vmatpush3.bf16.msra.mxu1 %v6775_v55 }
 0x853   : > { %v6423_v2 = vpop.f32.mrf.mxu1  ;;  %6469 = vmatprep.subr.bf16.mxu1 %v6776_v42 }
 0x854   : > { %6514 = vmatmul.mubr.bf16.gmra.mxu0 %v5311_v59 }
 0x855   : > { %v4635_v53 = vpop.f32.mrf.mxu1 }
 0x856   : > { %6470 = vmatpush3.bf16.msra.mxu1 %v6776_v42 }
 0x857   : > { %v6424_v12 = vpop.f32.mrf.mxu1  ;;  %6471 = vmatprep.subr.bf16.mxu1 %v6777_v25 }
 0x85a   : > { %6472 = vmatpush3.bf16.msra.mxu1 %v6777_v25 }
 0x85b   : > { %6521 = vmatprep.subr.bf16.mxu1 %v9655_v22 }
 0x8e3   : > { %v9868_v34 = vpop.f32.mrf.mxu0 }
 0x8e4   : > { %v4991_v54 = vmul.f32 %v9868_v34, %v9868_v34 }
 0x8e5   : > { %v9870_v11 = vpop.f32.mrf.mxu0 }
 0x8e6   : > { %v4989_v50 = vmul.f32 %v9870_v11, %v9870_v11 }
 0x8e7   : > { %v9872_v59 = vpop.f32.mrf.mxu0 }
 0x8e8   : > { %v4992_v31 = vmul.f32 %v9872_v59, %v9872_v59 }
 0x8e9   : > { %v9874_v44 = vpop.f32.mrf.mxu0 }
 0x8ea   : > { %v4961_v37 = vadd.f32 %v9874_v44, %v9870_v11  ;;  %v4990_v32 = vmul.f32 %v9874_v44, %v9874_v44 }
 0x8eb   : > { %v9882_v39 = vpop.f32.mrf.mxu0 }
 0x8ec   : > { %v4962_v1 = vadd.f32 %v9868_v34, %v4961_v37  ;;  %v5005_v36 = vadd.f32 %v4990_v32, %v4989_v50  ;;  %v4995_v24 = vmul.f32 %v9882_v39, %v9882_v39 }
 0x8ed   : > { %v9887_v5 = vpop.f32.mrf.mxu0 }
 0x8ee   : > { %v5006_v16 = vadd.f32 %v5005_v36, %v4991_v54  ;;  %v4963_v19 = vadd.f32 %v9872_v59, %v4962_v1  ;;  %v4993_v45 = vmul.f32 %v9887_v5, %v9887_v5 }
 0x8ef   : > { %v9892_v43 = vpop.f32.mrf.mxu0 }
 0x8f0   : > { %v4964_v58 = vadd.f32 %v4963_v19, %v9887_v5  ;;  %v5007_v28 = vadd.f32 %v5006_v16, %v4992_v31  ;;  %v4996_v46 = vmul.f32 %v9892_v43, %v9892_v43 }
 0x8f1   : > { %v9897_v47 = vpop.f32.mrf.mxu0 }
 0x8f2   : > { %v5008_v6 = vadd.f32 %v5007_v28, %v4993_v45  ;;  %v4965_v35 = vadd.f32 %v4964_v58, %v9897_v47  ;;  %v4994_v13 = vmul.f32 %v9897_v47, %v9897_v47 }
 0x8f4   : > { %v4966_v17 = vadd.f32 %v9882_v39, %v4965_v35  ;;  %v5009_v9 = vadd.f32 %v5008_v6, %v4994_v13  ;;  %v9905_v8 = vpop.f32.mrf.mxu0 }
 0x8f5   : > { %v4999_v49 = vmul.f32 %v9905_v8, %v9905_v8 }
 0x8f6   : > { %v4967_v3 = vadd.f32 %v9892_v43, %v4966_v17  ;;  %v5010_v63 = vadd.f32 %v5009_v9, %v4995_v24  ;;  %v9910_v21 = vpop.f32.mrf.mxu0 }
 0x8f7   : > { %v4997_v53 = vmul.f32 %v9910_v21, %v9910_v21 }
 0x8f8   : > { %v4968_v40 = vrot.slane %v4967_v3, 4  ;;  %v5011_v52 = vadd.f32 %v5010_v63, %v4996_v46  ;;  %v9912_v10 = vpop.f32.mrf.mxu0 }
 0x8f9   : > { %v5000_v32 = vmul.f32 %v9912_v10, %v9912_v10 }
 0x8fa   : > { %v4969_v33 = vadd.f32 %v4968_v40, %v4967_v3  ;;  %v5012_v61 = vrot.slane %v5011_v52, 4  ;;  %v9914_v2 = vpop.f32.mrf.mxu0 }
 0x8fb   : > { %v4974_v12 = vadd.f32 %v9914_v2, %v9910_v21  ;;  %v4998_v0 = vmul.f32 %v9914_v2, %v9914_v2 }
 0x8fc   : > { %v4970_v56 = vrot.slane %v4969_v33, 2  ;;  %v5013_v14 = vadd.f32 %v5012_v61, %v5011_v52  ;;  %v9922_v29 = vpop.f32.mrf.mxu0 }
 0x8fd   : > { %v4975_v55 = vadd.f32 %v9905_v8, %v4974_v12  ;;  %v5018_v42 = vadd.f32 %v4998_v0, %v4997_v53  ;;  %v5003_v3 = vmul.f32 %v9922_v29, %v9922_v29 }
 0x8fe   : > { %v4971_v25 = vadd.f32 %v4970_v56, %v4969_v33  ;;  %v5014_v50 = vrot.slane %v5013_v14, 2  ;;  %v9927_v37 = vpop.f32.mrf.mxu0 }
 0x8ff   : > { %v5019_v54 = vadd.f32 %v5018_v42, %v4999_v49  ;;  %v4976_v1 = vadd.f32 %v9912_v10, %v4975_v55  ;;  %v5001_v58 = vmul.f32 %v9927_v37, %v9927_v37 }
 0x900   : > { %v4972_v36 = vrot.slane %v4971_v25, 1  ;;  %v5015_v31 = vadd.f32 %v5014_v50, %v5013_v14  ;;  %v9932_v16 = vpop.f32.mrf.mxu0 }
 0x901   : > { %v4977_v19 = vadd.f32 %v4976_v1, %v9927_v37  ;;  %v5020_v45 = vadd.f32 %v5019_v54, %v5000_v32  ;;  %v5004_v61 = vmul.f32 %v9932_v16, %v9932_v16 }
 0x902   : > { %v4973_v28 = vadd.f32 %v4972_v36, %v4971_v25  ;;  %v5016_v6 = vrot.slane %v5015_v31, 1  ;;  %v9937_v35 = vpop.f32.mrf.mxu0 }
 0x903   : > { %v5021_v13 = vadd.f32 %v5020_v45, %v5001_v58  ;;  %v4978_v24 = vadd.f32 %v4977_v19, %v9937_v35  ;;  %v5002_v17 = vmul.f32 %v9937_v35, %v9937_v35 }
 0x904   : > { %v9942_v9 = vmul.f32 0.015625, %v4973_v28  ;;  %v5017_v46 = vadd.f32 %v5016_v6, %v5015_v31  ;;  %v1024_v6 = vld [vmem:[%s10185_s18] sm:$0x3] }
 0x905   : > { %v4979_v63 = vadd.f32 %v9922_v29, %v4978_v24  ;;  %v5022_v40 = vadd.f32 %v5021_v13, %v5002_v17  ;;  %v9960_v17 = vrot.slane %v1024_v6, %v10433_v41 }
 0x906   : > { %v5031_v52 = vmul.f32 0.015625, %v5017_v46  ;;  %v5033_v33 = vmul.f32 %v9942_v9, %v9942_v9 }
 0x907   : > { %v4980_v53 = vadd.f32 %v9932_v16, %v4979_v63  ;;  %v5023_v12 = vadd.f32 %v5022_v40, %v5003_v3  ;;  %v9963_v3 = vrot.slane %v1024_v6, %v10481_v18  ;;  %v5044_v63 = vsub.f32 %v9897_v47, %v9942_v9 }
 0x908   : > { %v5035_v0 = vsub.f32 %v5031_v52, %v5033_v33  ;;  %v5039_v40 = vsub.f32 %v9870_v11, %v9942_v9  ;;  %v5040_v52 = vsub.f32 %v9874_v44, %v9942_v9  ;;  %v5041_v33 = vsub.f32 %v9868_v34, %v9942_v9 }
 0x909   : > { %v4981_v56 = vrot.slane %v4980_v53, 4  ;;  %v5024_v14 = vadd.f32 %v5023_v12, %v5004_v61  ;;  %v5042_v12 = vsub.f32 %v9872_v59, %v9942_v9  ;;  %v5043_v18 = vsub.f32 %v9887_v5, %v9942_v9 }
 0x90a   : > { %v5037_v49 = vmax.f32 %v5035_v0, 0.0  ;;  %v5045_v47 = vsub.f32 %v9882_v39, %v9942_v9  ;;  %v5046_v34 = vsub.f32 %v9892_v43, %v9942_v9 }
 0x90b   : > { %v4982_v55 = vadd.f32 %v4981_v56, %v4980_v53  ;;  %v5025_v42 = vrot.slane %v5024_v14, 4 }
 0x90c   : > { %v5055_v25 = vadd.f32 0.001, %v5037_v49 }
 0x90d   : > { %v4983_v50 = vrot.slane %v4982_v55, 2  ;;  %v5026_v32 = vadd.f32 %v5025_v42, %v5024_v14 }
 0x90e   : > { %6894 = vrsqrt.f32 %v5055_v25 }
 0x90f   : > { %v4984_v54 = vadd.f32 %v4983_v50, %v4982_v55  ;;  %v5027_v1 = vrot.slane %v5026_v32, 2 }
 0x911   : > { %v4985_v36 = vrot.slane %v4984_v54, 1  ;;  %v5028_v31 = vadd.f32 %v5027_v1, %v5026_v32 }
 0x913   : > { %v4986_v19 = vadd.f32 %v4985_v36, %v4984_v54  ;;  %v5029_v58 = vrot.slane %v5028_v31, 1 }
 0x915   : > { %v9952_v45 = vmul.f32 0.015625, %v4986_v19  ;;  %v5030_v28 = vadd.f32 %v5029_v58, %v5028_v31 }
 0x917   : > { %v5032_v13 = vmul.f32 0.015625, %v5030_v28  ;;  %v5034_v24 = vmul.f32 %v9952_v45, %v9952_v45 }
 0x919   : > { %v5036_v46 = vsub.f32 %v5032_v13, %v5034_v24 }
 0x91b   : > { %v6895_v61 = vpop.eup %6894  ;;  %v5038_v53 = vmax.f32 %v5036_v46, 0.0 }
 0x91c   : > { %v5064_v0 = vmul.f32 %v6895_v61, %v5044_v63  ;;  %v5059_v56 = vmul.f32 %v6895_v61, %v5039_v40  ;;  %v5060_v11 = vmul.f32 %v6895_v61, %v5040_v52  ;;  %v5061_v14 = vmul.f32 %v6895_v61, %v5041_v33 }
 0x91d   : > { %v5056_v49 = vadd.f32 0.001, %v5038_v53  ;;  %v5062_v44 = vmul.f32 %v6895_v61, %v5042_v12  ;;  %v5063_v55 = vmul.f32 %v6895_v61, %v5043_v18  ;;  %v5065_v32 = vmul.f32 %v6895_v61, %v5045_v47 }
 0x91e   : > { %v5084_v42 = vmul.f32 %v9960_v17, %v5064_v0  ;;  %v5079_v59 = vmul.f32 %v9960_v17, %v5059_v56  ;;  %v5080_v25 = vmul.f32 %v9960_v17, %v5060_v11  ;;  %v5081_v5 = vmul.f32 %v9960_v17, %v5061_v14 }
 0x91f   : > { %6896 = vrsqrt.f32 %v5056_v49  ;;  %v5082_v39 = vmul.f32 %v9960_v17, %v5062_v44  ;;  %v5083_v50 = vmul.f32 %v9960_v17, %v5063_v55  ;;  %v5066_v19 = vmul.f32 %v6895_v61, %v5046_v34 }
 0x920   : > { %v5099_v54 = vadd.f32 %v9963_v3, %v5079_v59  ;;  %v5100_v1 = vadd.f32 %v9963_v3, %v5080_v25  ;;  %v5101_v43 = vadd.f32 %v9963_v3, %v5081_v5  ;;  %v5104_v9 = vadd.f32 %v9963_v3, %v5084_v42 }
 0x921   : > { %v5102_v36 = vadd.f32 %v9963_v3, %v5082_v39  ;;  %v5103_v31 = vadd.f32 %v9963_v3, %v5083_v50  ;;  %v5085_v58 = vmul.f32 %v9960_v17, %v5065_v32  ;;  %v5086_v40 = vmul.f32 %v9960_v17, %v5066_v19 }
 0x922   : > { %v5115_v28 = vmax.f32 %v5099_v54, 0.0  ;;  %v5116_v6 = vmax.f32 %v5100_v1, 0.0  ;;  %v5117_v13 = vmax.f32 %v5101_v43, 0.0  ;;  %v5120_v24 = vmax.f32 %v5104_v9, 0.0 }
 0x923   : > { %v5118_v46 = vmax.f32 %v5102_v36, 0.0  ;;  %v5119_v63 = vmax.f32 %v5103_v31, 0.0  ;;  %v5105_v33 = vadd.f32 %v9963_v3, %v5085_v58  ;;  %v5106_v12 = vadd.f32 %v9963_v3, %v5086_v40 }
 0x924   : > { %v5131_v52 = vpack.c.bf16 %v5116_v6, %v5115_v28  ;;  %v5052_v0 = vsub.f32 %v9937_v35, %v9952_v45  ;;  %v5047_v56 = vsub.f32 %v9910_v21, %v9952_v45  ;;  %v5048_v11 = vsub.f32 %v9914_v2, %v9952_v45 }
 0x925   : > { %v5132_v53 = vpack.c.bf16 %v5118_v46, %v5117_v13  ;;  %v5133_v18 = vpack.c.bf16 %v5120_v24, %v5119_v63  ;;  %v5121_v61 = vmax.f32 %v5105_v33, 0.0  ;;  %v5122_v47 = vmax.f32 %v5106_v12, 0.0 }
 0x926   : > { %6473 = vmatprep.mubr.bf16.mxu1 %v5131_v52  ;;  %v5049_v14 = vsub.f32 %v9905_v8, %v9952_v45  ;;  %v5050_v49 = vsub.f32 %v9912_v10, %v9952_v45  ;;  %v5051_v55 = vsub.f32 %v9927_v37, %v9952_v45  ;;  %v5053_v35 = vsub.f32 %v9922_v29, %v9952_v45 }
 0x927   : > { %6474 = vmatmul.mubr.bf16.vlgmr.msra.gmra.mxu1 %v5132_v53  ;;  %v5134_v44 = vpack.c.bf16 %v5122_v47, %v5121_v61  ;;  %v5054_v21 = vsub.f32 %v9932_v16, %v9952_v45  ;;  %v5312_v53 = vpack.c.bf16 %v9739_v51, %v9729_v7 }
 0x928   : > { %6477 = vmatprep.mubr.bf16.mxu1 %v5133_v18  ;;  %6529 = vmatpush3.bf16.msra.mxu1 %v9655_v22 }
 0x929   : > { %6522 = vmatprep.subr.bf16.mxu1 %v9787_v57 }
 0x92c   : > { %v6897_v22 = vpop.eup %6896  ;;  %6530 = vmatpush3.bf16.msra.mxu1 %v9787_v57 }
 0x92d   : > { %v5072_v2 = vmul.f32 %v6897_v22, %v5052_v0  ;;  %6523 = vmatprep.subr.bf16.mxu1 %v9791_v20  ;;  %v5067_v8 = vmul.f32 %v6897_v22, %v5047_v56  ;;  %v5068_v34 = vmul.f32 %v6897_v22, %v5048_v11  ;;  %v5069_v42 = vmul.f32 %v6897_v22, %v5049_v14  ;;  %v10061_v56 = vld [vmem:[%s10482_s8] ss:$0 sm:$0xff]  ;;  %s7166_s8 = sshll.u32 %s7265_s29, 4  ;;  %s7167_s8 = int_to_ptr.vmem [resolvable:$false] %s7166_s8 }
 0x92e   : > { %v5070_v10 = vmul.f32 %v6897_v22, %v5050_v49  ;;  %v5071_v59 = vmul.f32 %v6897_v22, %v5051_v55  ;;  %v5073_v25 = vmul.f32 %v6897_v22, %v5053_v35  ;;  %v5074_v57 = vmul.f32 %v6897_v22, %v5054_v21  ;;  %s7168_s2 = scalar_lea.vmem %s7167_s8, 4096  ;;  %p7169_p1 = scmp.lt.s32.totalorder %s10121_s20, %s7167_s8 }
 0x92f   : > { %v5092_v5 = vmul.f32 %v9960_v17, %v5072_v2  ;;  %6478 = vmatmul.mubr.bf16.gmra.mxu1 %v5134_v44  ;;  %v5087_v37 = vmul.f32 %v9960_v17, %v5067_v8  ;;  %v5088_v29 = vmul.f32 %v9960_v17, %v5068_v34  ;;  %v5089_v39 = vmul.f32 %v9960_v17, %v5069_v42  ;;  %p7170_p5 = scmp.lt.s32.totalorder %s7168_s2, %s7162_s24 }
 0x930   : > { %6531 = vmatpush3.bf16.msra.mxu1 %v9791_v20  ;;  %v5090_v16 = vmul.f32 %v9960_v17, %v5070_v10  ;;  %v5091_v45 = vmul.f32 %v9960_v17, %v5071_v59  ;;  %v5093_v20 = vmul.f32 %v9960_v17, %v5073_v25  ;;  %v5094_v36 = vmul.f32 %v9960_v17, %v5074_v57 }
 0x931   : > { %6524 = vmatprep.subr.bf16.mxu1 %v9811_v60  ;;  %v5107_v50 = vadd.f32 %v9963_v3, %v5087_v37  ;;  %v5108_v32 = vadd.f32 %v9963_v3, %v5088_v29  ;;  %v5109_v54 = vadd.f32 %v9963_v3, %v5089_v39  ;;  %v5112_v1 = vadd.f32 %v9963_v3, %v5092_v5  ;;  %p7171_p12 = por %p7170_p5, %p7169_p1 }
 0x932   : > { %v5110_v43 = vadd.f32 %v9963_v3, %v5090_v16  ;;  %v5111_v9 = vadd.f32 %v9963_v3, %v5091_v45  ;;  %v5113_v63 = vadd.f32 %v9963_v3, %v5093_v20  ;;  %v5114_v40 = vadd.f32 %v9963_v3, %v5094_v36 }
 0x933   : > { %v5123_v31 = vmax.f32 %v5107_v50, 0.0  ;;  %v5124_v19 = vmax.f32 %v5108_v32, 0.0  ;;  %v5125_v58 = vmax.f32 %v5109_v54, 0.0  ;;  %v5128_v28 = vmax.f32 %v5112_v1, 0.0  ;;  %p7172_p6 = pnand %p7171_p12, %p7165_p3 }
 0x934   : > { %6532 = vmatpush3.bf16.msra.mxu1 %v9811_v60  ;;  %v5126_v6 = vmax.f32 %v5110_v43, 0.0  ;;  %v5127_v13 = vmax.f32 %v5111_v9, 0.0  ;;  %v5129_v17 = vmax.f32 %v5113_v63, 0.0  ;;  %v5130_v60 = vmax.f32 %v5114_v40, 0.0 }
 0x935   : > { %v5135_v24 = vpack.c.bf16 %v5124_v19, %v5123_v31  ;;  %6525 = vmatprep.subr.bf16.mxu1 %v9824_v30  ;;  %v7264_v3 = vmov 1966171168  }
 0x936   : > { %v5136_v46 = vpack.c.bf16 %v5126_v6, %v5125_v58  ;;  %v5137_v52 = vpack.c.bf16 %v5128_v28, %v5127_v13  ;;  %v5138_v33 = vpack.c.bf16 %v5130_v60, %v5129_v17  ;;  %v5483_v12 = vunpack.c.l.s4 %v7264_v3 }
 0x937   : > { %6481 = vmatprep.mubr.bf16.mxu1 %v5135_v24 }
 0x938   : > { %6482 = vmatmul.mubr.bf16.gmra.mxu1 %v5136_v46  ;;  %v5484_v7 = vunpack.c.0.s8 %v5483_v12 }
 0x939   : > { %6485 = vmatprep.mubr.bf16.mxu1 %v5137_v52  ;;  %6533 = vmatpush3.bf16.msra.mxu1 %v9824_v30  ;;  %v6507_v30 = vpop.f32.mrf.mxu0 }
 0x93a   : > { %6526 = vmatprep.subr.bf16.mxu1 %v9833_v27 }
 0x93d   : > { %6534 = vmatpush3.bf16.msra.mxu1 %v9833_v27  ;;  %v5396_v27 = vpop.f32.mrf.mxu0 }
 0x93e   : > { %6527 = vmatprep.subr.bf16.mxu1 %v9839_v48 }
 0x93f   : > { %v6508_v18 = vpop.f32.mrf.mxu0 }
 0x940   : > { %6486 = vmatmul.mubr.bf16.gmra.mxu1 %v5138_v33 }
 0x941   : > { %6535 = vmatpush3.bf16.msra.mxu1 %v9839_v48  ;;  %6517 = vmatprep.mubr.bf16.mxu1 %v5312_v53  ;;  %v5399_v51 = vpop.f32.mrf.mxu0  ;;  %v5487_v48 = vsub.s32 %v5484_v7, %v10480_v15 }
 0x942   : > { %6528 = vmatprep.subr.bf16.mxu1 %v9843_v38 }
 0x943   : > { %v6511_v61 = vpop.f32.mrf.mxu0  ;;  %v5488_v47 = vrot.slane %v9862_v23, %v5487_v48 }
 0x945   : > { %6536 = vmatpush3.bf16.msra.mxu1 %v9843_v38  ;;  %v5412_v0 = vpop.f32.mrf.mxu0  ;;  %v10054_v38 = vld [vmem:[%s10190_s23] ss:$0 sm:$0xff]  ;;  %v5496_v4 = vrot.slane %v5488_v47, %v5487_v48  ;;  %v5489_v45 = vcombine.high %v5488_v47, %v5488_v47 }
 0x946   : > { %v5467_v26 = vadd.f32 %v6507_v30, %v10054_v38  ;;  %v5465_v23 = vadd.f32 %v10054_v38, %v5396_v27  ;;  %v5468_v49 = vadd.f32 %v6508_v18, %v10054_v38  ;;  %v5466_v21 = vadd.f32 %v10054_v38, %v5399_v51 }
 0x947   : > { %v5507_v15 = vrot.slane %v5496_v4, %v10433_v41  ;;  %v5471_v10 = vadd.f32 %v6511_v61, %v10054_v38  ;;  %v5469_v29 = vadd.f32 %v10054_v38, %v5412_v0  ;;  %v5503_v28 = vrot.slane %v5489_v45, %v5487_v48 }
 0x948   : > { %6518 = vmatmul.mubr.bf16.vlgmr.msra.gmra.mxu1 %v5313_v62  ;;  %v6512_v62 = vpop.f32.mrf.mxu0 }
 0x949   : > { %v5516_v14 = vadd.f32 %v5507_v15, %v5467_v26  ;;  %v5514_v35 = vadd.f32 %v5507_v15, %v5465_v23  ;;  %v5517_v42 = vadd.f32 %v5507_v15, %v5468_v49  ;;  %v5515_v37 = vadd.f32 %v5507_v15, %v5466_v21 }
 0x94a   : > { %v5415_v22 = vpop.f32.mrf.mxu0  ;;  %v5520_v32 = vadd.f32 %v5507_v15, %v5471_v10  ;;  %v5472_v54 = vadd.f32 %v6512_v62, %v10054_v38  ;;  %v5518_v36 = vadd.f32 %v5507_v15, %v5469_v29  ;;  %v5511_v53 = vrot.slane %v5503_v28, %v10433_v41 }
 0x94b   : > { %v5470_v31 = vadd.f32 %v10054_v38, %v5415_v22 }
 0x94c   : > { %v6515_v59 = vpop.f32.mrf.mxu0  ;;  %v5521_v13 = vadd.f32 %v5507_v15, %v5472_v54 }
 0x94d   : > { %v5475_v40 = vadd.f32 %v6515_v59, %v10054_v38  ;;  %v5519_v17 = vadd.f32 %v5507_v15, %v5470_v31 }
 0x94e   : > { %v5428_v1 = vpop.f32.mrf.mxu0 }
 0x94f   : > { %v5473_v30 = vadd.f32 %v10054_v38, %v5428_v1  ;;  %v5524_v18 = vadd.f32 %v5511_v53, %v5475_v40 }
 0x950   : > { %v6516_v24 = vpop.f32.mrf.mxu0 }
 0x951   : > { %v5476_v7 = vadd.f32 %v6516_v24, %v10054_v38  ;;  %v5522_v61 = vadd.f32 %v5511_v53, %v5473_v30 }
 0x952   : > { %v5431_v27 = vpop.f32.mrf.mxu0 }
 0x953   : > { %v5474_v47 = vadd.f32 %v10054_v38, %v5431_v27  ;;  %v5525_v26 = vadd.f32 %v5511_v53, %v5476_v7 }
 0x9e7   : > { %v6475_v11 = vpop.f32.mrf.mxu1 }
 0x9e8   : > { %v5292_v44 = vadd.f32 %v6475_v11, %v10061_v56  ;;  %v5523_v11 = vadd.f32 %v5511_v53, %v5474_v47 }
 0x9e9   : > { %v5221_v55 = vpop.f32.mrf.mxu1 }
 0x9ea   : > { %v5532_v2 = vadd.f32 %v5516_v14, %v5292_v44  ;;  %v5290_v8 = vadd.f32 %v10061_v56, %v5221_v55 }
 0x9eb   : > { %v6476_v34 = vpop.f32.mrf.mxu1 }
 0x9ec   : > { %5548 = vst [vmem:[%s10072_s4 + $0x10] sm:$0xff] %v5532_v2  ;;  %v5530_v25 = vadd.f32 %v5514_v35, %v5290_v8  ;;  %v5293_v57 = vadd.f32 %v6476_v34, %v10061_v56 }
 0x9ed   : > { %v5224_v5 = vpop.f32.mrf.mxu1 }
 0x9ee   : > { %5546 = vst [vmem:[%s10072_s4] sm:$0xff] %v5530_v25  ;;  %v5533_v39 = vadd.f32 %v5517_v42, %v5293_v57  ;;  %v5291_v16 = vadd.f32 %v10061_v56, %v5224_v5 }
 0x9ef   : > { %v6479_v50 = vpop.f32.mrf.mxu1 }
 0x9f0   : > { %5549 = vst [vmem:[%s10072_s4 + $0x18] sm:$0xff] %v5533_v39  ;;  %v5531_v43 = vadd.f32 %v5515_v37, %v5291_v16  ;;  %v5296_v9 = vadd.f32 %v6479_v50, %v10061_v56 }
 0x9f1   : > { %v5237_v20 = vpop.f32.mrf.mxu1 }
 0x9f2   : > { %5547 = vst [vmem:[%s10072_s4 + $0x8] sm:$0xff] %v5531_v43  ;;  %v5536_v19 = vadd.f32 %v5520_v32, %v5296_v9  ;;  %v5294_v58 = vadd.f32 %v10061_v56, %v5237_v20 }
 0x9f3   : > { %v6480_v6 = vpop.f32.mrf.mxu1 }
 0x9f4   : > { %5552 = vst [vmem:[%s10072_s4 + $0x30] sm:$0xff] %v5536_v19  ;;  %v5534_v46 = vadd.f32 %v5518_v36, %v5294_v58  ;;  %v5297_v63 = vadd.f32 %v6480_v6, %v10061_v56 }
 0x9f5   : > { %v5240_v52 = vpop.f32.mrf.mxu1 }
 0x9f6   : > { %5550 = vst [vmem:[%s10072_s4 + $0x20] sm:$0xff] %v5534_v46  ;;  %v5537_v60 = vadd.f32 %v5521_v13, %v5297_v63  ;;  %v5295_v33 = vadd.f32 %v10061_v56, %v5240_v52 }
 0x9f8   : > { %5553 = vst [vmem:[%s10072_s4 + $0x38] sm:$0xff] %v5537_v60  ;;  %v5535_v3 = vadd.f32 %v5519_v17, %v5295_v33  ;;  %v6483_v12 = vpop.f32.mrf.mxu1 }
 0x9f9   : > { %v5300_v51 = vadd.f32 %v6483_v12, %v10061_v56 }
 0x9fa   : > { %5551 = vst [vmem:[%s10072_s4 + $0x28] sm:$0xff] %v5535_v3  ;;  %v5253_v48 = vpop.f32.mrf.mxu1 }
 0x9fb   : > { %v5540_v41 = vadd.f32 %v5524_v18, %v5300_v51  ;;  %v5298_v0 = vadd.f32 %v10061_v56, %v5253_v48 }
 0x9fc   : > { %v6484_v4 = vpop.f32.mrf.mxu1 }
 0x9fd   : > { %5556 = vst [vmem:[%s10072_s4 + $0x50] sm:$0xff] %v5540_v41  ;;  %v5538_v62 = vadd.f32 %v5522_v61, %v5298_v0  ;;  %v5301_v15 = vadd.f32 %v6484_v4, %v10061_v56 }
 0x9fe   : > { %v5256_v23 = vpop.f32.mrf.mxu1 }
 0x9ff   : > { %5554 = vst [vmem:[%s10072_s4 + $0x40] sm:$0xff] %v5538_v62  ;;  %v5541_v14 = vadd.f32 %v5525_v26, %v5301_v15  ;;  %v5299_v49 = vadd.f32 %v10061_v56, %v5256_v23 }
 0xa00   : > { %v6487_v22 = vpop.f32.mrf.mxu1 }
 0xa01   : > { %5557 = vst [vmem:[%s10072_s4 + $0x58] sm:$0xff] %v5541_v14  ;;  %v5539_v44 = vadd.f32 %v5523_v11, %v5299_v49  ;;  %v5304_v42 = vadd.f32 %v6487_v22, %v10061_v56 }
 0xa02   : > { %v5269_v55 = vpop.f32.mrf.mxu1 }
 0xa03   : > { %5555 = vst [vmem:[%s10072_s4 + $0x48] sm:$0xff] %v5539_v44  ;;  %v5302_v57 = vadd.f32 %v10061_v56, %v5269_v55 }
 0xa04   : > { %v6488_v35 = vpop.f32.mrf.mxu1 }
 0xa05   : > { %v5305_v16 = vadd.f32 %v6488_v35, %v10061_v56 }
 0xa06   : > { %v5272_v21 = vpop.f32.mrf.mxu1 }
 0xa07   : > { %v5303_v54 = vadd.f32 %v10061_v56, %v5272_v21 }
 0xa08   : > { %v6519_v2 = vpop.f32.mrf.mxu1 }
 0xa09   : > { %v5479_v8 = vadd.f32 %v6519_v2, %v10054_v38 }
 0xa0a   : > { %v5444_v34 = vpop.f32.mrf.mxu1 }
 0xa0b   : > { %v5528_v10 = vadd.f32 %v5511_v53, %v5479_v8  ;;  %v5477_v59 = vadd.f32 %v10054_v38, %v5444_v34 }
 0xa0c   : > { %v6520_v25 = vpop.f32.mrf.mxu1 }
 0xa0d   : > { %v5544_v5 = vadd.f32 %v5528_v10, %v5304_v42  ;;  %v5526_v37 = vadd.f32 %v5511_v53, %v5477_v59  ;;  %v5480_v29 = vadd.f32 %v6520_v25, %v10054_v38 }
 0xa0e   : > { %v5447_v39 = vpop.f32.mrf.mxu1 }
 0xa0f   : > { %5560 = vst [vmem:[%s10072_s4 + $0x70] sm:$0xff] %v5544_v5  ;;  %v5542_v45 = vadd.f32 %v5526_v37, %v5302_v57  ;;  %v5529_v50 = vadd.f32 %v5511_v53, %v5480_v29  ;;  %v5478_v32 = vadd.f32 %v10054_v38, %v5447_v39 }
 0xa11   : > { %5558 = vst [vmem:[%s10072_s4 + $0x60] sm:$0xff] %v5542_v45  ;;  %v5545_v1 = vadd.f32 %v5529_v50, %v5305_v16  ;;  %v5527_v43 = vadd.f32 %v5511_v53, %v5478_v32 }
 0xa13   : > { %5561 = vst [vmem:[%s10072_s4 + $0x78] sm:$0xff] %v5545_v1  ;;  %v5543_v9 = vadd.f32 %v5527_v43, %v5303_v54 }
 0xa15   : > { %5559 = vst [vmem:[%s10072_s4 + $0x68] sm:$0xff] %v5543_v9 }
 0xa16   : > { %7175 = shalt.err (!%p7172_p6)
}
 0xa17   : > { %s7176_s7 = scalar_lea.hbm %s10119_s5, 2048  ;;  %s7180_s3 = scalar_lea.hbm %s10484_s1, 4096 }
 0xa18   : > { %p7177_p10 = scmp.ne.s32.totalorder %s10119_s5, %s7176_s7  ;;  %p7181_p9 = scmp.lt.s32.totalorder %s10119_s5, %s10484_s1 }
 0xa19   : > { %p7182_p8 = scmp.lt.s32.totalorder %s7180_s3, %s7176_s7 }
 0xa1a   : > { %p7178_p2 = pnand %p7177_p10, %p10485_p13 }
 0xa1b   : > { %p7183_p7 = por %p7182_p8, %p7181_p9 }
 0xa1c   : > { %p7179_p4 = pneg %p7178_p2 }
 0xa1e   : > { %p7184_p11 = pnand %p7183_p7, %p7179_p4 }
 0xa20   : > { %7187 = shalt.err (!%p7184_p11)
}
 0xa21   : > { %s7266_s24 = smov 128   ;;  %s7267_s8 = smov 8  }
 0xa22   : > { %6577 = dma.vmem_to_hbm [thread:$0]  (%p10485_p13), %s10121_s20, 2048, %s10119_s5, %s10127_s6, %s7266_s24, %s7266_s24, %s7267_s8  }
 0xa23 PF: > { %s10486_s2 = sld [smem:[#allocation29_spill]] }
 0xa24   : > { %s10487_s4 = sld [smem:[#allocation27_spill]] }
 0xa25   : > { %s10488_s28 = sld [smem:[#allocation33_spill]] }
 0xa29   : > { %p6634_p0 = scmp.ge.s32.totalorder %s10486_s2, 2 }
 0xa2a   : > { %s5592_s9 = sand.u32 1, %s10487_s4  }
 0xa2b   : > { %p10489_p3 = scmp.ne.s32.totalorder %s10488_s28, 0  ;;  %s5593_s7 = scalar_lea.sflag [#allocation4], %s5592_s9 }
 0xa2d   : > { %p6611_p1 = pnand %p6634_p0, %p10489_p3 }
 0xa2f   : > { %p6612_p5 = pneg %p6611_p1 }
 0xa31   : > { %7229 = dma.done.wait (%p6612_p5), %s5593_s7, 2048  }
 0xa32   : > { %7231 = vsyncadd (%p6612_p5), %s5593_s7, 4294965248  ;;  %s10490_s28 = sld [smem:[#allocation30_spill]]  ;;  %s10493_s5 = smov %s7238_s26 }
 0xa33   : > { %s10491_s3 = sld [smem:[#allocation28_spill]] }
 0xa34   : > { %s10492_s27 = sld [smem:[#allocation31_spill]] }
 0xa38   : > { %p40_p12 = scmp.ge.s32.totalorder %s10490_s28, 4  }
 0xa39   : > { %s10494_s26 = smov %s10491_s3 }
 0xa3a   :  { %42 = sbr.rel (!%p40_p12) target bundleno = 22 (0x16), region = 192 }
 0xa3f   :  { %5598 = vsyncpa [#allocation3], 1 }
 0xa40   :  { %5600 = vsyncpa [#allocation3 + $0x1], 1 }
 0xa41   :  { %5601 = vsyncpa [#allocation6], 1 }
 0xa42   :  { %5602 = vsyncpa [#allocation9], 1 }
 0xa43   :  { %5603 = vsyncpa [#allocation12], 1 }
 0xa44   :  { %5604 = vsyncpa [#allocation15], 1 }
 0xa45   :  { %5605 = vsyncpa [#allocation18], 1 }
 0xa46   :  { %5606 = vsyncpa [#allocation4], 1 }
 0xa47   :  { %5608 = vsyncpa [#allocation4 + $0x1], 1 }

</bundles_post_ra>
